<compile_context>
chip_gen: v5e
topology: v5e:2x2
jax: 0.10.0
libtpu: 0.0.40
codegen_flags: <defaults>
</compile_context>

<pallas_src>
import functools
import math

import jax
import jax.numpy as jnp
from jax.experimental import pallas as pl
from jax.experimental.pallas import tpu as pltpu

D_MODEL = 512
VOCAB = 1000


def _round_up(x, m):
    return ((x + m - 1) // m) * m


def _pick_tok_block(n_tok_pad, max_tok_block):
    """Largest multiple-of-8 divisor of n_tok_pad that is <= max_tok_block,
    preferring choices that leave >= 2 grid steps (keeps both v7x TCs busy)."""
    divisors = [d for d in range(8, min(max_tok_block, n_tok_pad) + 1, 8)
                if n_tok_pad % d == 0]
    if not divisors:
        return min(max_tok_block, n_tok_pad)
    multi = [d for d in divisors if n_tok_pad // d >= 2]
    return max(multi) if multi else max(divisors)


def _embed_kernel(ids_ref, hi_ref, lo_ref, out_ref, *, scale):
    # ids_ref: (tok_block, 1)        int32   token ids for this block
    # hi_ref : (vocab_pad, d_pad)    bf16    high half of table (resident)
    # lo_ref : (vocab_pad, d_pad)    bf16    low-residual half   (resident)
    # out_ref: (tok_block, d_pad)    f32     scaled embeddings
    tok_block = out_ref.shape[0]
    vocab_pad = hi_ref.shape[0]

    ids = ids_ref[...]  # (tok_block, 1)
    col = jax.lax.broadcasted_iota(jnp.int32, (tok_block, vocab_pad), 1)
    # 0/1 is exact in bf16 -> the MXU gather is exact row selection.
    one_hot = (col == ids).astype(jnp.bfloat16)  # (tok_block, vocab_pad)

    hi = jnp.dot(one_hot, hi_ref[...], preferred_element_type=jnp.float32)
    lo = jnp.dot(one_hot, lo_ref[...], preferred_element_type=jnp.float32)

    # sqrt(d_model) scale fused here (VPU filler under the store).
    out_ref[...] = ((hi + lo) * jnp.float32(scale)).astype(out_ref.dtype)


def prepare_embedding_table(table):
    """One-time (init) prep: pad to (8,128)-friendly shape and split the f32
    table into a bf16 hi/lo pair for the exact-selection MXU gather."""
    vocab, d_model = table.shape
    vocab_pad = _round_up(vocab, 128)
    d_pad = _round_up(d_model, 128)

    t32 = table.astype(jnp.float32)
    hi = t32.astype(jnp.bfloat16)
    lo = (t32 - hi.astype(jnp.float32)).astype(jnp.bfloat16)

    hi_pad = jnp.zeros((vocab_pad, d_pad), jnp.bfloat16).at[:vocab, :d_model].set(hi)
    lo_pad = jnp.zeros((vocab_pad, d_pad), jnp.bfloat16).at[:vocab, :d_model].set(lo)
    return hi_pad, lo_pad, vocab, d_model


def embeddings_forward(ids, prepared, *, max_tok_block=1024):
    """ids: (batch, seq) int32 token ids; prepared = prepare_embedding_table(w).

    Returns (batch, seq, d_model) float32 = w[ids] * sqrt(d_model).
    Note: out-of-range / negative ids yield all-zero rows (PyTorch would raise).
    """
    hi_pad, lo_pad, vocab, d_model = prepared
    vocab_pad, d_pad = hi_pad.shape
    batch, seq = ids.shape
    n_tok = batch * seq

    n_tok_pad = _round_up(n_tok, 8)
    tok_block = _pick_tok_block(n_tok_pad, max_tok_block)
    n_grid = n_tok_pad // tok_block

    ids_flat = ids.reshape(n_tok).astype(jnp.int32)
    if n_tok_pad != n_tok:
        ids_flat = jnp.concatenate(
            [ids_flat, jnp.zeros((n_tok_pad - n_tok,), jnp.int32)])
    ids_col = ids_flat.reshape(n_tok_pad, 1)
    # TODO(synk): if VMEM gets tight on v7x at tok_block>=1024, switch ids to a
    # lane-dense (1, tok_block) layout with a transposed one-hot.

    cost = pl.CostEstimate(
        flops=4 * n_tok_pad * vocab_pad * d_pad,          # two bf16 matmuls
        transcendentals=0,
        bytes_accessed=(n_tok_pad * 4                      # ids
                        + 2 * vocab_pad * d_pad * 2        # hi + lo (bf16)
                        + n_tok_pad * d_pad * 4),          # f32 output
    )

    out = pl.pallas_call(
        functools.partial(_embed_kernel, scale=math.sqrt(d_model)),
        grid=(n_grid,),
        in_specs=[
            # Token-id tile for this block (vector data in VMEM).
            pl.BlockSpec((tok_block, 1), lambda i: (i, 0)),
            # Resident table halves: constant index_map + single buffer.
            pl.BlockSpec((vocab_pad, d_pad), lambda i: (0, 0),
                         pipeline_mode=pl.Buffered(1)),
            pl.BlockSpec((vocab_pad, d_pad), lambda i: (0, 0),
                         pipeline_mode=pl.Buffered(1)),
        ],
        out_specs=pl.BlockSpec((tok_block, d_pad), lambda i: (i, 0)),
        out_shape=jax.ShapeDtypeStruct((n_tok_pad, d_pad), jnp.float32),
        compiler_params=pltpu.CompilerParams(
            dimension_semantics=("parallel",),
            vmem_limit_bytes=32 * 1024 * 1024,
        ),
        cost_estimate=cost,
    )(ids_col, hi_pad, lo_pad)

    # Slice only if padding actually happened (no-op copy avoided otherwise).
    if n_tok_pad != n_tok or d_pad != d_model:
        out = out[:n_tok, :d_model]
    return out.reshape(batch, seq, d_model)


if __name__ == "__main__":
    key = jax.random.PRNGKey(0)
    k_ids, k_tab = jax.random.split(key)

    batch, seq = 2, 8
    # Deterministic synthetic "nn.Embedding" weight (vocab, d_model).
    table = jax.random.normal(k_tab, (VOCAB, D_MODEL), dtype=jnp.float32)
    # Integer token ids (the PyTorch module expects LongTensor indices).
    ids = jax.random.randint(k_ids, (batch, seq), 0, VOCAB, dtype=jnp.int32)

    prepared = prepare_embedding_table(table)   # init-time, not per-call
    out = embeddings_forward(ids, prepared)
    out = jax.block_until_ready(out)

    # Pure-JAX f32 reference. The bf16 hi/lo split recovers ~16-17 mantissa
    # bits, so comparison against the full-f32 reference uses a matching
    # (relative ~2^-16) tolerance.
    ref = jnp.take(table, ids, axis=0) * jnp.float32(math.sqrt(D_MODEL))
    assert out.shape == (batch, seq, D_MODEL)
    assert jnp.allclose(out, ref, rtol=1e-4, atol=1e-4), \
        float(jnp.max(jnp.abs(out - ref)))

    print("KERNEL_OK")
</pallas_src>

<mosaic_0001>
module attributes {stable_mosaic.version = 11 : i64} {
  func.func @_embed_kernel(%arg0: i32, %arg1: memref<8x1xi32, #tpu.memory_space<vmem>>, %arg2: memref<1024x512xbf16, #tpu.memory_space<vmem>>, %arg3: memref<1024x512xbf16, #tpu.memory_space<vmem>>, %arg4: memref<8x512xf32, #tpu.memory_space<vmem>>) attributes {dimension_semantics = [#tpu.dimension_semantics<parallel>], iteration_bounds = array<i64: 2>, scalar_prefetch = 0 : i64, scratch_operands = 0 : i64, tpu.core_type = #tpu.core_type<tc>, window_params = [{transform_indices = @transform_0, window_bounds = array<i64: 8, 1>}, {pipeline_mode = #tpu.pipeline_mode<synchronous>, transform_indices = @transform_1, window_bounds = array<i64: 1024, 512>}, {pipeline_mode = #tpu.pipeline_mode<synchronous>, transform_indices = @transform_2, window_bounds = array<i64: 1024, 512>}, {transform_indices = @transform_3, window_bounds = array<i64: 8, 512>}]} {
    %c0 = arith.constant 0 : index
    %c0_0 = arith.constant 0 : index
    %0 = vector.load %arg1[%c0, %c0_0] : memref<8x1xi32, #tpu.memory_space<vmem>>, vector<8x1xi32>
    %1 = tpu.iota {dimensions = array<i32: 1>} : vector<8x1024xi32>
    %2 = vector.broadcast %0 : vector<8x1xi32> to vector<8x1024xi32>
    %3 = arith.cmpi eq, %1, %2 : vector<8x1024xi32>
    %4 = arith.extui %3 : vector<8x1024xi1> to vector<8x1024xi32>
    %5 = arith.sitofp %4 : vector<8x1024xi32> to vector<8x1024xf32>
    %6 = arith.truncf %5 : vector<8x1024xf32> to vector<8x1024xbf16>
    %c0_1 = arith.constant 0 : index
    %c0_2 = arith.constant 0 : index
    %7 = vector.load %arg2[%c0_1, %c0_2] : memref<1024x512xbf16, #tpu.memory_space<vmem>>, vector<1024x512xbf16>
    %cst = arith.constant dense<0.000000e+00> : vector<8x512xf32>
    %8 = tpu.matmul %6, %7, %cst {dimension_numbers = #tpu.dot_dimension_numbers<[1], [0], [0], [1], [0, 0, 1, 1], [], []>} : vector<8x1024xbf16>, vector<1024x512xbf16>, vector<8x512xf32> -> vector<8x512xf32>
    %c0_3 = arith.constant 0 : index
    %c0_4 = arith.constant 0 : index
    %9 = vector.load %arg3[%c0_3, %c0_4] : memref<1024x512xbf16, #tpu.memory_space<vmem>>, vector<1024x512xbf16>
    %cst_5 = arith.constant dense<0.000000e+00> : vector<8x512xf32>
    %10 = tpu.matmul %6, %9, %cst_5 {dimension_numbers = #tpu.dot_dimension_numbers<[1], [0], [0], [1], [0, 0, 1, 1], [], []>} : vector<8x1024xbf16>, vector<1024x512xbf16>, vector<8x512xf32> -> vector<8x512xf32>
    %11 = arith.addf %8, %10 : vector<8x512xf32>
    %cst_6 = arith.constant 22.6274166 : f32
    %12 = vector.broadcast %cst_6 : f32 to vector<8x512xf32>
    %13 = arith.mulf %11, %12 : vector<8x512xf32>
    %c0_7 = arith.constant 0 : index
    %c0_8 = arith.constant 0 : index
    %14 = vector.load %arg4[%c0_7, %c0_8] : memref<8x512xf32, #tpu.memory_space<vmem>>, vector<8x512xf32>
    tpu.vector_store %arg4[%c0_7, %c0_8], %13 {strides = array<i32>} : memref<8x512xf32, #tpu.memory_space<vmem>>, vector<8x512xf32>,
    return
  }
  func.func @transform_0(%arg0: i32) -> (i32, i32) {
    %c0_i32 = arith.constant 0 : i32
    %c0_i32_0 = arith.constant 0 : i32
    return %arg0, %c0_i32 : i32, i32
  }
  func.func @transform_1(%arg0: i32) -> (i32, i32) {
    %c0_i32 = arith.constant 0 : i32
    %c0_i32_0 = arith.constant 0 : i32
    %c0_i32_1 = arith.constant 0 : i32
    return %c0_i32, %c0_i32_0 : i32, i32
  }
  func.func @transform_2(%arg0: i32) -> (i32, i32) {
    %c0_i32 = arith.constant 0 : i32
    %c0_i32_0 = arith.constant 0 : i32
    %c0_i32_1 = arith.constant 0 : i32
    return %c0_i32, %c0_i32_0 : i32, i32
  }
  func.func @transform_3(%arg0: i32) -> (i32, i32) {
    %c0_i32 = arith.constant 0 : i32
    %c0_i32_0 = arith.constant 0 : i32
    return %arg0, %c0_i32 : i32, i32
  }
}

</mosaic_0001>

<bundles_post_ra>
// kernel: tpu_custom_call.1
= control target key start
LH: loop header
LB: loop body
LE: loop exit
PB: predicated region body
PF: predicated region fallthrough
CT: control target
= control target key end

     0   :  { %8 = vsyncpa [#allocation3], 0  ;;  %s7615_s0 = inlined_call_operand.vmem [shape: s32[16,1], index: 0, kind: input, shape index: {}]   ;;  %s7616_s1 = inlined_call_operand.hbm [shape: bf16[1024,512], index: 1, kind: input, shape index: {}]   ;;  %s7617_s2 = inlined_call_operand.hbm [shape: bf16[1024,512], index: 2, kind: input, shape index: {}]   ;;  %s7618_s3 = inlined_call_operand.hbm [shape: f32[16,512], index: 3, kind: output, shape index: {}]  }
   0x1   :  { %9 = vsyncpa [#allocation6], 0 }
   0x2   :  { %10 = vsyncpa [#allocation4], 0 }
   0x3   :  { %12 = vsyncpa [#allocation4 + $0x1], 0  ;;  %s7190_s12 = smov 0   ;;  %s7192_s13 = smov 0  }
   0x4   :  { %s7194_s14 = smov 0   ;;  %s7196_s15 = smov 0  }
   0x5 LB: > { %s7211_s16 = sadd.s32 4294967295, %s7162_s15   ;;  %s4255_s17 = sadd.s32 4294967294, %s7162_s15   ;;  %s7162_s15 = sphi %s7196_s15, %s7641_s15   ;;  %s7158_s14 = sphi %s7194_s14, %s7640_s14   ;;  %s7154_s13 = sphi %s7192_s13, %s7639_s13   ;;  %s7150_s12 = sphi %s7190_s12, %s7638_s12  }
   0x6   : > { %s7215_s18 = sadd.s32 1, %s7162_s15   ;;  %s93_s19 = sadd.s32 1, %s7158_s14 }
   0x7   : > { %s90_s20 = ssub.s32 %s7162_s15, %s7215_s18  ;;  %p103_p0 = scmp.ne.s32.totalorder %s7158_s14, %s7154_s13 }
   0x8   : > { %p91_p1 = scmp.eq.s32.totalorder %s90_s20, 0  ;;  %p104_p2 = scmp.eq.s32.totalorder %s7211_s16, 1 }
   0x9   : > { %p109_p3 = scmp.ne.s32.totalorder %s7154_s13, %s7150_s12  ;;  %p110_p4 = scmp.eq.s32.totalorder %s4255_s17, 1 }
   0xa   : > { %s7226_s21 = scalar_select %p91_p1, %s7158_s14, %s93_s19  }
   0xb   : > { %p7228_p5 = por %p104_p2, %p103_p0  ;;  %p7232_p6 = por %p110_p4, %p109_p3 }
   0xc   : > { %p4256_p7 = scmp.ge.s32.totalorder %s7162_s15, 1  ;;  %p117_p8 = scmp.lt.s32.totalorder %s7162_s15, 3 }
   0xd   : > { %p6988_p9 = scmp.eq.s32.totalorder %s7211_s16, 0  ;;  %s128_s27 = sshll.u32 %s7616_s1, 4  ;;  %s129_s27 = int_to_ptr.hbm [resolvable:$true] %s128_s27 }
   0xe   : > { %p7239_p10 = pnand %p4256_p7, %p117_p8  ;;  %s7164_s28 = smov [#allocation2]  }
   0xf   : > { %s130_s29 = sshll.u32 %s7164_s28, 4  ;;  %s142_s5 = sshll.u32 %s7617_s2, 4  ;;  %s131_s29 = int_to_ptr.vmem [resolvable:$true] %s130_s29  ;;  %s143_s5 = int_to_ptr.hbm [resolvable:$true] %s142_s5 }
  0x10   : > { %p6977_p11 = pneg %p7239_p10  ;;  %s7165_s6 = smov 256  }
  0x11   : > { %s7166_s7 = smov 16   ;;  %s7167_s8 = smov [#allocation5]  }
  0x12   : > { %p6978_p12 = pnand %p6988_p9, %p6977_p11  ;;  %s144_s9 = sshll.u32 %s7167_s8, 4  ;;  %s145_s9 = int_to_ptr.vmem [resolvable:$true] %s144_s9 }
  0x13   : > { %167 = sbr.rel (%p7239_p10) target bundleno = 743 (0x2e7), region = 32 }
  0x14   : > { %6980 = dma.hbm_to_vmem [thread:$0]  (!%p6978_p12), %s129_s27, 32768, %s131_s29, [#allocation3], %s7165_s6, %s7165_s6, %s7166_s7  }
  0x15   : > { %6983 = dma.hbm_to_vmem [thread:$0]  (!%p6978_p12), %s143_s5, 32768, %s145_s9, [#allocation6], %s7165_s6, %s7165_s6, %s7166_s7  }
  0x18   : > { %7137 = dma.done.wait (%p6988_p9), [#allocation3], 32768  }
  0x19   : > { %7139 = vsyncadd (%p6988_p9), [#allocation3], 4294934528 }
  0x1a   : > { %7141 = dma.done.wait (%p6988_p9), [#allocation6], 32768  }
  0x1b   : > { %7143 = vsyncadd (%p6988_p9), [#allocation6], 4294934528  ;;  %p196_p13 = scmp.lt.s32.totalorder %s7211_s16, 1  ;;  %v7168_v0 = vmov 0   ;;  %v4387_v2 = vld [vmem:[#allocation5 + $0xe0] sm:$0xf] }
  0x1c   : > { %7031 = vset.pattern.permute.xlu0 %v7168_v0  ;;  %v6740_v3 = vld [vmem:[#allocation5 + $0xec] sm:$0xf0]  ;;  %v4515_v5 = vld [vmem:[#allocation5 + $0x1e0] sm:$0xf]  ;;  %s193_s24 = sand.u32 1, %s7154_s13   ;;  %s6966_s27 = sshll.u32 %s7211_s16, 5 }
  0x1d   : > { %s197_s10 = scalar_select %p196_p13, %s7211_s16, 1  ;;  %v4388_v4 = vor.u32 %v6740_v3, %v4387_v2  ;;  %v6772_v6 = vld [vmem:[#allocation5 + $0x1ec] sm:$0xf0]  ;;  %v4643_v7 = vld [vmem:[#allocation5 + $0x2e0] sm:$0xf] }
  0x1e   : > { %v4516_v8 = vor.u32 %v6772_v6, %v4515_v5  ;;  %v6804_v9 = vld [vmem:[#allocation5 + $0x2ec] sm:$0xf0]  ;;  %v4771_v10 = vld [vmem:[#allocation5 + $0x3e0] sm:$0xf]  ;;  %s7539_s25 = sshll.u32 %s193_s24, 5  ;;  %s4169_s30 = scalar_lea.hbm %s7618_s3, %s6966_s27 }
  0x1f   : > { %s4264_s11 = sshll.u32 %s197_s10, 3  ;;  %v6836_v11 = vld [vmem:[#allocation5 + $0x3ec] sm:$0xf0]  ;;  %2037 = vmatpush.bf16.msra.mxu0 %v4388_v4  ;;  %v4644_v12 = vor.u32 %v6804_v9, %v4643_v7  ;;  %v4371_v14 = vld [vmem:[#allocation5 + $0xc0] sm:$0xf]  ;;  %s7542_s26 = scalar_lea.vmem [#allocation7], %s7539_s25 }
  0x20   : > { %s199_s20 = scalar_lea.vmem %s7615_s0, %s4264_s11  ;;  %v4772_v13 = vor.u32 %v6836_v11, %v4771_v10  ;;  %v6736_v15 = vld [vmem:[#allocation5 + $0xcc] sm:$0xf0]  ;;  %v4499_v16 = vld [vmem:[#allocation5 + $0x1c0] sm:$0xf]  ;;  %2050 = vmatpush.bf16.msra.mxu1 %v4516_v8  ;;  %s4171_s4 = sshll.u32 %s7542_s26, 4  ;;  %s4172_s4 = int_to_ptr.vmem [resolvable:$true] %s4171_s4 }
  0x21   : > { %v200_v1 = vld [vmem:[%s199_s20] sm:$0xff]  ;;  %v4372_v17 = vor.u32 %v6736_v15, %v4371_v14  ;;  %v6768_v18 = vld [vmem:[#allocation5 + $0x1cc] sm:$0xf0]  ;;  %2063 = vmatpush.bf16.msra.mxu2 %v4644_v12  ;;  %s4173_s5 = sshll.u32 %s4169_s30, 4  ;;  %s4158_s16 = scalar_lea.sflag [#allocation4], %s193_s24  ;;  %s4174_s5 = int_to_ptr.hbm [resolvable:$true] %s4173_s5 }
  0x22   : > { %211 = vperm.xlu0 %7031, %v200_v1   ;;  %v4627_v19 = vld [vmem:[#allocation5 + $0x2c0] sm:$0xf]  ;;  %v6800_v20 = vld [vmem:[#allocation5 + $0x2cc] sm:$0xf0]  ;;  %2076 = vmatpush.bf16.msra.mxu3 %v4772_v13  ;;  %v4500_v21 = vor.u32 %v6768_v18, %v4499_v16  ;;  %s7106_s6 = sshra.s32 %s4174_s5, 4  ;;  %s7112_s10 = scalar_lea.hbm %s7618_s3, 64  ;;  %s7107_s6 = int_to_ptr.hbm [resolvable:$true] %s7106_s6 }
  0x23   : > { %v4628_v22 = vor.u32 %v6800_v20, %v4627_v19  ;;  %v4755_v23 = vld [vmem:[#allocation5 + $0x3c0] sm:$0xf]  ;;  %v6832_v24 = vld [vmem:[#allocation5 + $0x3cc] sm:$0xf0]  ;;  %2038 = vmatpush.bf16.msra.mxu0 %v4372_v17  ;;  %s7108_s7 = scalar_lea.hbm %s7107_s6, 32  ;;  %p7113_p3 = scmp.lt.s32.totalorder %s7107_s6, %s7618_s3 }
  0x24   : > { %v4355_v25 = vld [vmem:[#allocation5 + $0xa0] sm:$0xf]  ;;  %v4756_v26 = vor.u32 %v6832_v24, %v4755_v23  ;;  %v6732_v27 = vld [vmem:[#allocation5 + $0xac] sm:$0xf0]  ;;  %2051 = vmatpush.bf16.msra.mxu1 %v4500_v21  ;;  %p7109_p0 = scmp.ne.s32.totalorder %s7107_s6, %s7108_s7  ;;  %p7114_p4 = scmp.lt.s32.totalorder %s7112_s10, %s7108_s7 }
  0x25   : > { %v4483_v28 = vld [vmem:[#allocation5 + $0x1a0] sm:$0xf]  ;;  %v6764_v29 = vld [vmem:[#allocation5 + $0x1ac] sm:$0xf0]  ;;  %v4356_v30 = vor.u32 %v6732_v27, %v4355_v25  ;;  %2064 = vmatpush.bf16.msra.mxu2 %v4628_v22 }
  0x26   : > { %v4611_v31 = vld [vmem:[#allocation5 + $0x2a0] sm:$0xf]  ;;  %v6796_v32 = vld [vmem:[#allocation5 + $0x2ac] sm:$0xf0]  ;;  %v4484_v34 = vor.u32 %v6764_v29, %v4483_v28  ;;  %2077 = vmatpush.bf16.msra.mxu3 %v4756_v26  ;;  %p7110_p1 = pnand %p7109_p0, %p7228_p5  ;;  %p7115_p7 = por %p7114_p4, %p7113_p3 }
  0x27   : > { %v4739_v33 = vld [vmem:[#allocation5 + $0x3a0] sm:$0xf]  ;;  %v6828_v35 = vld [vmem:[#allocation5 + $0x3ac] sm:$0xf0]  ;;  %v4612_v38 = vor.u32 %v6796_v32, %v4611_v31  ;;  %2039 = vmatpush.bf16.msra.mxu0 %v4356_v30 }
  0x28   : > { %v4339_v36 = vld [vmem:[#allocation5 + $0x80] sm:$0xf]  ;;  %v6728_v37 = vld [vmem:[#allocation5 + $0x8c] sm:$0xf0]  ;;  %v4740_v39 = vor.u32 %v6828_v35, %v4739_v33  ;;  %2052 = vmatpush.bf16.msra.mxu1 %v4484_v34  ;;  %p7111_p2 = pneg %p7110_p1 }
  0x29   : > { %v4467_v40 = vld [vmem:[#allocation5 + $0x180] sm:$0xf]  ;;  %v6760_v41 = vld [vmem:[#allocation5 + $0x18c] sm:$0xf0]  ;;  %v4340_v46 = vor.u32 %v6728_v37, %v4339_v36  ;;  %2065 = vmatpush.bf16.msra.mxu2 %v4612_v38 }
  0x2a   : > { %v4595_v42 = vld [vmem:[#allocation5 + $0x280] sm:$0xf]  ;;  %v6792_v43 = vld [vmem:[#allocation5 + $0x28c] sm:$0xf0]  ;;  %v4468_v47 = vor.u32 %v6760_v41, %v4467_v40  ;;  %2078 = vmatpush.bf16.msra.mxu3 %v4740_v39  ;;  %p7116_p8 = pnand %p7115_p7, %p7111_p2 }
  0x2b   : > { %v4723_v44 = vld [vmem:[#allocation5 + $0x380] sm:$0xf]  ;;  %v6824_v45 = vld [vmem:[#allocation5 + $0x38c] sm:$0xf0]  ;;  %v4596_v50 = vor.u32 %v6792_v43, %v4595_v42  ;;  %2040 = vmatpush.bf16.msra.mxu0 %v4340_v46 }
  0x2c   : > { %v4323_v48 = vld [vmem:[#allocation5 + $0x60] sm:$0xf]  ;;  %v6724_v49 = vld [vmem:[#allocation5 + $0x6c] sm:$0xf0]  ;;  %v4724_v51 = vor.u32 %v6824_v45, %v4723_v44  ;;  %2053 = vmatpush.bf16.msra.mxu1 %v4468_v47 }
  0x2d   : > { %v4451_v52 = vld [vmem:[#allocation5 + $0x160] sm:$0xf]  ;;  %v6756_v53 = vld [vmem:[#allocation5 + $0x16c] sm:$0xf0]  ;;  %v4324_v58 = vor.u32 %v6724_v49, %v4323_v48  ;;  %2066 = vmatpush.bf16.msra.mxu2 %v4596_v50 }
  0x2e   : > { %v4579_v54 = vld [vmem:[#allocation5 + $0x260] sm:$0xf]  ;;  %v6788_v55 = vld [vmem:[#allocation5 + $0x26c] sm:$0xf0]  ;;  %v4452_v59 = vor.u32 %v6756_v53, %v4451_v52  ;;  %2079 = vmatpush.bf16.msra.mxu3 %v4724_v51 }
  0x2f   : > { %v4707_v56 = vld [vmem:[#allocation5 + $0x360] sm:$0xf]  ;;  %v6820_v57 = vld [vmem:[#allocation5 + $0x36c] sm:$0xf0]  ;;  %v4580_v62 = vor.u32 %v6788_v55, %v4579_v54  ;;  %2041 = vmatpush.bf16.msra.mxu0 %v4324_v58 }
  0x30   : > { %v4307_v60 = vld [vmem:[#allocation5 + $0x40] sm:$0xf]  ;;  %v6720_v61 = vld [vmem:[#allocation5 + $0x4c] sm:$0xf0]  ;;  %v4708_v63 = vor.u32 %v6820_v57, %v4707_v56  ;;  %2054 = vmatpush.bf16.msra.mxu1 %v4452_v59 }
  0x31   : > { %v4435_v0 = vld [vmem:[#allocation5 + $0x140] sm:$0xf]  ;;  %v6752_v1 = vld [vmem:[#allocation5 + $0x14c] sm:$0xf0]  ;;  %v4308_v6 = vor.u32 %v6720_v61, %v4307_v60  ;;  %2067 = vmatpush.bf16.msra.mxu2 %v4580_v62 }
  0x32   : > { %v4563_v2 = vld [vmem:[#allocation5 + $0x240] sm:$0xf]  ;;  %v6784_v3 = vld [vmem:[#allocation5 + $0x24c] sm:$0xf0]  ;;  %v4436_v7 = vor.u32 %v6752_v1, %v4435_v0  ;;  %2080 = vmatpush.bf16.msra.mxu3 %v4708_v63 }
  0x33   : > { %v4691_v4 = vld [vmem:[#allocation5 + $0x340] sm:$0xf]  ;;  %v6816_v5 = vld [vmem:[#allocation5 + $0x34c] sm:$0xf0]  ;;  %v4564_v10 = vor.u32 %v6784_v3, %v4563_v2  ;;  %2042 = vmatpush.bf16.msra.mxu0 %v4308_v6 }
  0x34   : > { %v4291_v8 = vld [vmem:[#allocation5 + $0x20] sm:$0xf]  ;;  %v6716_v9 = vld [vmem:[#allocation5 + $0x2c] sm:$0xf0]  ;;  %v4692_v11 = vor.u32 %v6816_v5, %v4691_v4  ;;  %2055 = vmatpush.bf16.msra.mxu1 %v4436_v7 }
  0x35   : > { %v4419_v12 = vld [vmem:[#allocation5 + $0x120] sm:$0xf]  ;;  %v6748_v13 = vld [vmem:[#allocation5 + $0x12c] sm:$0xf0]  ;;  %v4292_v18 = vor.u32 %v6716_v9, %v4291_v8  ;;  %2068 = vmatpush.bf16.msra.mxu2 %v4564_v10 }
  0x36   : > { %v4547_v14 = vld [vmem:[#allocation5 + $0x220] sm:$0xf]  ;;  %v6780_v15 = vld [vmem:[#allocation5 + $0x22c] sm:$0xf0]  ;;  %v4420_v21 = vor.u32 %v6748_v13, %v4419_v12  ;;  %2081 = vmatpush.bf16.msra.mxu3 %v4692_v11 }
  0x37   : > { %v4675_v16 = vld [vmem:[#allocation5 + $0x320] sm:$0xf]  ;;  %v6812_v17 = vld [vmem:[#allocation5 + $0x32c] sm:$0xf0]  ;;  %v4548_v25 = vor.u32 %v6780_v15, %v4547_v14  ;;  %2043 = vmatpush.bf16.msra.mxu0 %v4292_v18 }
  0x38   : > { %v4275_v19 = vld [vmem:[#allocation5] sm:$0xf]  ;;  %v6712_v20 = vld [vmem:[#allocation5 + $0xc] sm:$0xf0]  ;;  %v4676_v26 = vor.u32 %v6812_v17, %v4675_v16  ;;  %2056 = vmatpush.bf16.msra.mxu1 %v4420_v21 }
  0x39   : > { %v4403_v22 = vld [vmem:[#allocation5 + $0x100] sm:$0xf]  ;;  %v6744_v23 = vld [vmem:[#allocation5 + $0x10c] sm:$0xf0]  ;;  %v4276_v33 = vor.u32 %v6712_v20, %v4275_v19  ;;  %2069 = vmatpush.bf16.msra.mxu2 %v4548_v25 }
  0x3a   : > { %v4531_v24 = vld [vmem:[#allocation5 + $0x200] sm:$0xf]  ;;  %v6776_v27 = vld [vmem:[#allocation5 + $0x20c] sm:$0xf0]  ;;  %v4404_v37 = vor.u32 %v6744_v23, %v4403_v22  ;;  %2082 = vmatpush.bf16.msra.mxu3 %v4676_v26 }
  0x3b   : > { %v4899_v28 = vld [vmem:[#allocation5 + $0x4e0] sm:$0xf]  ;;  %v6868_v29 = vld [vmem:[#allocation5 + $0x4ec] sm:$0xf0]  ;;  %v4532_v41 = vor.u32 %v6776_v27, %v4531_v24  ;;  %2044 = vmatpush.bf16.msra.mxu0 %v4276_v33 }
  0x3c   : > { %v4659_v30 = vld [vmem:[#allocation5 + $0x300] sm:$0xf]  ;;  %v6808_v31 = vld [vmem:[#allocation5 + $0x30c] sm:$0xf0]  ;;  %v4900_v38 = vor.u32 %v6868_v29, %v4899_v28  ;;  %2057 = vmatpush.bf16.msra.mxu1 %v4404_v37 }
  0x3d   : > { %v5027_v32 = vld [vmem:[#allocation5 + $0x5e0] sm:$0xf]  ;;  %v6900_v34 = vld [vmem:[#allocation5 + $0x5ec] sm:$0xf0]  ;;  %v4660_v42 = vor.u32 %v6808_v31, %v4659_v30  ;;  %2070 = vmatpush.bf16.msra.mxu2 %v4532_v41 }
  0x3e   : > { %v5155_v35 = vld [vmem:[#allocation5 + $0x6e0] sm:$0xf]  ;;  %v6932_v36 = vld [vmem:[#allocation5 + $0x6ec] sm:$0xf0]  ;;  %v5028_v45 = vor.u32 %v6900_v34, %v5027_v32 }
  0x3f   : > { %v5283_v39 = vld [vmem:[#allocation5 + $0x7e0] sm:$0xf]  ;;  %v6964_v40 = vld [vmem:[#allocation5 + $0x7ec] sm:$0xf0]  ;;  %v5156_v46 = vor.u32 %v6932_v36, %v5155_v35  ;;  %2089 = vmatpush.bf16.msrb.mxu0 %v4900_v38  ;;  %2083 = vmatpush.bf16.msra.mxu3 %v4660_v42 }
  0x40   : > { %v4883_v43 = vld [vmem:[#allocation5 + $0x4c0] sm:$0xf]  ;;  %v6864_v44 = vld [vmem:[#allocation5 + $0x4cc] sm:$0xf0]  ;;  %v5284_v48 = vor.u32 %v6964_v40, %v5283_v39  ;;  %2102 = vmatpush.bf16.msrb.mxu1 %v5028_v45 }
  0x41   : > { %v5011_v47 = vld [vmem:[#allocation5 + $0x5c0] sm:$0xf]  ;;  %v6896_v49 = vld [vmem:[#allocation5 + $0x5cc] sm:$0xf0]  ;;  %v4884_v52 = vor.u32 %v6864_v44, %v4883_v43  ;;  %2115 = vmatpush.bf16.msrb.mxu2 %v5156_v46 }
  0x42   : > { %v5139_v50 = vld [vmem:[#allocation5 + $0x6c0] sm:$0xf]  ;;  %v6928_v51 = vld [vmem:[#allocation5 + $0x6cc] sm:$0xf0]  ;;  %v5012_v57 = vor.u32 %v6896_v49, %v5011_v47 }
  0x43   : > { %v5267_v53 = vld [vmem:[#allocation5 + $0x7c0] sm:$0xf]  ;;  %v6960_v54 = vld [vmem:[#allocation5 + $0x7cc] sm:$0xf0]  ;;  %v5140_v58 = vor.u32 %v6928_v51, %v5139_v50  ;;  %2128 = vmatpush.bf16.msrb.mxu3 %v5284_v48  ;;  %2090 = vmatpush.bf16.msrb.mxu0 %v4884_v52 }
  0x44   : > { %v4867_v55 = vld [vmem:[#allocation5 + $0x4a0] sm:$0xf]  ;;  %v6860_v56 = vld [vmem:[#allocation5 + $0x4ac] sm:$0xf0]  ;;  %v5268_v60 = vor.u32 %v6960_v54, %v5267_v53  ;;  %2103 = vmatpush.bf16.msrb.mxu1 %v5012_v57 }
  0x45   : > { %v4995_v59 = vld [vmem:[#allocation5 + $0x5a0] sm:$0xf]  ;;  %v6892_v61 = vld [vmem:[#allocation5 + $0x5ac] sm:$0xf0]  ;;  %v4868_v0 = vor.u32 %v6860_v56, %v4867_v55  ;;  %2116 = vmatpush.bf16.msrb.mxu2 %v5140_v58 }
  0x46   : > { %v5123_v62 = vld [vmem:[#allocation5 + $0x6a0] sm:$0xf]  ;;  %v6924_v63 = vld [vmem:[#allocation5 + $0x6ac] sm:$0xf0]  ;;  %v4996_v5 = vor.u32 %v6892_v61, %v4995_v59 }
  0x47   : > { %v5251_v1 = vld [vmem:[#allocation5 + $0x7a0] sm:$0xf]  ;;  %v6956_v2 = vld [vmem:[#allocation5 + $0x7ac] sm:$0xf0]  ;;  %v5124_v6 = vor.u32 %v6924_v63, %v5123_v62  ;;  %2129 = vmatpush.bf16.msrb.mxu3 %v5268_v60  ;;  %2091 = vmatpush.bf16.msrb.mxu0 %v4868_v0 }
  0x48   : > { %v4851_v3 = vld [vmem:[#allocation5 + $0x480] sm:$0xf]  ;;  %v6856_v4 = vld [vmem:[#allocation5 + $0x48c] sm:$0xf0]  ;;  %v5252_v8 = vor.u32 %v6956_v2, %v5251_v1  ;;  %2104 = vmatpush.bf16.msrb.mxu1 %v4996_v5  ;;  %v201_v2 = vlaneseq }
  0x49   : > { %v4979_v7 = vld [vmem:[#allocation5 + $0x580] sm:$0xf]  ;;  %v6888_v9 = vld [vmem:[#allocation5 + $0x58c] sm:$0xf0]  ;;  %v4852_v12 = vor.u32 %v6856_v4, %v4851_v3  ;;  %2117 = vmatpush.bf16.msrb.mxu2 %v5124_v6  ;;  %v6738_v6 = vld [vmem:[#allocation5 + $0xe4] sm:$0xf] }
  0x4a   : > { %v5107_v10 = vld [vmem:[#allocation5 + $0x680] sm:$0xf]  ;;  %v6920_v11 = vld [vmem:[#allocation5 + $0x68c] sm:$0xf0]  ;;  %v4980_v17 = vor.u32 %v6888_v9, %v4979_v7  ;;  %v7268_v3 = vand.u32 127, %v201_v2 }
  0x4b   : > { %v5235_v13 = vld [vmem:[#allocation5 + $0x780] sm:$0xf]  ;;  %v6952_v14 = vld [vmem:[#allocation5 + $0x78c] sm:$0xf0]  ;;  %v5108_v18 = vor.u32 %v6920_v11, %v5107_v10  ;;  %2130 = vmatpush.bf16.msrb.mxu3 %v5252_v8  ;;  %2092 = vmatpush.bf16.msrb.mxu0 %v4852_v12  ;;  %v4389_v7 = vld [vmem:[#allocation5 + $0xf0] sm:$0xf0] }
  0x4c   : > { %v4835_v15 = vld [vmem:[#allocation5 + $0x460] sm:$0xf]  ;;  %v6852_v16 = vld [vmem:[#allocation5 + $0x46c] sm:$0xf0]  ;;  %v5236_v20 = vor.u32 %v6952_v14, %v5235_v13  ;;  %2105 = vmatpush.bf16.msrb.mxu1 %v4980_v17  ;;  %v203_v4 = vadd.s32 128, %v7268_v3  ;;  %v204_v5 = vadd.s32 256, %v7268_v3  ;;  %v4392_v14 = vor.u32 %v6738_v6, %v4389_v7 }
  0x4d   : > { %v4963_v19 = vld [vmem:[#allocation5 + $0x560] sm:$0xf]  ;;  %v6884_v21 = vld [vmem:[#allocation5 + $0x56c] sm:$0xf0]  ;;  %v4836_v24 = vor.u32 %v6852_v16, %v4835_v15  ;;  %2118 = vmatpush.bf16.msrb.mxu2 %v5108_v18  ;;  %v205_v8 = vadd.s32 384, %v7268_v3 }
  0x4e   : > { %v5091_v22 = vld [vmem:[#allocation5 + $0x660] sm:$0xf]  ;;  %v6916_v23 = vld [vmem:[#allocation5 + $0x66c] sm:$0xf0]  ;;  %v4964_v29 = vor.u32 %v6884_v21, %v4963_v19  ;;  %v6770_v9 = vld [vmem:[#allocation5 + $0x1e4] sm:$0xf] }
  0x4f   : > { %v5219_v25 = vld [vmem:[#allocation5 + $0x760] sm:$0xf]  ;;  %v6948_v26 = vld [vmem:[#allocation5 + $0x76c] sm:$0xf0]  ;;  %v5092_v30 = vor.u32 %v6916_v23, %v5091_v22  ;;  %2131 = vmatpush.bf16.msrb.mxu3 %v5236_v20  ;;  %2093 = vmatpush.bf16.msrb.mxu0 %v4836_v24  ;;  %v4517_v10 = vld [vmem:[#allocation5 + $0x1f0] sm:$0xf0] }
  0x50   : > { %v4819_v27 = vld [vmem:[#allocation5 + $0x440] sm:$0xf]  ;;  %v6848_v28 = vld [vmem:[#allocation5 + $0x44c] sm:$0xf0]  ;;  %v5220_v32 = vor.u32 %v6948_v26, %v5219_v25  ;;  %2106 = vmatpush.bf16.msrb.mxu1 %v4964_v29  ;;  %v6802_v11 = vld [vmem:[#allocation5 + $0x2e4] sm:$0xf]  ;;  %v4520_v17 = vor.u32 %v6770_v9, %v4517_v10 }
  0x51   : > { %v4947_v31 = vld [vmem:[#allocation5 + $0x540] sm:$0xf]  ;;  %v6880_v33 = vld [vmem:[#allocation5 + $0x54c] sm:$0xf0]  ;;  %v4820_v36 = vor.u32 %v6848_v28, %v4819_v27  ;;  %2119 = vmatpush.bf16.msrb.mxu2 %v5092_v30  ;;  %v4645_v12 = vld [vmem:[#allocation5 + $0x2f0] sm:$0xf0] }
  0x52   : > { %v5075_v34 = vld [vmem:[#allocation5 + $0x640] sm:$0xf]  ;;  %v6912_v35 = vld [vmem:[#allocation5 + $0x64c] sm:$0xf0]  ;;  %v4948_v41 = vor.u32 %v6880_v33, %v4947_v31  ;;  %v6834_v15 = vld [vmem:[#allocation5 + $0x3e4] sm:$0xf]  ;;  %v4648_v21 = vor.u32 %v6802_v11, %v4645_v12 }
  0x53   : > { %v5203_v37 = vld [vmem:[#allocation5 + $0x740] sm:$0xf]  ;;  %v6944_v38 = vld [vmem:[#allocation5 + $0x74c] sm:$0xf0]  ;;  %v5076_v42 = vor.u32 %v6912_v35, %v5075_v34  ;;  %2132 = vmatpush.bf16.msrb.mxu3 %v5220_v32  ;;  %2094 = vmatpush.bf16.msrb.mxu0 %v4820_v36  ;;  %v4773_v16 = vld [vmem:[#allocation5 + $0x3f0] sm:$0xf0] }
  0x54   : > { %v4803_v39 = vld [vmem:[#allocation5 + $0x420] sm:$0xf]  ;;  %v6844_v40 = vld [vmem:[#allocation5 + $0x42c] sm:$0xf0]  ;;  %v5204_v44 = vor.u32 %v6944_v38, %v5203_v37  ;;  %2107 = vmatpush.bf16.msrb.mxu1 %v4948_v41  ;;  %v6734_v18 = vld [vmem:[#allocation5 + $0xc4] sm:$0xf]  ;;  %v4776_v26 = vor.u32 %v6834_v15, %v4773_v16 }
  0x55   : > { %v4931_v43 = vld [vmem:[#allocation5 + $0x520] sm:$0xf]  ;;  %v6876_v45 = vld [vmem:[#allocation5 + $0x52c] sm:$0xf0]  ;;  %v4804_v48 = vor.u32 %v6844_v40, %v4803_v39  ;;  %2120 = vmatpush.bf16.msrb.mxu2 %v5076_v42  ;;  %v4373_v19 = vld [vmem:[#allocation5 + $0xd0] sm:$0xf0] }
  0x56   : > { %v5059_v46 = vld [vmem:[#allocation5 + $0x620] sm:$0xf]  ;;  %v6908_v47 = vld [vmem:[#allocation5 + $0x62c] sm:$0xf0]  ;;  %v4932_v51 = vor.u32 %v6876_v45, %v4931_v43  ;;  %v6766_v22 = vld [vmem:[#allocation5 + $0x1c4] sm:$0xf]  ;;  %v4376_v30 = vor.u32 %v6734_v18, %v4373_v19 }
  0x57   : > { %v5187_v49 = vld [vmem:[#allocation5 + $0x720] sm:$0xf]  ;;  %v6940_v50 = vld [vmem:[#allocation5 + $0x72c] sm:$0xf0]  ;;  %v5060_v52 = vor.u32 %v6908_v47, %v5059_v46  ;;  %2133 = vmatpush.bf16.msrb.mxu3 %v5204_v44  ;;  %2095 = vmatpush.bf16.msrb.mxu0 %v4804_v48  ;;  %v4501_v23 = vld [vmem:[#allocation5 + $0x1d0] sm:$0xf0] }
  0x58   : > { %v5188_v53 = vor.u32 %v6940_v50, %v5187_v49  ;;  %2108 = vmatpush.bf16.msrb.mxu1 %v4932_v51  ;;  %v4787_v54 = vld [vmem:[#allocation5 + $0x400] sm:$0xf]  ;;  %v6840_v55 = vld [vmem:[#allocation5 + $0x40c] sm:$0xf0]  ;;  %v7169_v24 = vmov 1.0|1.0   ;;  %v4504_v34 = vor.u32 %v6766_v22, %v4501_v23 }
  0x59   : > { %2121 = vmatpush.bf16.msrb.mxu2 %v5060_v52  ;;  %v4915_v56 = vld [vmem:[#allocation5 + $0x500] sm:$0xf]  ;;  %v4788_v57 = vor.u32 %v6840_v55, %v4787_v54  ;;  %v6872_v58 = vld [vmem:[#allocation5 + $0x50c] sm:$0xf0]  ;;  %v6798_v27 = vld [vmem:[#allocation5 + $0x2c4] sm:$0xf] }
  0x5a   : > { %v5043_v59 = vld [vmem:[#allocation5 + $0x600] sm:$0xf]  ;;  %v6904_v60 = vld [vmem:[#allocation5 + $0x60c] sm:$0xf0]  ;;  %v4916_v61 = vor.u32 %v6872_v58, %v4915_v56  ;;  %v4629_v28 = vld [vmem:[#allocation5 + $0x2d0] sm:$0xf0] }
  0x5b   : > { %2134 = vmatpush.bf16.msrb.mxu3 %v5188_v53  ;;  %v5044_v62 = vor.u32 %v6904_v60, %v5043_v59  ;;  %v5171_v63 = vld [vmem:[#allocation5 + $0x700] sm:$0xf]  ;;  %v6936_v0 = vld [vmem:[#allocation5 + $0x70c] sm:$0xf0]  ;;  %2096 = vmatpush.bf16.msrb.mxu0 %v4788_v57  ;;  %v6830_v31 = vld [vmem:[#allocation5 + $0x3c4] sm:$0xf]  ;;  %v4632_v37 = vor.u32 %v6798_v27, %v4629_v28 }
  0x5c   : > { %v5172_v1 = vor.u32 %v6936_v0, %v5171_v63  ;;  %2109 = vmatpush.bf16.msrb.mxu1 %v4916_v61  ;;  %v4757_v32 = vld [vmem:[#allocation5 + $0x3d0] sm:$0xf0]  ;;  %v6730_v35 = vld [vmem:[#allocation5 + $0xa4] sm:$0xf]  ;;  %v206_v52 = vadd.s32 512, %v7268_v3  ;;  %v207_v56 = vadd.s32 640, %v7268_v3 }
  0x5d   : > { %2122 = vmatpush.bf16.msrb.mxu2 %v5044_v62  ;;  %v4357_v36 = vld [vmem:[#allocation5 + $0xb0] sm:$0xf0]  ;;  %v6762_v38 = vld [vmem:[#allocation5 + $0x1a4] sm:$0xf]  ;;  %v4760_v40 = vor.u32 %v6830_v31, %v4757_v32  ;;  %v208_v60 = vadd.s32 768, %v7268_v3  ;;  %v209_v0 = vadd.s32 896, %v7268_v3 }
  0x5e   : > { %v4485_v39 = vld [vmem:[#allocation5 + $0x1b0] sm:$0xf0]  ;;  %v6794_v41 = vld [vmem:[#allocation5 + $0x2a4] sm:$0xf]  ;;  %v4360_v43 = vor.u32 %v6730_v35, %v4357_v36  ;;  %v6631_v25 = vld [vmem:[#allocation2 + $0x58c] sm:$0xf] }
  0x5f   : > { %2135 = vmatpush.bf16.msrb.mxu3 %v5172_v1  ;;  %v4613_v42 = vld [vmem:[#allocation5 + $0x2b0] sm:$0xf0]  ;;  %v6826_v44 = vld [vmem:[#allocation5 + $0x3a4] sm:$0xf]  ;;  %v4488_v46 = vor.u32 %v6762_v38, %v4485_v39  ;;  %v6663_v29 = vld [vmem:[#allocation2 + $0x68c] sm:$0xf] }
  0x60   : > { %v4741_v45 = vld [vmem:[#allocation5 + $0x3b0] sm:$0xf0]  ;;  %v6726_v47 = vld [vmem:[#allocation5 + $0x84] sm:$0xf]  ;;  %v4616_v49 = vor.u32 %v6794_v41, %v4613_v42 }
  0x61   : > { %v4341_v48 = vld [vmem:[#allocation5 + $0x90] sm:$0xf0]  ;;  %v6758_v50 = vld [vmem:[#allocation5 + $0x184] sm:$0xf]  ;;  %v4744_v53 = vor.u32 %v6826_v44, %v4741_v45 }
  0x62   : > { %v4469_v51 = vld [vmem:[#allocation5 + $0x190] sm:$0xf0]  ;;  %v6790_v54 = vld [vmem:[#allocation5 + $0x284] sm:$0xf]  ;;  %v4344_v57 = vor.u32 %v6726_v47, %v4341_v48 }
  0x63   : > { %v4597_v55 = vld [vmem:[#allocation5 + $0x290] sm:$0xf0]  ;;  %v6822_v58 = vld [vmem:[#allocation5 + $0x384] sm:$0xf]  ;;  %v4472_v61 = vor.u32 %v6758_v50, %v4469_v51 }
  0x64   : > { %v4725_v59 = vld [vmem:[#allocation5 + $0x390] sm:$0xf0]  ;;  %v6722_v62 = vld [vmem:[#allocation5 + $0x64] sm:$0xf]  ;;  %v4600_v1 = vor.u32 %v6790_v54, %v4597_v55 }
  0x65   : > { %v4325_v63 = vld [vmem:[#allocation5 + $0x70] sm:$0xf0]  ;;  %v6754_v2 = vld [vmem:[#allocation5 + $0x164] sm:$0xf] }
  0x66   : > { %v6786_v6 = vld [vmem:[#allocation5 + $0x264] sm:$0xf]  ;;  %v4581_v7 = vld [vmem:[#allocation5 + $0x270] sm:$0xf0] }
  0x67   : > { %v6818_v9 = vld [vmem:[#allocation5 + $0x364] sm:$0xf]  ;;  %v4709_v10 = vld [vmem:[#allocation5 + $0x370] sm:$0xf0]  ;;  %v4584_v15 = vor.u32 %v6786_v6, %v4581_v7 }
  0x68   : > { %v6718_v11 = vld [vmem:[#allocation5 + $0x44] sm:$0xf]  ;;  %v4309_v12 = vld [vmem:[#allocation5 + $0x50] sm:$0xf0]  ;;  %v4712_v19 = vor.u32 %v6818_v9, %v4709_v10 }
  0x69   : > { %v6750_v16 = vld [vmem:[#allocation5 + $0x144] sm:$0xf]  ;;  %v4565_v22 = vld [vmem:[#allocation5 + $0x250] sm:$0xf0] }
  0x6a   : > { %v6814_v27 = vld [vmem:[#allocation5 + $0x344] sm:$0xf]  ;;  %v4693_v28 = vld [vmem:[#allocation5 + $0x350] sm:$0xf0] }
  0x6b   : > { %v6714_v32 = vld [vmem:[#allocation5 + $0x24] sm:$0xf]  ;;  %v4696_v38 = vor.u32 %v6814_v27, %v4693_v28  ;;  %v4549_v39 = vld [vmem:[#allocation5 + $0x230] sm:$0xf0] }
  0x6c   : > { %v6746_v36 = vld [vmem:[#allocation5 + $0x124] sm:$0xf]  ;;  %v4677_v42 = vld [vmem:[#allocation5 + $0x330] sm:$0xf0] }
  0x6d   : > { %v4277_v44 = vld [vmem:[#allocation5 + $0x10] sm:$0xf0]  ;;  %v6774_v48 = vld [vmem:[#allocation5 + $0x204] sm:$0xf] }
  0x6e   : > { %v4405_v47 = vld [vmem:[#allocation5 + $0x110] sm:$0xf0]  ;;  %v6866_v51 = vld [vmem:[#allocation5 + $0x4e4] sm:$0xf] }
  0x6f   : > { %v4533_v50 = vld [vmem:[#allocation5 + $0x210] sm:$0xf0]  ;;  %v6806_v54 = vld [vmem:[#allocation5 + $0x304] sm:$0xf] }
  0x70   : > { %v6898_v55 = vld [vmem:[#allocation5 + $0x5e4] sm:$0xf]  ;;  %v4885_v7 = vld [vmem:[#allocation5 + $0x4d0] sm:$0xf0] }
  0x71   : > { %v6862_v6 = vld [vmem:[#allocation5 + $0x4c4] sm:$0xf]  ;;  %v5013_v10 = vld [vmem:[#allocation5 + $0x5d0] sm:$0xf0] }
  0x72   : > { %v4997_v28 = vld [vmem:[#allocation5 + $0x5b0] sm:$0xf0] }
  0x94   : > { %v7273_v13 = vpop.permute.xlu0 %211 }
  0x95   : > { %vm213_vm0 = vcmp.eq.s32.totalorder %v7268_v3, %v7273_v13  ;;  %vm214_vm1 = vcmp.eq.s32.totalorder %v203_v4, %v7273_v13  ;;  %vm215_vm2 = vcmp.eq.s32.totalorder %v204_v5, %v7273_v13  ;;  %vm216_vm3 = vcmp.eq.s32.totalorder %v205_v8, %v7273_v13  ;;  %v4453_v4 = vld [vmem:[#allocation5 + $0x170] sm:$0xf0] }
  0x96   : > { %vm7280_vm4 = vmpackc.low %vm213_vm0, %vm213_vm0  ;;  %vm217_vm8 = vcmp.eq.s32.totalorder %v206_v52, %v7273_v13  ;;  %v4728_v5 = vor.u32 %v6822_v58, %v4725_v59  ;;  %vm218_vm9 = vcmp.eq.s32.totalorder %v207_v56, %v7273_v13  ;;  %v4328_v8 = vor.u32 %v6722_v62, %v4325_v63  ;;  %v4901_v52 = vld [vmem:[#allocation5 + $0x4f0] sm:$0xf0]  ;;  %v6930_v59 = vld [vmem:[#allocation5 + $0x6e4] sm:$0xf] }
  0x97   : > { %5298 = vmatmul.msk.bf16.vlgmr.msra.gmra.mxu0 %vm7280_vm4, %v7169_v24  ;;  %vm7287_vm5 = vmpackc.low %vm214_vm1, %vm214_vm1  ;;  %vm219_vm10 = vcmp.eq.s32.totalorder %v208_v60, %v7273_v13  ;;  %v4456_v3 = vor.u32 %v6754_v2, %v4453_v4  ;;  %vm220_vm11 = vcmp.eq.s32.totalorder %v209_v0, %v7273_v13  ;;  %v6778_v13 = vld [vmem:[#allocation5 + $0x224] sm:$0xf]  ;;  %v5029_v56 = vld [vmem:[#allocation5 + $0x5f0] sm:$0xf0]  ;;  %v4904_v62 = vor.u32 %v6866_v51, %v4901_v52 }
  0x98   : > { %5300 = vmatmul.msk.bf16.vlgmr.msra.gmra.mxu1 %vm7287_vm5, %v7169_v24  ;;  %vm7297_vm6 = vmpackc.low %vm215_vm2, %vm215_vm2  ;;  %2141 = vmatpush.bf16.msra.mxu0 %v4392_v14  ;;  %v4661_v58 = vld [vmem:[#allocation5 + $0x310] sm:$0xf0]  ;;  %v6962_v63 = vld [vmem:[#allocation5 + $0x7e4] sm:$0xf]  ;;  %v5032_v2 = vor.u32 %v6898_v55, %v5029_v56 }
  0x99   : > { %5302 = vmatmul.msk.bf16.vlgmr.msra.gmra.mxu2 %vm7297_vm6, %v7169_v24  ;;  %vm7307_vm7 = vmpackc.low %vm216_vm3, %vm216_vm3  ;;  %2154 = vmatpush.bf16.msra.mxu1 %v4520_v17  ;;  %v4437_v17 = vld [vmem:[#allocation5 + $0x150] sm:$0xf0]  ;;  %v4664_v4 = vor.u32 %v6806_v54, %v4661_v58  ;;  %v6882_v52 = vld [vmem:[#allocation5 + $0x564] sm:$0xf] }
  0x9a   : > { %5304 = vmatmul.msk.bf16.vlgmr.msra.gmra.mxu3 %vm7307_vm7, %v7169_v24  ;;  %2167 = vmatpush.bf16.msra.mxu2 %v4648_v21  ;;  %vm7325_vm12 = vmpackc.low %vm217_vm8, %vm217_vm8  ;;  %v6782_v21 = vld [vmem:[#allocation5 + $0x244] sm:$0xf]  ;;  %v4440_v31 = vor.u32 %v6750_v16, %v4437_v17  ;;  %v5157_v60 = vld [vmem:[#allocation5 + $0x6f0] sm:$0xf0]  ;;  %v4888_v16 = vor.u32 %v6862_v6, %v4885_v7 }
  0x9b   : > { %2180 = vmatpush.bf16.msra.mxu3 %v4776_v26  ;;  %vm7335_vm13 = vmpackc.low %vm218_vm9, %vm218_vm9  ;;  %v4312_v26 = vor.u32 %v6718_v11, %v4309_v12  ;;  %v4568_v35 = vor.u32 %v6782_v21, %v4565_v22  ;;  %v5285_v0 = vld [vmem:[#allocation5 + $0x7f0] sm:$0xf0]  ;;  %v6958_v12 = vld [vmem:[#allocation5 + $0x7c4] sm:$0xf] }
  0x9c   : > { %2142 = vmatpush.bf16.msra.mxu0 %v4376_v30  ;;  %vm7345_vm14 = vmpackc.low %vm219_vm10, %vm219_vm10  ;;  %v5288_v9 = vor.u32 %v6962_v63, %v5285_v0  ;;  %v5141_v11 = vld [vmem:[#allocation5 + $0x6d0] sm:$0xf0]  ;;  %v6858_v21 = vld [vmem:[#allocation5 + $0x4a4] sm:$0xf] }
  0x9d   : > { %2155 = vmatpush.bf16.msra.mxu1 %v4504_v34  ;;  %vm7355_vm15 = vmpackc.low %vm220_vm11, %vm220_vm11  ;;  %v4293_v34 = vld [vmem:[#allocation5 + $0x30] sm:$0xf0]  ;;  %v6914_v55 = vld [vmem:[#allocation5 + $0x664] sm:$0xf] }
  0x9e   : > { %2168 = vmatpush.bf16.msra.mxu2 %v4632_v37  ;;  %v4421_v37 = vld [vmem:[#allocation5 + $0x130] sm:$0xf0]  ;;  %v4296_v41 = vor.u32 %v6714_v32, %v4293_v34  ;;  %v6954_v34 = vld [vmem:[#allocation5 + $0x7a4] sm:$0xf] }
  0x9f   : > { %2181 = vmatpush.bf16.msra.mxu3 %v4760_v40  ;;  %v6810_v40 = vld [vmem:[#allocation5 + $0x324] sm:$0xf]  ;;  %v4424_v45 = vor.u32 %v6746_v36, %v4421_v37  ;;  %v4869_v22 = vld [vmem:[#allocation5 + $0x4b0] sm:$0xf0] }
  0xa0   : > { %2143 = vmatpush.bf16.msra.mxu0 %v4360_v43  ;;  %v6710_v43 = vld [vmem:[#allocation5 + $0x4] sm:$0xf]  ;;  %v5125_v32 = vld [vmem:[#allocation5 + $0x6b0] sm:$0xf0]  ;;  %v4872_v36 = vor.u32 %v6858_v21, %v4869_v22 }
  0xa1   : > { %2156 = vmatpush.bf16.msra.mxu1 %v4488_v46  ;;  %v6742_v46 = vld [vmem:[#allocation5 + $0x104] sm:$0xf]  ;;  %v4837_v51 = vld [vmem:[#allocation5 + $0x470] sm:$0xf0] }
  0xa2   : > { %2169 = vmatpush.bf16.msra.mxu2 %v4616_v49  ;;  %v4552_v49 = vor.u32 %v6778_v13, %v4549_v39  ;;  %v6854_v13 = vld [vmem:[#allocation5 + $0x484] sm:$0xf]  ;;  %v4853_v39 = vld [vmem:[#allocation5 + $0x490] sm:$0xf0] }
  0xa3   : > { %2182 = vmatpush.bf16.msra.mxu3 %v4744_v53  ;;  %v4680_v53 = vor.u32 %v6810_v40, %v4677_v42  ;;  %v6886_v40 = vld [vmem:[#allocation5 + $0x584] sm:$0xf]  ;;  %v4981_v42 = vld [vmem:[#allocation5 + $0x590] sm:$0xf0] }
  0xa4   : > { %2144 = vmatpush.bf16.msra.mxu0 %v4344_v57  ;;  %v4280_v57 = vor.u32 %v6710_v43, %v4277_v44  ;;  %v6918_v43 = vld [vmem:[#allocation5 + $0x684] sm:$0xf]  ;;  %v5109_v44 = vld [vmem:[#allocation5 + $0x690] sm:$0xf0] }
  0xa5   : > { %2157 = vmatpush.bf16.msra.mxu1 %v4472_v61  ;;  %v4408_v61 = vor.u32 %v6742_v46, %v4405_v47  ;;  %v5237_v46 = vld [vmem:[#allocation5 + $0x790] sm:$0xf0]  ;;  %v4856_v47 = vor.u32 %v6854_v13, %v4853_v39  ;;  %v6878_v0 = vld [vmem:[#allocation5 + $0x544] sm:$0xf] }
  0xa6   : > { %2170 = vmatpush.bf16.msra.mxu2 %v4600_v1  ;;  %v4536_v1 = vor.u32 %v6774_v48, %v4533_v50  ;;  %v4984_v48 = vor.u32 %v6886_v40, %v4981_v42  ;;  %v6850_v50 = vld [vmem:[#allocation5 + $0x464] sm:$0xf]  ;;  %v4965_v54 = vld [vmem:[#allocation5 + $0x570] sm:$0xf0]  ;;  %v4395_v40 = vld [vmem:[#allocation5 + $0xe8] sm:$0xf] }
  0xa7   : > { %2183 = vmatpush.bf16.msra.mxu3 %v4728_v5  ;;  %5306 = vmatmul.msk.bf16.vlgmr.msrb.gmra.mxu0 %vm7325_vm12, %v7169_v24  ;;  %v5160_v5 = vor.u32 %v6930_v59, %v5157_v60  ;;  %v5093_v56 = vld [vmem:[#allocation5 + $0x670] sm:$0xf0]  ;;  %v4840_v59 = vor.u32 %v6850_v50, %v4837_v51  ;;  %v4968_v60 = vor.u32 %v6882_v52, %v4965_v54  ;;  %v6942_v6 = vld [vmem:[#allocation5 + $0x744] sm:$0xf]  ;;  %v4523_v42 = vld [vmem:[#allocation5 + $0x1e8] sm:$0xf] }
  0xa8   : > { %5308 = vmatmul.msk.bf16.vlgmr.msrb.gmra.mxu1 %vm7335_vm13, %v7169_v24  ;;  %2145 = vmatpush.bf16.msra.mxu0 %v4328_v8  ;;  %v6894_v8 = vld [vmem:[#allocation5 + $0x5c4] sm:$0xf]  ;;  %v5221_v58 = vld [vmem:[#allocation5 + $0x770] sm:$0xf0]  ;;  %v6837_v50 = vld [vmem:[#allocation5 + $0x3f4] sm:$0xf0] }
  0xa9   : > { %5310 = vmatmul.msk.bf16.vlgmr.msrb.gmra.mxu2 %vm7345_vm14, %v7169_v24  ;;  %2158 = vmatpush.bf16.msra.mxu1 %v4456_v3  ;;  %v6926_v3 = vld [vmem:[#allocation5 + $0x6c4] sm:$0xf]  ;;  %v5016_v17 = vor.u32 %v6894_v8, %v5013_v10  ;;  %v4821_v63 = vld [vmem:[#allocation5 + $0x450] sm:$0xf0] }
  0xaa   : > { %5312 = vmatmul.msk.bf16.vlgmr.msrb.gmra.mxu3 %vm7355_vm15, %v7169_v24  ;;  %2171 = vmatpush.bf16.msra.mxu2 %v4584_v15  ;;  %v5269_v15 = vld [vmem:[#allocation5 + $0x7d0] sm:$0xf0]  ;;  %v6938_v21 = vld [vmem:[#allocation5 + $0x724] sm:$0xf] }
  0xab   : > { %2184 = vmatpush.bf16.msra.mxu3 %v4712_v19  ;;  %v5144_v19 = vor.u32 %v6926_v3, %v5141_v11  ;;  %v5272_v27 = vor.u32 %v6958_v12, %v5269_v15  ;;  %v5205_v7 = vld [vmem:[#allocation5 + $0x750] sm:$0xf0]  ;;  %v6842_v3 = vld [vmem:[#allocation5 + $0x424] sm:$0xf] }
  0xac   : > { %2146 = vmatpush.bf16.msra.mxu0 %v4312_v26  ;;  %v6890_v26 = vld [vmem:[#allocation5 + $0x5a4] sm:$0xf]  ;;  %v4805_v11 = vld [vmem:[#allocation5 + $0x430] sm:$0xf0]  ;;  %v5208_v15 = vor.u32 %v6942_v6, %v5205_v7  ;;  %v4491_v6 = vld [vmem:[#allocation5 + $0x1a8] sm:$0xf] }
  0xad   : > { %2159 = vmatpush.bf16.msra.mxu1 %v4440_v31  ;;  %v6922_v31 = vld [vmem:[#allocation5 + $0x6a4] sm:$0xf]  ;;  %v5000_v37 = vor.u32 %v6890_v26, %v4997_v28  ;;  %v5189_v22 = vld [vmem:[#allocation5 + $0x730] sm:$0xf0]  ;;  %v4808_v26 = vor.u32 %v6842_v3, %v4805_v11  ;;  %v4747_v3 = vld [vmem:[#allocation5 + $0x3a8] sm:$0xf] }
  0xae   : > { %2172 = vmatpush.bf16.msra.mxu2 %v4568_v35  ;;  %v5253_v35 = vld [vmem:[#allocation5 + $0x7b0] sm:$0xf0]  ;;  %v6874_v12 = vld [vmem:[#allocation5 + $0x524] sm:$0xf]  ;;  %v6829_v11 = vld [vmem:[#allocation5 + $0x3b4] sm:$0xf0] }
  0xaf   : > { %2185 = vmatpush.bf16.msra.mxu3 %v4696_v38  ;;  %v5128_v38 = vor.u32 %v6922_v31, %v5125_v32  ;;  %v4789_v28 = vld [vmem:[#allocation5 + $0x410] sm:$0xf0]  ;;  %v6934_v13 = vld [vmem:[#allocation5 + $0x704] sm:$0xf] }
  0xb0   : > { %2147 = vmatpush.bf16.msra.mxu0 %v4296_v41  ;;  %v5256_v41 = vor.u32 %v6954_v34, %v5253_v35  ;;  %v6870_v34 = vld [vmem:[#allocation5 + $0x504] sm:$0xf]  ;;  %v4917_v35 = vld [vmem:[#allocation5 + $0x510] sm:$0xf0] }
  0xb1   : > { %2160 = vmatpush.bf16.msra.mxu1 %v4424_v45  ;;  %v6950_v45 = vld [vmem:[#allocation5 + $0x784] sm:$0xf]  ;;  %v5173_v39 = vld [vmem:[#allocation5 + $0x710] sm:$0xf0] }
  0xb2   : > { %2173 = vmatpush.bf16.msra.mxu2 %v4552_v49  ;;  %v5112_v49 = vor.u32 %v6918_v43, %v5109_v44  ;;  %v6773_v44 = vld [vmem:[#allocation5 + $0x1f4] sm:$0xf0]  ;;  %v5176_v51 = vor.u32 %v6934_v13, %v5173_v39  ;;  %v4459_v13 = vld [vmem:[#allocation5 + $0x168] sm:$0xf] }
  0xb3   : > { %2186 = vmatpush.bf16.msra.mxu3 %v4680_v53  ;;  %v5240_v53 = vor.u32 %v6950_v45, %v5237_v46  ;;  %v4651_v45 = vld [vmem:[#allocation5 + $0x2e8] sm:$0xf]  ;;  %v6805_v46 = vld [vmem:[#allocation5 + $0x2f4] sm:$0xf0] }
  0xb4   : > { %2148 = vmatpush.bf16.msra.mxu0 %v4280_v57  ;;  %v6946_v57 = vld [vmem:[#allocation5 + $0x764] sm:$0xf]  ;;  %v4652_v54 = vor.u32 %v6805_v46, %v4651_v45 }
  0xb5   : > { %2161 = vmatpush.bf16.msra.mxu1 %v4408_v61  ;;  %v5096_v61 = vor.u32 %v6914_v55, %v5093_v56  ;;  %v4379_v55 = vld [vmem:[#allocation5 + $0xc8] sm:$0xf]  ;;  %v6737_v56 = vld [vmem:[#allocation5 + $0xd4] sm:$0xf0] }
  0xb6   : > { %2174 = vmatpush.bf16.msra.mxu2 %v4536_v1  ;;  %v5224_v1 = vor.u32 %v6946_v57, %v5221_v58  ;;  %v4507_v57 = vld [vmem:[#allocation5 + $0x1c8] sm:$0xf] }
  0xb7   : > { %2187 = vmatpush.bf16.msra.mxu3 %v4664_v4  ;;  %5314 = vmatmul.msk.bf16.vlgmr.msra.gmra.mxu0 %vm7280_vm4, %v7169_v24  ;;  %v6910_v4 = vld [vmem:[#allocation5 + $0x644] sm:$0xf] }
  0xb8   : > { %2193 = vmatpush.bf16.msrb.mxu0 %v4904_v62  ;;  %5316 = vmatmul.msk.bf16.vlgmr.msra.gmra.mxu1 %vm7287_vm5, %v7169_v24  ;;  %v6846_v62 = vld [vmem:[#allocation5 + $0x444] sm:$0xf] }
  0xb9   : > { %2206 = vmatpush.bf16.msrb.mxu1 %v5032_v2  ;;  %5318 = vmatmul.msk.bf16.vlgmr.msra.gmra.mxu2 %vm7297_vm6, %v7169_v24  ;;  %v4949_v2 = vld [vmem:[#allocation5 + $0x550] sm:$0xf0]  ;;  %v4824_v8 = vor.u32 %v6846_v62, %v4821_v63  ;;  %v4763_v62 = vld [vmem:[#allocation5 + $0x3c8] sm:$0xf]  ;;  %v6833_v63 = vld [vmem:[#allocation5 + $0x3d4] sm:$0xf0] }
  0xba   : > { %2219 = vmatpush.bf16.msrb.mxu2 %v5160_v5  ;;  %5320 = vmatmul.msk.bf16.vlgmr.msra.gmra.mxu3 %vm7307_vm7, %v7169_v24  ;;  %v5077_v5 = vld [vmem:[#allocation5 + $0x650] sm:$0xf0]  ;;  %v4764_v7 = vor.u32 %v6833_v63, %v4763_v62  ;;  %v4427_v62 = vld [vmem:[#allocation5 + $0x128] sm:$0xf] }
  0xbb   : > { %2232 = vmatpush.bf16.msrb.mxu3 %v5288_v9  ;;  %v4952_v9 = vor.u32 %v6878_v0, %v4949_v2  ;;  %v5080_v10 = vor.u32 %v6910_v4, %v5077_v5  ;;  %v4380_v0 = vor.u32 %v6737_v56, %v4379_v55  ;;  %v4363_v4 = vld [vmem:[#allocation5 + $0xa8] sm:$0xf]  ;;  %v6733_v5 = vld [vmem:[#allocation5 + $0xb4] sm:$0xf0] }
  0xbc   : > { %2194 = vmatpush.bf16.msrb.mxu0 %v4888_v16  ;;  %v4933_v16 = vld [vmem:[#allocation5 + $0x530] sm:$0xf0]  ;;  %v4699_v55 = vld [vmem:[#allocation5 + $0x348] sm:$0xf]  ;;  %v6817_v56 = vld [vmem:[#allocation5 + $0x354] sm:$0xf0] }
  0xbd   : > { %2207 = vmatpush.bf16.msrb.mxu1 %v5016_v17  ;;  %v6906_v17 = vld [vmem:[#allocation5 + $0x624] sm:$0xf]  ;;  %v4936_v31 = vor.u32 %v6874_v12, %v4933_v16  ;;  %v4364_v12 = vor.u32 %v6733_v5, %v4363_v4  ;;  %v4700_v63 = vor.u32 %v6817_v56, %v4699_v55  ;;  %v4683_v4 = vld [vmem:[#allocation5 + $0x328] sm:$0xf]  ;;  %v6813_v5 = vld [vmem:[#allocation5 + $0x334] sm:$0xf0] }
  0xbe   : > { %2220 = vmatpush.bf16.msrb.mxu2 %v5144_v19  ;;  %v5061_v19 = vld [vmem:[#allocation5 + $0x630] sm:$0xf0]  ;;  %v5003_v55 = vld [vmem:[#allocation5 + $0x5a8] sm:$0xf] }
  0xbf   : > { %2233 = vmatpush.bf16.msrb.mxu3 %v5272_v27  ;;  %v6838_v27 = vld [vmem:[#allocation5 + $0x404] sm:$0xf]  ;;  %v5064_v32 = vor.u32 %v6906_v17, %v5061_v19  ;;  %v4347_v17 = vld [vmem:[#allocation5 + $0x88] sm:$0xf]  ;;  %v6729_v19 = vld [vmem:[#allocation5 + $0x94] sm:$0xf0] }
  0xc0   : > { %2195 = vmatpush.bf16.msrb.mxu0 %v4872_v36  ;;  %v6902_v36 = vld [vmem:[#allocation5 + $0x604] sm:$0xf]  ;;  %v4792_v43 = vor.u32 %v6838_v27, %v4789_v28  ;;  %v4603_v27 = vld [vmem:[#allocation5 + $0x288] sm:$0xf]  ;;  %v6793_v28 = vld [vmem:[#allocation5 + $0x294] sm:$0xf0] }
  0xc1   : > { %2208 = vmatpush.bf16.msrb.mxu1 %v5000_v37  ;;  %v5192_v37 = vor.u32 %v6938_v21, %v5189_v22  ;;  %v4475_v21 = vld [vmem:[#allocation5 + $0x188] sm:$0xf]  ;;  %v4748_v22 = vor.u32 %v6829_v11, %v4747_v3  ;;  %v6745_v11 = vld [vmem:[#allocation5 + $0x114] sm:$0xf0] }
  0xc2   : > { %2221 = vmatpush.bf16.msrb.mxu2 %v5128_v38  ;;  %v5045_v38 = vld [vmem:[#allocation5 + $0x610] sm:$0xf0]  ;;  %v4411_v3 = vld [vmem:[#allocation5 + $0x108] sm:$0xf] }
  0xc3   : > { %2234 = vmatpush.bf16.msrb.mxu3 %v5256_v41  ;;  %v6741_v41 = vld [vmem:[#allocation5 + $0xf4] sm:$0xf0] }
  0xc4   : > { %2196 = vmatpush.bf16.msrb.mxu0 %v4856_v47  ;;  %v4920_v47 = vor.u32 %v6870_v34, %v4917_v35  ;;  %v4396_v52 = vor.u32 %v6741_v41, %v4395_v40  ;;  %v4348_v34 = vor.u32 %v6729_v19, %v4347_v17  ;;  %v6757_v40 = vld [vmem:[#allocation5 + $0x174] sm:$0xf0]  ;;  %v4587_v41 = vld [vmem:[#allocation5 + $0x268] sm:$0xf] }
  0xc5   : > { %2209 = vmatpush.bf16.msrb.mxu1 %v4984_v48  ;;  %v5048_v48 = vor.u32 %v6902_v36, %v5045_v38  ;;  %v4604_v36 = vor.u32 %v6793_v28, %v4603_v27  ;;  %v6725_v38 = vld [vmem:[#allocation5 + $0x74] sm:$0xf0]  ;;  %v4460_v46 = vor.u32 %v6757_v40, %v4459_v13  ;;  %v4667_v17 = vld [vmem:[#allocation5 + $0x308] sm:$0xf] }
  0xc6   : > { %2222 = vmatpush.bf16.msrb.mxu2 %v5112_v49  ;;  %v4779_v49 = vld [vmem:[#allocation5 + $0x3e8] sm:$0xf]  ;;  %v6809_v19 = vld [vmem:[#allocation5 + $0x314] sm:$0xf0] }
  0xc7   : > { %2235 = vmatpush.bf16.msrb.mxu3 %v5240_v53  ;;  %v4524_v53 = vor.u32 %v6773_v44, %v4523_v42  ;;  %v4780_v58 = vor.u32 %v6837_v50, %v4779_v49  ;;  %v6789_v42 = vld [vmem:[#allocation5 + $0x274] sm:$0xf0]  ;;  %v4443_v50 = vld [vmem:[#allocation5 + $0x148] sm:$0xf] }
  0xc8   : > { %2197 = vmatpush.bf16.msrb.mxu0 %v4840_v59  ;;  %v6769_v59 = vld [vmem:[#allocation5 + $0x1d4] sm:$0xf0] }
  0xc9   : > { %2210 = vmatpush.bf16.msrb.mxu1 %v4968_v60  ;;  %v4635_v60 = vld [vmem:[#allocation5 + $0x2c8] sm:$0xf]  ;;  %v6821_v44 = vld [vmem:[#allocation5 + $0x374] sm:$0xf0] }
  0xca   : > { %2223 = vmatpush.bf16.msrb.mxu2 %v5096_v61  ;;  %v6801_v61 = vld [vmem:[#allocation5 + $0x2d4] sm:$0xf0] }
  0xcb   : > { %2236 = vmatpush.bf16.msrb.mxu3 %v5224_v1  ;;  %v4508_v1 = vor.u32 %v6769_v59, %v4507_v57  ;;  %v4636_v2 = vor.u32 %v6801_v61, %v4635_v60  ;;  %v6721_v49 = vld [vmem:[#allocation5 + $0x54] sm:$0xf0]  ;;  %v4299_v60 = vld [vmem:[#allocation5 + $0x28] sm:$0xf] }
  0xcc   : > { %2198 = vmatpush.bf16.msrb.mxu0 %v4824_v8  ;;  %v6765_v8 = vld [vmem:[#allocation5 + $0x1b4] sm:$0xf0] }
  0xcd   : > { %2211 = vmatpush.bf16.msrb.mxu1 %v4952_v9  ;;  %v4619_v9 = vld [vmem:[#allocation5 + $0x2a8] sm:$0xf]  ;;  %v6717_v61 = vld [vmem:[#allocation5 + $0x34] sm:$0xf0] }
  0xce   : > { %2224 = vmatpush.bf16.msrb.mxu2 %v5080_v10  ;;  %v6797_v10 = vld [vmem:[#allocation5 + $0x2b4] sm:$0xf0] }
  0xcf   : > { %2237 = vmatpush.bf16.msrb.mxu3 %v5208_v15  ;;  %v4492_v15 = vor.u32 %v6765_v8, %v4491_v6  ;;  %v4620_v16 = vor.u32 %v6797_v10, %v4619_v9  ;;  %v4300_v6 = vor.u32 %v6717_v61, %v4299_v60  ;;  %v6713_v8 = vld [vmem:[#allocation5 + $0x14] sm:$0xf0]  ;;  %v5259_v60 = vld [vmem:[#allocation5 + $0x7a8] sm:$0xf] }
  0xd0   : > { %2199 = vmatpush.bf16.msrb.mxu0 %v4808_v26  ;;  %v6761_v26 = vld [vmem:[#allocation5 + $0x194] sm:$0xf0] }
  0xd1   : > { %2212 = vmatpush.bf16.msrb.mxu1 %v4936_v31  ;;  %v4731_v31 = vld [vmem:[#allocation5 + $0x388] sm:$0xf]  ;;  %v4476_v35 = vor.u32 %v6761_v26, %v4475_v21  ;;  %v6901_v28 = vld [vmem:[#allocation5 + $0x5f4] sm:$0xf0] }
  0xd2   : > { %2225 = vmatpush.bf16.msrb.mxu2 %v5064_v32  ;;  %v6825_v32 = vld [vmem:[#allocation5 + $0x394] sm:$0xf0]  ;;  %v4907_v21 = vld [vmem:[#allocation5 + $0x4e8] sm:$0xf] }
  0xd3   : > { %2238 = vmatpush.bf16.msrb.mxu3 %v5192_v37  ;;  %v4331_v37 = vld [vmem:[#allocation5 + $0x68] sm:$0xf]  ;;  %v4732_v39 = vor.u32 %v6825_v32, %v4731_v31  ;;  %v6933_v32 = vld [vmem:[#allocation5 + $0x6f4] sm:$0xf0] }
  0xd4   : > { %2200 = vmatpush.bf16.msrb.mxu0 %v4792_v43  ;;  %v4715_v43 = vld [vmem:[#allocation5 + $0x368] sm:$0xf]  ;;  %v4332_v45 = vor.u32 %v6725_v38, %v4331_v37  ;;  %v6965_v37 = vld [vmem:[#allocation5 + $0x7f4] sm:$0xf0]  ;;  %v4668_v38 = vor.u32 %v6809_v19, %v4667_v17 }
  0xd5   : > { %2213 = vmatpush.bf16.msrb.mxu1 %v4920_v47  ;;  %v4588_v47 = vor.u32 %v6789_v42, %v4587_v41  ;;  %v5035_v26 = vld [vmem:[#allocation5 + $0x5e8] sm:$0xf]  ;;  %v6865_v42 = vld [vmem:[#allocation5 + $0x4d4] sm:$0xf0] }
  0xd6   : > { %2226 = vmatpush.bf16.msrb.mxu2 %v5048_v48  ;;  %v4315_v48 = vld [vmem:[#allocation5 + $0x48] sm:$0xf]  ;;  %v6957_v61 = vld [vmem:[#allocation5 + $0x7b4] sm:$0xf0] }
  0xd7   : > { %2239 = vmatpush.bf16.msrb.mxu3 %v5176_v51  ;;  %5322 = vmatmul.msk.bf16.vlgmr.msrb.gmra.mxu0 %vm7325_vm12, %v7169_v24  ;;  %v4716_v51 = vor.u32 %v6821_v44, %v4715_v43  ;;  %v4316_v57 = vor.u32 %v6721_v49, %v4315_v48  ;;  %v5163_v31 = vld [vmem:[#allocation5 + $0x6e8] sm:$0xf]  ;;  %v6961_v49 = vld [vmem:[#allocation5 + $0x7d4] sm:$0xf0] }
  0xd8   : > { %2245 = vmatpush.bf16.msra.mxu0 %v4396_v52  ;;  %5324 = vmatmul.msk.bf16.vlgmr.msrb.gmra.mxu1 %vm7335_vm13, %v7169_v24  ;;  %v6753_v52 = vld [vmem:[#allocation5 + $0x154] sm:$0xf0]  ;;  %v5164_v40 = vor.u32 %v6933_v32, %v5163_v31  ;;  %v4891_v41 = vld [vmem:[#allocation5 + $0x4c8] sm:$0xf] }
  0xd9   : > { %2258 = vmatpush.bf16.msra.mxu1 %v4524_v53  ;;  %5326 = vmatmul.msk.bf16.vlgmr.msrb.gmra.mxu2 %vm7345_vm14, %v7169_v24  ;;  %v4571_v53 = vld [vmem:[#allocation5 + $0x248] sm:$0xf] }
  0xda   : > { %2271 = vmatpush.bf16.msra.mxu2 %v4652_v54  ;;  %5328 = vmatmul.msk.bf16.vlgmr.msrb.gmra.mxu3 %vm7355_vm15, %v7169_v24  ;;  %v6785_v54 = vld [vmem:[#allocation5 + $0x254] sm:$0xf0]  ;;  %v5019_v43 = vld [vmem:[#allocation5 + $0x5c8] sm:$0xf] }
  0xdb   : > { %2284 = vmatpush.bf16.msra.mxu3 %v4780_v58  ;;  %v4444_v58 = vor.u32 %v6753_v52, %v4443_v50  ;;  %v4572_v59 = vor.u32 %v6785_v54, %v4571_v53  ;;  %v5275_v48 = vld [vmem:[#allocation5 + $0x7c8] sm:$0xf]  ;;  %v4892_v50 = vor.u32 %v6865_v42, %v4891_v41  ;;  %v6861_v54 = vld [vmem:[#allocation5 + $0x4b4] sm:$0xf0] }
  0xdc   : > { %2246 = vmatpush.bf16.msra.mxu0 %v4380_v0  ;;  %v6749_v0 = vld [vmem:[#allocation5 + $0x134] sm:$0xf0]  ;;  %v4875_v53 = vld [vmem:[#allocation5 + $0x4a8] sm:$0xf]  ;;  %v5276_v56 = vor.u32 %v6961_v49, %v5275_v48 }
  0xdd   : > { %2259 = vmatpush.bf16.msra.mxu1 %v4508_v1  ;;  %v4555_v1 = vld [vmem:[#allocation5 + $0x228] sm:$0xf]  ;;  %v4428_v9 = vor.u32 %v6749_v0, %v4427_v62  ;;  %v4876_v62 = vor.u32 %v6861_v54, %v4875_v53  ;;  %v6945_v42 = vld [vmem:[#allocation5 + $0x754] sm:$0xf0] }
  0xde   : > { %2272 = vmatpush.bf16.msra.mxu2 %v4636_v2  ;;  %v6781_v2 = vld [vmem:[#allocation5 + $0x234] sm:$0xf0]  ;;  %v4971_v17 = vld [vmem:[#allocation5 + $0x568] sm:$0xf] }
  0xdf   : > { %2285 = vmatpush.bf16.msra.mxu3 %v4764_v7  ;;  %v4283_v7 = vld [vmem:[#allocation5 + $0x8] sm:$0xf]  ;;  %v4556_v10 = vor.u32 %v6781_v2, %v4555_v1  ;;  %v6857_v2 = vld [vmem:[#allocation5 + $0x494] sm:$0xf0] }
  0xe0   : > { %2247 = vmatpush.bf16.msra.mxu0 %v4364_v12  ;;  %v4539_v12 = vld [vmem:[#allocation5 + $0x208] sm:$0xf]  ;;  %v4284_v27 = vor.u32 %v6713_v8, %v4283_v7  ;;  %v6921_v8 = vld [vmem:[#allocation5 + $0x694] sm:$0xf0] }
  0xe1   : > { %2260 = vmatpush.bf16.msra.mxu1 %v4492_v15  ;;  %v4684_v15 = vor.u32 %v6813_v5, %v4683_v4  ;;  %v4859_v1 = vld [vmem:[#allocation5 + $0x488] sm:$0xf]  ;;  %v5260_v5 = vor.u32 %v6957_v61, %v5259_v60  ;;  %v6941_v54 = vld [vmem:[#allocation5 + $0x734] sm:$0xf0] }
  0xe2   : > { %2273 = vmatpush.bf16.msra.mxu2 %v4620_v16  ;;  %v6777_v16 = vld [vmem:[#allocation5 + $0x214] sm:$0xf0]  ;;  %v4987_v4 = vld [vmem:[#allocation5 + $0x588] sm:$0xf] }
  0xe3   : > { %2286 = vmatpush.bf16.msra.mxu3 %v4748_v22  ;;  %v6869_v22 = vld [vmem:[#allocation5 + $0x4f4] sm:$0xf0]  ;;  %v5115_v7 = vld [vmem:[#allocation5 + $0x688] sm:$0xf] }
  0xe4   : > { %2248 = vmatpush.bf16.msra.mxu0 %v4348_v34  ;;  %v4412_v34 = vor.u32 %v6745_v11, %v4411_v3  ;;  %v4908_v13 = vor.u32 %v6869_v22, %v4907_v21  ;;  %v4860_v3 = vor.u32 %v6857_v2, %v4859_v1  ;;  %v6885_v21 = vld [vmem:[#allocation5 + $0x574] sm:$0xf0]  ;;  %v5099_v22 = vld [vmem:[#allocation5 + $0x668] sm:$0xf] }
  0xe5   : > { %2261 = vmatpush.bf16.msra.mxu1 %v4476_v35  ;;  %v4540_v35 = vor.u32 %v6777_v16, %v4539_v12  ;;  %v5116_v12 = vor.u32 %v6921_v8, %v5115_v7  ;;  %v6853_v16 = vld [vmem:[#allocation5 + $0x474] sm:$0xf0]  ;;  %v4972_v32 = vor.u32 %v6885_v21, %v4971_v17  ;;  %v5211_v41 = vld [vmem:[#allocation5 + $0x748] sm:$0xf]  ;;  %v4525_v8 = vld [vmem:[#allocation5 + $0x1f8] sm:$0xf0] }
  0xe6   : > { %2274 = vmatpush.bf16.msra.mxu2 %v4604_v36  ;;  %v5291_v36 = vld [vmem:[#allocation5 + $0x7e8] sm:$0xf]  ;;  %v5212_v49 = vor.u32 %v6945_v42, %v5211_v41  ;;  %v6873_v61 = vld [vmem:[#allocation5 + $0x514] sm:$0xf0]  ;;  %v6763_v41 = vld [vmem:[#allocation5 + $0x1ac] sm:$0xf] }
  0xe7   : > { %2287 = vmatpush.bf16.msra.mxu3 %v4732_v39  ;;  %v5036_v39 = vor.u32 %v6901_v28, %v5035_v26  ;;  %v5292_v44 = vor.u32 %v6965_v37, %v5291_v36  ;;  %v6917_v26 = vld [vmem:[#allocation5 + $0x674] sm:$0xf0]  ;;  %v4955_v37 = vld [vmem:[#allocation5 + $0x548] sm:$0xf] }
  0xe8   : > { %2249 = vmatpush.bf16.msra.mxu0 %v4332_v45  ;;  %v6897_v45 = vld [vmem:[#allocation5 + $0x5d4] sm:$0xf0]  ;;  %v4939_v48 = vld [vmem:[#allocation5 + $0x528] sm:$0xf] }
  0xe9   : > { %2262 = vmatpush.bf16.msra.mxu1 %v4460_v46  ;;  %v5147_v46 = vld [vmem:[#allocation5 + $0x6c8] sm:$0xf]  ;;  %v6949_v28 = vld [vmem:[#allocation5 + $0x774] sm:$0xf0] }
  0xea   : > { %2275 = vmatpush.bf16.msra.mxu2 %v4588_v47  ;;  %v6929_v47 = vld [vmem:[#allocation5 + $0x6d4] sm:$0xf0]  ;;  %v5195_v53 = vld [vmem:[#allocation5 + $0x728] sm:$0xf] }
  0xeb   : > { %2288 = vmatpush.bf16.msra.mxu3 %v4716_v51  ;;  %v5020_v51 = vor.u32 %v6897_v45, %v5019_v43  ;;  %v5148_v52 = vor.u32 %v6929_v47, %v5147_v46  ;;  %v6849_v36 = vld [vmem:[#allocation5 + $0x454] sm:$0xf0]  ;;  %v4811_v46 = vld [vmem:[#allocation5 + $0x428] sm:$0xf] }
  0xec   : > { %2250 = vmatpush.bf16.msra.mxu0 %v4316_v57  ;;  %v6893_v57 = vld [vmem:[#allocation5 + $0x5b4] sm:$0xf0]  ;;  %v4923_v60 = vld [vmem:[#allocation5 + $0x508] sm:$0xf] }
  0xed   : > { %2263 = vmatpush.bf16.msra.mxu1 %v4444_v58  ;;  %v5131_v58 = vld [vmem:[#allocation5 + $0x6a8] sm:$0xf]  ;;  %v6845_v47 = vld [vmem:[#allocation5 + $0x434] sm:$0xf0] }
  0xee   : > { %2276 = vmatpush.bf16.msra.mxu2 %v4572_v59  ;;  %v6925_v59 = vld [vmem:[#allocation5 + $0x6b4] sm:$0xf0]  ;;  %v5179_v1 = vld [vmem:[#allocation5 + $0x708] sm:$0xf] }
  0xef   : > { %2289 = vmatpush.bf16.msra.mxu3 %v4700_v63  ;;  %v5004_v63 = vor.u32 %v6893_v57, %v5003_v55  ;;  %v5132_v0 = vor.u32 %v6925_v59, %v5131_v58  ;;  %v4812_v55 = vor.u32 %v6845_v47, %v4811_v46  ;;  %v6841_v57 = vld [vmem:[#allocation5 + $0x414] sm:$0xf0]  ;;  %v6827_v46 = vld [vmem:[#allocation5 + $0x3ac] sm:$0xf]  ;;  %v4749_v47 = vld [vmem:[#allocation5 + $0x3b8] sm:$0xf0] }
  0xf0   : > { %2251 = vmatpush.bf16.msra.mxu0 %v4300_v6  ;;  %v6889_v6 = vld [vmem:[#allocation5 + $0x594] sm:$0xf0] }
  0xf1   : > { %2264 = vmatpush.bf16.msra.mxu1 %v4428_v9  ;;  %v5243_v9 = vld [vmem:[#allocation5 + $0x788] sm:$0xf]  ;;  %v4988_v11 = vor.u32 %v6889_v6, %v4987_v4  ;;  %v6937_v2 = vld [vmem:[#allocation5 + $0x714] sm:$0xf0]  ;;  %v6739_v4 = vld [vmem:[#allocation5 + $0xec] sm:$0xf] }
  0xf2   : > { %2277 = vmatpush.bf16.msra.mxu2 %v4556_v10  ;;  %v6953_v10 = vld [vmem:[#allocation5 + $0x794] sm:$0xf0]  ;;  %v6771_v6 = vld [vmem:[#allocation5 + $0x1ec] sm:$0xf] }
  0xf3   : > { %2290 = vmatpush.bf16.msra.mxu3 %v4684_v15  ;;  %v4843_v15 = vld [vmem:[#allocation5 + $0x468] sm:$0xf]  ;;  %v5244_v19 = vor.u32 %v6953_v10, %v5243_v9  ;;  %v6803_v9 = vld [vmem:[#allocation5 + $0x2ec] sm:$0xf]  ;;  %v4653_v10 = vld [vmem:[#allocation5 + $0x2f8] sm:$0xf0] }
  0xf4   : > { %2252 = vmatpush.bf16.msra.mxu0 %v4284_v27  ;;  %v5227_v27 = vld [vmem:[#allocation5 + $0x768] sm:$0xf]  ;;  %v4844_v31 = vor.u32 %v6853_v16, %v4843_v15  ;;  %v4781_v15 = vld [vmem:[#allocation5 + $0x3f8] sm:$0xf0]  ;;  %v5180_v16 = vor.u32 %v6937_v2, %v5179_v1  ;;  %v4656_v21 = vor.u32 %v6803_v9, %v4653_v10  ;;  %v6723_v2 = vld [vmem:[#allocation5 + $0x6c] sm:$0xf] }
  0xf5   : > { %2265 = vmatpush.bf16.msra.mxu1 %v4412_v34  ;;  %v5100_v34 = vor.u32 %v6917_v26, %v5099_v22  ;;  %v6735_v22 = vld [vmem:[#allocation5 + $0xcc] sm:$0xf]  ;;  %v4381_v26 = vld [vmem:[#allocation5 + $0xd8] sm:$0xf0] }
  0xf6   : > { %2278 = vmatpush.bf16.msra.mxu2 %v4540_v35  ;;  %v4827_v35 = vld [vmem:[#allocation5 + $0x448] sm:$0xf]  ;;  %v4589_v9 = vld [vmem:[#allocation5 + $0x278] sm:$0xf0]  ;;  %v6819_v10 = vld [vmem:[#allocation5 + $0x36c] sm:$0xf] }
  0xf7   : > { %2291 = vmatpush.bf16.msra.mxu3 %v4668_v38  ;;  %5330 = vmatmul.msk.bf16.vlgmr.msra.gmra.mxu0 %vm7280_vm4, %v7169_v24  ;;  %v5228_v38 = vor.u32 %v6949_v28, %v5227_v27  ;;  %v4828_v43 = vor.u32 %v6849_v36, %v4827_v35  ;;  %v6767_v27 = vld [vmem:[#allocation5 + $0x1cc] sm:$0xf]  ;;  %v4765_v36 = vld [vmem:[#allocation5 + $0x3d8] sm:$0xf0] }
  0xf8   : > { %2297 = vmatpush.bf16.msrb.mxu0 %v4908_v13  ;;  %5332 = vmatmul.msk.bf16.vlgmr.msra.gmra.mxu1 %vm7287_vm5, %v7169_v24  ;;  %v6881_v13 = vld [vmem:[#allocation5 + $0x554] sm:$0xf0]  ;;  %v6831_v35 = vld [vmem:[#allocation5 + $0x3cc] sm:$0xf] }
  0xf9   : > { %2310 = vmatpush.bf16.msrb.mxu1 %v5036_v39  ;;  %5334 = vmatmul.msk.bf16.vlgmr.msra.gmra.mxu2 %vm7297_vm6, %v7169_v24  ;;  %v5083_v39 = vld [vmem:[#allocation5 + $0x648] sm:$0xf]  ;;  %v4768_v42 = vor.u32 %v6831_v35, %v4765_v36  ;;  %v4573_v35 = vld [vmem:[#allocation5 + $0x258] sm:$0xf0] }
  0xfa   : > { %2323 = vmatpush.bf16.msrb.mxu2 %v5164_v40  ;;  %5336 = vmatmul.msk.bf16.vlgmr.msra.gmra.mxu3 %vm7307_vm7, %v7169_v24  ;;  %v6913_v40 = vld [vmem:[#allocation5 + $0x654] sm:$0xf0] }
  0xfb   : > { %2336 = vmatpush.bf16.msrb.mxu3 %v5292_v44  ;;  %v4956_v44 = vor.u32 %v6881_v13, %v4955_v37  ;;  %v5084_v45 = vor.u32 %v6913_v40, %v5083_v39  ;;  %v4384_v37 = vor.u32 %v6735_v22, %v4381_v26  ;;  %v6731_v39 = vld [vmem:[#allocation5 + $0xac] sm:$0xf]  ;;  %v4365_v40 = vld [vmem:[#allocation5 + $0xb8] sm:$0xf0] }
  0xfc   : > { %2298 = vmatpush.bf16.msrb.mxu0 %v4892_v50  ;;  %v6877_v50 = vld [vmem:[#allocation5 + $0x534] sm:$0xf0]  ;;  %v6719_v26 = vld [vmem:[#allocation5 + $0x4c] sm:$0xf] }
  0xfd   : > { %2311 = vmatpush.bf16.msrb.mxu1 %v5020_v51  ;;  %v5067_v51 = vld [vmem:[#allocation5 + $0x628] sm:$0xf]  ;;  %v4940_v58 = vor.u32 %v6877_v50, %v4939_v48  ;;  %v4368_v48 = vor.u32 %v6731_v39, %v4365_v40 }
  0xfe   : > { %2324 = vmatpush.bf16.msrb.mxu2 %v5148_v52  ;;  %v6909_v52 = vld [vmem:[#allocation5 + $0x634] sm:$0xf0] }
  0xff   : > { %2337 = vmatpush.bf16.msrb.mxu3 %v5276_v56  ;;  %v4795_v56 = vld [vmem:[#allocation5 + $0x408] sm:$0xf]  ;;  %v5068_v59 = vor.u32 %v6909_v52, %v5067_v51 }
 0x100   : > { %2299 = vmatpush.bf16.msrb.mxu0 %v4876_v62  ;;  %v5051_v62 = vld [vmem:[#allocation5 + $0x608] sm:$0xf]  ;;  %v4796_v7 = vor.u32 %v6841_v57, %v4795_v56  ;;  %v4752_v56 = vor.u32 %v6827_v46, %v4749_v47  ;;  %v6779_v46 = vld [vmem:[#allocation5 + $0x22c] sm:$0xf]  ;;  %v4557_v47 = vld [vmem:[#allocation5 + $0x238] sm:$0xf0] }
 0x101   : > { %2312 = vmatpush.bf16.msrb.mxu1 %v5004_v63  ;;  %v5196_v63 = vor.u32 %v6941_v54, %v5195_v53  ;;  %v6727_v53 = vld [vmem:[#allocation5 + $0x8c] sm:$0xf]  ;;  %v4349_v54 = vld [vmem:[#allocation5 + $0x98] sm:$0xf0] }
 0x102   : > { %2325 = vmatpush.bf16.msrb.mxu2 %v5132_v0  ;;  %v6905_v0 = vld [vmem:[#allocation5 + $0x614] sm:$0xf0] }
 0x103   : > { %2338 = vmatpush.bf16.msrb.mxu3 %v5260_v5  ;;  %v4397_v5 = vld [vmem:[#allocation5 + $0xf8] sm:$0xf0] }
 0x104   : > { %2300 = vmatpush.bf16.msrb.mxu0 %v4860_v3  ;;  %v4924_v3 = vor.u32 %v6873_v61, %v4923_v60  ;;  %v4400_v17 = vor.u32 %v6739_v4, %v4397_v5  ;;  %v4605_v60 = vld [vmem:[#allocation5 + $0x298] sm:$0xf0]  ;;  %v6823_v61 = vld [vmem:[#allocation5 + $0x38c] sm:$0xf] }
 0x105   : > { %2313 = vmatpush.bf16.msrb.mxu1 %v4988_v11  ;;  %v5052_v11 = vor.u32 %v6905_v0, %v5051_v62  ;;  %v4733_v62 = vld [vmem:[#allocation5 + $0x398] sm:$0xf0]  ;;  %v6755_v5 = vld [vmem:[#allocation5 + $0x16c] sm:$0xf] }
 0x106   : > { %2326 = vmatpush.bf16.msrb.mxu2 %v5116_v12  ;;  %v6835_v12 = vld [vmem:[#allocation5 + $0x3ec] sm:$0xf]  ;;  %v4333_v4 = vld [vmem:[#allocation5 + $0x78] sm:$0xf0] }
 0x107   : > { %2339 = vmatpush.bf16.msrb.mxu3 %v5244_v19  ;;  %v4528_v19 = vor.u32 %v6771_v6, %v4525_v8  ;;  %v4784_v28 = vor.u32 %v6835_v12, %v4781_v15  ;;  %v4736_v6 = vor.u32 %v6823_v61, %v4733_v62  ;;  %v6787_v8 = vld [vmem:[#allocation5 + $0x26c] sm:$0xf]  ;;  %v4336_v12 = vor.u32 %v6723_v2, %v4333_v4  ;;  %v4413_v61 = vld [vmem:[#allocation5 + $0x118] sm:$0xf0] }
 0x108   : > { %2301 = vmatpush.bf16.msrb.mxu0 %v4844_v31  ;;  %v4509_v31 = vld [vmem:[#allocation5 + $0x1d8] sm:$0xf0]  ;;  %v6775_v62 = vld [vmem:[#allocation5 + $0x20c] sm:$0xf] }
 0x109   : > { %2314 = vmatpush.bf16.msrb.mxu1 %v4972_v32  ;;  %v6799_v32 = vld [vmem:[#allocation5 + $0x2cc] sm:$0xf]  ;;  %v4669_v2 = vld [vmem:[#allocation5 + $0x318] sm:$0xf0] }
 0x10a   : > { %2327 = vmatpush.bf16.msrb.mxu2 %v5100_v34  ;;  %v4637_v34 = vld [vmem:[#allocation5 + $0x2d8] sm:$0xf0] }
 0x10b   : > { %2340 = vmatpush.bf16.msrb.mxu3 %v5228_v38  ;;  %v4512_v38 = vor.u32 %v6767_v27, %v4509_v31  ;;  %v4640_v13 = vor.u32 %v6799_v32, %v4637_v34  ;;  %v4317_v27 = vld [vmem:[#allocation5 + $0x58] sm:$0xf0]  ;;  %v6783_v34 = vld [vmem:[#allocation5 + $0x24c] sm:$0xf] }
 0x10c   : > { %2302 = vmatpush.bf16.msrb.mxu0 %v4828_v43  ;;  %v4493_v43 = vld [vmem:[#allocation5 + $0x1b8] sm:$0xf0]  ;;  %v4576_v40 = vor.u32 %v6783_v34, %v4573_v35 }
 0x10d   : > { %2315 = vmatpush.bf16.msrb.mxu1 %v4956_v44  ;;  %v6795_v44 = vld [vmem:[#allocation5 + $0x2ac] sm:$0xf]  ;;  %v4496_v50 = vor.u32 %v6763_v41, %v4493_v43  ;;  %v4445_v32 = vld [vmem:[#allocation5 + $0x158] sm:$0xf0] }
 0x10e   : > { %2328 = vmatpush.bf16.msrb.mxu2 %v5084_v45  ;;  %v4621_v45 = vld [vmem:[#allocation5 + $0x2b8] sm:$0xf0]  ;;  %v6715_v41 = vld [vmem:[#allocation5 + $0x2c] sm:$0xf] }
 0x10f   : > { %2341 = vmatpush.bf16.msrb.mxu3 %v5212_v49  ;;  %v4624_v51 = vor.u32 %v6795_v44, %v4621_v45  ;;  %v6747_v43 = vld [vmem:[#allocation5 + $0x12c] sm:$0xf]  ;;  %v4429_v45 = vld [vmem:[#allocation5 + $0x138] sm:$0xf0] }
 0x110   : > { %2303 = vmatpush.bf16.msrb.mxu0 %v4812_v55  ;;  %v6759_v55 = vld [vmem:[#allocation5 + $0x18c] sm:$0xf]  ;;  %v5021_v35 = vld [vmem:[#allocation5 + $0x5d8] sm:$0xf0] }
 0x111   : > { %2316 = vmatpush.bf16.msrb.mxu1 %v4940_v58  ;;  %v4477_v58 = vld [vmem:[#allocation5 + $0x198] sm:$0xf0] }
 0x112   : > { %2329 = vmatpush.bf16.msrb.mxu2 %v5068_v59  ;;  %v6791_v59 = vld [vmem:[#allocation5 + $0x28c] sm:$0xf]  ;;  %v4480_v0 = vor.u32 %v6759_v55, %v4477_v58 }
 0x113   : > { %2342 = vmatpush.bf16.msrb.mxu3 %v5196_v63  ;;  %v4352_v63 = vor.u32 %v6727_v53, %v4349_v54  ;;  %v4608_v1 = vor.u32 %v6791_v59, %v4605_v60  ;;  %v6711_v53 = vld [vmem:[#allocation5 + $0xc] sm:$0xf]  ;;  %v4285_v54 = vld [vmem:[#allocation5 + $0x18] sm:$0xf0] }
 0x114   : > { %2304 = vmatpush.bf16.msrb.mxu0 %v4796_v7  ;;  %v2046_v49 = vpop.f32.mrf.mxu0  ;;  %v4461_v7 = vld [vmem:[#allocation5 + $0x178] sm:$0xf0]  ;;  %v6743_v60 = vld [vmem:[#allocation5 + $0x10c] sm:$0xf] }
 0x115   : > { %2317 = vmatpush.bf16.msrb.mxu1 %v4924_v3  ;;  %v2059_v52 = vpop.f32.mrf.mxu1  ;;  %v4717_v3 = vld [vmem:[#allocation5 + $0x378] sm:$0xf0] }
 0x116   : > { %2330 = vmatpush.bf16.msrb.mxu2 %v5052_v11  ;;  %v2060_v57 = vadd.f32 %v2059_v52, %v2046_v49  ;;  %v4720_v31 = vor.u32 %v6819_v10, %v4717_v3  ;;  %v4685_v49 = vld [vmem:[#allocation5 + $0x338] sm:$0xf0]  ;;  %v6931_v10 = vld [vmem:[#allocation5 + $0x6ec] sm:$0xf] }
 0x117   : > { %2343 = vmatpush.bf16.msrb.mxu3 %v5180_v16  ;;  %5338 = vmatmul.msk.bf16.vlgmr.msrb.gmra.mxu0 %vm7325_vm12, %v7169_v24  ;;  %v5165_v3 = vld [vmem:[#allocation5 + $0x6f8] sm:$0xf0] }
 0x118   : > { %2349 = vmatpush.bf16.msra.mxu0 %v4400_v17  ;;  %5340 = vmatmul.msk.bf16.vlgmr.msrb.gmra.mxu1 %vm7335_vm13, %v7169_v24 }
 0x119   : > { %2362 = vmatpush.bf16.msra.mxu1 %v4528_v19  ;;  %5342 = vmatmul.msk.bf16.vlgmr.msrb.gmra.mxu2 %vm7345_vm14, %v7169_v24  ;;  %v4464_v19 = vor.u32 %v6755_v5, %v4461_v7  ;;  %v6867_v5 = vld [vmem:[#allocation5 + $0x4ec] sm:$0xf] }
 0x11a   : > { %2375 = vmatpush.bf16.msra.mxu2 %v4656_v21  ;;  %5344 = vmatmul.msk.bf16.vlgmr.msrb.gmra.mxu3 %vm7355_vm15, %v7169_v24  ;;  %v4592_v21 = vor.u32 %v6787_v8, %v4589_v9  ;;  %v6899_v7 = vld [vmem:[#allocation5 + $0x5ec] sm:$0xf]  ;;  %v4288_v8 = vor.u32 %v6711_v53, %v4285_v54  ;;  %v5037_v9 = vld [vmem:[#allocation5 + $0x5f8] sm:$0xf0] }
 0x11b   : > { %2388 = vmatpush.bf16.msra.mxu3 %v4784_v28  ;;  %v6751_v28 = vld [vmem:[#allocation5 + $0x14c] sm:$0xf]  ;;  %v5261_v54 = vld [vmem:[#allocation5 + $0x7b8] sm:$0xf0] }
 0x11c   : > { %2350 = vmatpush.bf16.msra.mxu0 %v4384_v37  ;;  %v2072_v11 = vpop.f32.mrf.mxu2  ;;  %v2048_v15 = vpop.f32.mrf.mxu0  ;;  %v6815_v37 = vld [vmem:[#allocation5 + $0x34c] sm:$0xf]  ;;  %v4448_v39 = vor.u32 %v6751_v28, %v4445_v32 }
 0x11d   : > { %2363 = vmatpush.bf16.msra.mxu1 %v4512_v38  ;;  %v2073_v16 = vadd.f32 %v2072_v11, %v2060_v57  ;;  %v2085_v17 = vpop.f32.mrf.mxu3  ;;  %v2061_v22 = vpop.f32.mrf.mxu1  ;;  %v4701_v38 = vld [vmem:[#allocation5 + $0x358] sm:$0xf0]  ;;  %v4560_v57 = vor.u32 %v6779_v46, %v4557_v47  ;;  %v4416_v11 = vor.u32 %v6743_v60, %v4413_v61  ;;  %v6963_v15 = vld [vmem:[#allocation5 + $0x7ec] sm:$0xf] }
 0x11e   : > { %2376 = vmatpush.bf16.msra.mxu2 %v4640_v13  ;;  %v4320_v13 = vor.u32 %v6719_v26, %v4317_v27  ;;  %v4704_v44 = vor.u32 %v6815_v37, %v4701_v38  ;;  %v5168_v22 = vor.u32 %v6931_v10, %v5165_v3  ;;  %v6863_v26 = vld [vmem:[#allocation5 + $0x4cc] sm:$0xf]  ;;  %v4893_v27 = vld [vmem:[#allocation5 + $0x4d8] sm:$0xf0] }
 0x11f   : > { %2389 = vmatpush.bf16.msra.mxu3 %v4768_v42  ;;  %v2086_v36 = vadd.f32 %v2085_v17, %v2073_v16  ;;  %v4301_v42 = vld [vmem:[#allocation5 + $0x38] sm:$0xf0]  ;;  %v6895_v28 = vld [vmem:[#allocation5 + $0x5cc] sm:$0xf] }
 0x120   : > { %2351 = vmatpush.bf16.msra.mxu0 %v4368_v48  ;;  %v6811_v48 = vld [vmem:[#allocation5 + $0x32c] sm:$0xf]  ;;  %v5293_v16 = vld [vmem:[#allocation5 + $0x7f8] sm:$0xf0] }
 0x121   : > { %2364 = vmatpush.bf16.msra.mxu1 %v4496_v50  ;;  %v5149_v37 = vld [vmem:[#allocation5 + $0x6d8] sm:$0xf0]  ;;  %v6859_v46 = vld [vmem:[#allocation5 + $0x4ac] sm:$0xf] }
 0x122   : > { %2377 = vmatpush.bf16.msra.mxu2 %v4624_v51  ;;  %v4304_v51 = vor.u32 %v6715_v41, %v4301_v42  ;;  %v5277_v41 = vld [vmem:[#allocation5 + $0x7d8] sm:$0xf0]  ;;  %v4896_v42 = vor.u32 %v6863_v26, %v4893_v27  ;;  %v6955_v53 = vld [vmem:[#allocation5 + $0x7ac] sm:$0xf] }
 0x123   : > { %2390 = vmatpush.bf16.msra.mxu3 %v4752_v56  ;;  %v4432_v56 = vor.u32 %v6747_v43, %v4429_v45  ;;  %v4877_v47 = vld [vmem:[#allocation5 + $0x4b8] sm:$0xf0]  ;;  %v6887_v60 = vld [vmem:[#allocation5 + $0x58c] sm:$0xf]  ;;  %v5264_v61 = vor.u32 %v6955_v53, %v5261_v54 }
 0x124   : > { %2352 = vmatpush.bf16.msra.mxu0 %v4352_v63  ;;  %v2074_v50 = vpop.f32.mrf.mxu2  ;;  %v2098_v52 = vpop.f32.mrf.mxu0  ;;  %v4688_v63 = vor.u32 %v6811_v48, %v4685_v49  ;;  %v6891_v48 = vld [vmem:[#allocation5 + $0x5ac] sm:$0xf]  ;;  %v5229_v26 = vld [vmem:[#allocation5 + $0x778] sm:$0xf0] }
 0x125   : > { %2365 = vmatpush.bf16.msra.mxu1 %v4480_v0  ;;  %v2087_v55 = vpop.f32.mrf.mxu3  ;;  %v2099_v58 = vadd.f32 %v2098_v52, %v2086_v36  ;;  %v2111_v59 = vpop.f32.mrf.mxu1  ;;  %v4541_v0 = vld [vmem:[#allocation5 + $0x218] sm:$0xf0]  ;;  %v6927_v36 = vld [vmem:[#allocation5 + $0x6cc] sm:$0xf] }
 0x126   : > { %2378 = vmatpush.bf16.msra.mxu2 %v4608_v1  ;;  %v6807_v1 = vld [vmem:[#allocation5 + $0x30c] sm:$0xf]  ;;  %v5152_v45 = vor.u32 %v6927_v36, %v5149_v37  ;;  %v5005_v50 = vld [vmem:[#allocation5 + $0x5b8] sm:$0xf0]  ;;  %v4880_v55 = vor.u32 %v6859_v46, %v4877_v47 }
 0x127   : > { %2391 = vmatpush.bf16.msra.mxu3 %v4736_v6  ;;  %v2112_v4 = vadd.f32 %v2111_v59, %v2099_v58  ;;  %v4909_v6 = vld [vmem:[#allocation5 + $0x4f8] sm:$0xf0]  ;;  %v4672_v17 = vor.u32 %v6807_v1, %v4669_v2  ;;  %v6855_v58 = vld [vmem:[#allocation5 + $0x48c] sm:$0xf] }
 0x128   : > { %2353 = vmatpush.bf16.msra.mxu0 %v4336_v12  ;;  %v4544_v12 = vor.u32 %v6775_v62, %v4541_v0  ;;  %v5133_v52 = vld [vmem:[#allocation5 + $0x6b8] sm:$0xf0]  ;;  %v6919_v0 = vld [vmem:[#allocation5 + $0x68c] sm:$0xf] }
 0x129   : > { %2366 = vmatpush.bf16.msra.mxu1 %v4464_v19  ;;  %v4912_v19 = vor.u32 %v6867_v5, %v4909_v6  ;;  %v4861_v59 = vld [vmem:[#allocation5 + $0x498] sm:$0xf0]  ;;  %v6951_v5 = vld [vmem:[#allocation5 + $0x78c] sm:$0xf] }
 0x12a   : > { %2379 = vmatpush.bf16.msra.mxu2 %v4592_v21  ;;  %v5040_v21 = vor.u32 %v6899_v7, %v5037_v9  ;;  %v5117_v1 = vld [vmem:[#allocation5 + $0x698] sm:$0xf0]  ;;  %v6875_v53 = vld [vmem:[#allocation5 + $0x52c] sm:$0xf] }
 0x12b   : > { %2392 = vmatpush.bf16.msra.mxu3 %v4720_v31  ;;  %v5296_v31 = vor.u32 %v6963_v15, %v5293_v16  ;;  %v5245_v6 = vld [vmem:[#allocation5 + $0x798] sm:$0xf0]  ;;  %v5120_v3 = vor.u32 %v6919_v0, %v5117_v1  ;;  %v6883_v15 = vld [vmem:[#allocation5 + $0x56c] sm:$0xf] }
 0x12c   : > { %2354 = vmatpush.bf16.msra.mxu0 %v4320_v13  ;;  %v2124_v32 = vpop.f32.mrf.mxu2  ;;  %v2100_v34 = vpop.f32.mrf.mxu0  ;;  %v5248_v16 = vor.u32 %v6951_v5, %v5245_v6  ;;  %v6871_v1 = vld [vmem:[#allocation5 + $0x50c] sm:$0xf] }
 0x12d   : > { %2367 = vmatpush.bf16.msra.mxu1 %v4448_v39  ;;  %v2125_v38 = vadd.f32 %v2124_v32, %v2112_v4  ;;  %v2137_v13 = vpop.f32.mrf.mxu3  ;;  %v2113_v39 = vpop.f32.mrf.mxu1  ;;  %v6847_v32 = vld [vmem:[#allocation5 + $0x44c] sm:$0xf]  ;;  %v4829_v34 = vld [vmem:[#allocation5 + $0x458] sm:$0xf0] }
 0x12e   : > { %2380 = vmatpush.bf16.msra.mxu2 %v4576_v40  ;;  %v6959_v40 = vld [vmem:[#allocation5 + $0x7cc] sm:$0xf]  ;;  %v5085_v39 = vld [vmem:[#allocation5 + $0x658] sm:$0xf0]  ;;  %v4832_v47 = vor.u32 %v6847_v32, %v4829_v34 }
 0x12f   : > { %2393 = vmatpush.bf16.msra.mxu3 %v4704_v44  ;;  %v7410_v43 = vadd.f32 %v2137_v13, %v2125_v38  ;;  %v5024_v44 = vor.u32 %v6895_v28, %v5021_v35  ;;  %v5280_v49 = vor.u32 %v6959_v40, %v5277_v41  ;;  %v6879_v35 = vld [vmem:[#allocation5 + $0x54c] sm:$0xf]  ;;  %v4957_v38 = vld [vmem:[#allocation5 + $0x558] sm:$0xf0] }
 0x130   : > { %2355 = vmatpush.bf16.msra.mxu0 %v4304_v51  ;;  %v6923_v51 = vld [vmem:[#allocation5 + $0x6ac] sm:$0xf] }
 0x131   : > { %2368 = vmatpush.bf16.msra.mxu1 %v4432_v56  ;;  %v5008_v56 = vor.u32 %v6891_v48, %v5005_v50  ;;  %v6911_v13 = vld [vmem:[#allocation5 + $0x64c] sm:$0xf] }
 0x132   : > { %2381 = vmatpush.bf16.msra.mxu2 %v4560_v57  ;;  %v5136_v57 = vor.u32 %v6923_v51, %v5133_v52  ;;  %v5088_v50 = vor.u32 %v6911_v13, %v5085_v39  ;;  %v6843_v51 = vld [vmem:[#allocation5 + $0x42c] sm:$0xf]  ;;  %v4813_v52 = vld [vmem:[#allocation5 + $0x438] sm:$0xf0]  ;;  %v6512_v13 = vld [vmem:[#allocation2 + $0x1cc] sm:$0xf0] }
 0x133   : > { %2394 = vmatpush.bf16.msra.mxu3 %v4688_v63  ;;  %v4989_v63 = vld [vmem:[#allocation5 + $0x598] sm:$0xf0]  ;;  %v5715_v39 = vld [vmem:[#allocation2 + $0x2c0] sm:$0xf] }
 0x134   : > { %2356 = vmatpush.bf16.msra.mxu0 %v4288_v8  ;;  %v2126_v62 = vpop.f32.mrf.mxu2  ;;  %v2150_v4 = vpop.f32.mrf.mxu0  ;;  %v4864_v8 = vor.u32 %v6855_v58, %v4861_v59  ;;  %v4992_v10 = vor.u32 %v6887_v60, %v4989_v63  ;;  %v6939_v58 = vld [vmem:[#allocation5 + $0x72c] sm:$0xf]  ;;  %v5197_v59 = vld [vmem:[#allocation5 + $0x738] sm:$0xf0]  ;;  %v4816_v60 = vor.u32 %v6843_v51, %v4813_v52  ;;  %v6508_v52 = vld [vmem:[#allocation2 + $0x1ac] sm:$0xf0] }
 0x135   : > { %2369 = vmatpush.bf16.msra.mxu1 %v4416_v11  ;;  %v2139_v2 = vpop.f32.mrf.mxu3  ;;  %v2163_v7 = vpop.f32.mrf.mxu1  ;;  %v6851_v11 = vld [vmem:[#allocation5 + $0x46c] sm:$0xf]  ;;  %v4797_v62 = vld [vmem:[#allocation5 + $0x418] sm:$0xf0]  ;;  %v5200_v5 = vor.u32 %v6939_v58, %v5197_v59 }
 0x136   : > { %2382 = vmatpush.bf16.msra.mxu2 %v4544_v12  ;;  %v2164_v9 = vadd.f32 %v2163_v7, %v2150_v4  ;;  %v4845_v12 = vld [vmem:[#allocation5 + $0x478] sm:$0xf0]  ;;  %v6903_v4 = vld [vmem:[#allocation5 + $0x60c] sm:$0xf] }
 0x137   : > { %2395 = vmatpush.bf16.msra.mxu3 %v4672_v17  ;;  %5346 = vmatmul.msk.bf16.vlgmr.msra.gmra.mxu0 %vm7280_vm4, %v7169_v24  ;;  %v4973_v17 = vld [vmem:[#allocation5 + $0x578] sm:$0xf0]  ;;  %v4848_v27 = vor.u32 %v6851_v11, %v4845_v12  ;;  %v6484_v11 = vld [vmem:[#allocation2 + $0xec] sm:$0xf0]  ;;  %v5603_v12 = vld [vmem:[#allocation2 + $0x1e0] sm:$0xf] }
 0x138   : > { %2401 = vmatpush.bf16.msrb.mxu0 %v4912_v19  ;;  %5348 = vmatmul.msk.bf16.vlgmr.msra.gmra.mxu1 %vm7287_vm5, %v7169_v24  ;;  %v6915_v19 = vld [vmem:[#allocation5 + $0x66c] sm:$0xf]  ;;  %v4976_v28 = vor.u32 %v6883_v15, %v4973_v17  ;;  %v4925_v2 = vld [vmem:[#allocation5 + $0x518] sm:$0xf0]  ;;  %v5731_v17 = vld [vmem:[#allocation2 + $0x2e0] sm:$0xf] }
 0x139   : > { %2414 = vmatpush.bf16.msrb.mxu1 %v5040_v21  ;;  %5350 = vmatmul.msk.bf16.vlgmr.msra.gmra.mxu2 %vm7297_vm6, %v7169_v24  ;;  %v5101_v21 = vld [vmem:[#allocation5 + $0x678] sm:$0xf0] }
 0x13a   : > { %2427 = vmatpush.bf16.msrb.mxu2 %v5168_v22  ;;  %5352 = vmatmul.msk.bf16.vlgmr.msra.gmra.mxu3 %vm7307_vm7, %v7169_v24  ;;  %v6947_v22 = vld [vmem:[#allocation5 + $0x76c] sm:$0xf]  ;;  %v5053_v7 = vld [vmem:[#allocation5 + $0x618] sm:$0xf0] }
 0x13b   : > { %2440 = vmatpush.bf16.msrb.mxu3 %v5296_v31  ;;  %v5104_v31 = vor.u32 %v6915_v19, %v5101_v21  ;;  %v5232_v36 = vor.u32 %v6947_v22, %v5229_v26  ;;  %v6548_v19 = vld [vmem:[#allocation2 + $0x2ec] sm:$0xf0]  ;;  %v4928_v21 = vor.u32 %v6871_v1, %v4925_v2  ;;  %v5056_v22 = vor.u32 %v6903_v4, %v5053_v7  ;;  %v5859_v26 = vld [vmem:[#allocation2 + $0x3e0] sm:$0xf] }
 0x13c   : > { %2402 = vmatpush.bf16.msrb.mxu0 %v4896_v42  ;;  %v2176_v37 = vpop.f32.mrf.mxu2  ;;  %v2152_v42 = vpop.f32.mrf.mxu0  ;;  %v5732_v34 = vor.u32 %v6548_v19, %v5731_v17  ;;  %v5683_v1 = vld [vmem:[#allocation2 + $0x280] sm:$0xf]  ;;  %v6536_v2 = vld [vmem:[#allocation2 + $0x28c] sm:$0xf0] }
 0x13d   : > { %2415 = vmatpush.bf16.msrb.mxu1 %v5024_v44  ;;  %v2177_v40 = vadd.f32 %v2176_v37, %v2164_v9  ;;  %v2189_v41 = vpop.f32.mrf.mxu3  ;;  %v6943_v44 = vld [vmem:[#allocation5 + $0x74c] sm:$0xf]  ;;  %v2165_v46 = vpop.f32.mrf.mxu1  ;;  %v5181_v9 = vld [vmem:[#allocation5 + $0x718] sm:$0xf0]  ;;  %v5587_v37 = vld [vmem:[#allocation2 + $0x1c0] sm:$0xf] }
 0x13e   : > { %2428 = vmatpush.bf16.msrb.mxu2 %v5152_v45  ;;  %v5213_v45 = vld [vmem:[#allocation5 + $0x758] sm:$0xf0]  ;;  %v6576_v42 = vld [vmem:[#allocation2 + $0x3cc] sm:$0xf0] }
 0x13f   : > { %2441 = vmatpush.bf16.msrb.mxu3 %v5280_v49  ;;  %v7424_v48 = vadd.f32 %v2189_v41, %v2177_v40  ;;  %v4960_v49 = vor.u32 %v6879_v35, %v4957_v38  ;;  %v5216_v54 = vor.u32 %v6943_v44, %v5213_v45  ;;  %v5459_v35 = vld [vmem:[#allocation2 + $0xc0] sm:$0xf]  ;;  %v6544_v40 = vld [vmem:[#allocation2 + $0x2cc] sm:$0xf0]  ;;  %v5588_v45 = vor.u32 %v6512_v13, %v5587_v37 }
 0x140   : > { %2403 = vmatpush.bf16.msrb.mxu0 %v4880_v55  ;;  %v4941_v55 = vld [vmem:[#allocation5 + $0x538] sm:$0xf0]  ;;  %v5843_v41 = vld [vmem:[#allocation2 + $0x3c0] sm:$0xf]  ;;  %v5716_v46 = vor.u32 %v6544_v40, %v5715_v39  ;;  %v6500_v19 = vld [vmem:[#allocation2 + $0x16c] sm:$0xf0] }
 0x141   : > { %2416 = vmatpush.bf16.msrb.mxu1 %v5008_v56  ;;  %v6907_v56 = vld [vmem:[#allocation5 + $0x62c] sm:$0xf]  ;;  %v4944_v63 = vor.u32 %v6875_v53, %v4941_v55  ;;  %v5844_v51 = vor.u32 %v6576_v42, %v5843_v41  ;;  %v5699_v53 = vld [vmem:[#allocation2 + $0x2a0] sm:$0xf]  ;;  %v6528_v39 = vld [vmem:[#allocation2 + $0x24c] sm:$0xf0] }
 0x142   : > { %2429 = vmatpush.bf16.msrb.mxu2 %v5136_v57  ;;  %v5069_v57 = vld [vmem:[#allocation5 + $0x638] sm:$0xf0]  ;;  %v5827_v55 = vld [vmem:[#allocation2 + $0x3a0] sm:$0xf] }
 0x143   : > { %2442 = vmatpush.bf16.msrb.mxu3 %v5264_v61  ;;  %v6839_v61 = vld [vmem:[#allocation5 + $0x40c] sm:$0xf]  ;;  %v5072_v0 = vor.u32 %v6907_v56, %v5069_v57  ;;  %v6572_v56 = vld [vmem:[#allocation2 + $0x3ac] sm:$0xf0]  ;;  %v5651_v13 = vld [vmem:[#allocation2 + $0x240] sm:$0xf] }
 0x144   : > { %2404 = vmatpush.bf16.msrb.mxu0 %v4864_v8  ;;  %v2178_v6 = vpop.f32.mrf.mxu2  ;;  %v6935_v8 = vld [vmem:[#allocation5 + $0x70c] sm:$0xf]  ;;  %v4800_v15 = vor.u32 %v6839_v61, %v4797_v62  ;;  %v6472_v61 = vld [vmem:[#allocation2 + $0x8c] sm:$0xf0]  ;;  %v5555_v62 = vld [vmem:[#allocation2 + $0x180] sm:$0xf] }
 0x145   : > { %2417 = vmatpush.bf16.msrb.mxu1 %v4992_v10  ;;  %v2191_v10 = vpop.f32.mrf.mxu3  ;;  %v6568_v6 = vld [vmem:[#allocation2 + $0x38c] sm:$0xf0] }
 0x146   : > { %2430 = vmatpush.bf16.msrb.mxu2 %v5120_v3  ;;  %v5475_v3 = vld [vmem:[#allocation2 + $0xe0] sm:$0xf] }
 0x147   : > { %2443 = vmatpush.bf16.msrb.mxu3 %v5248_v16  ;;  %v6516_v16 = vld [vmem:[#allocation2 + $0x1ec] sm:$0xf0] }
 0x148   : > { %2405 = vmatpush.bf16.msrb.mxu0 %v4848_v27  ;;  %v6580_v27 = vld [vmem:[#allocation2 + $0x3ec] sm:$0xf0]  ;;  %v5604_v32 = vor.u32 %v6516_v16, %v5603_v12 }
 0x149   : > { %2418 = vmatpush.bf16.msrb.mxu1 %v4976_v28  ;;  %v5184_v28 = vor.u32 %v6935_v8, %v5181_v9  ;;  %v5860_v38 = vor.u32 %v6580_v27, %v5859_v26  ;;  %v6468_v12 = vld [vmem:[#allocation2 + $0x6c] sm:$0xf0]  ;;  %v5795_v26 = vld [vmem:[#allocation2 + $0x360] sm:$0xf] }
 0x14a   : > { %2431 = vmatpush.bf16.msrb.mxu2 %v5104_v31  ;;  %v5476_v31 = vor.u32 %v6484_v11, %v5475_v3  ;;  %v5684_v3 = vor.u32 %v6536_v2, %v5683_v1  ;;  %v5411_v11 = vld [vmem:[#allocation2 + $0x60] sm:$0xf]  ;;  %v6564_v27 = vld [vmem:[#allocation2 + $0x36c] sm:$0xf0] }
 0x14b   : > { %2444 = vmatpush.bf16.msrb.mxu3 %v5232_v36  ;;  %v6480_v36 = vld [vmem:[#allocation2 + $0xcc] sm:$0xf0]  ;;  %v5491_v2 = vld [vmem:[#allocation2 + $0x100] sm:$0xf] }
 0x14c   : > { %2406 = vmatpush.bf16.msrb.mxu0 %v4832_v47  ;;  %v5460_v44 = vor.u32 %v6480_v36, %v5459_v35  ;;  %v5443_v47 = vld [vmem:[#allocation2 + $0xa0] sm:$0xf]  ;;  %v5796_v36 = vor.u32 %v6564_v27, %v5795_v26 }
 0x14d   : > { %2419 = vmatpush.bf16.msrb.mxu1 %v4960_v49  ;;  %v6476_v49 = vld [vmem:[#allocation2 + $0xac] sm:$0xf0]  ;;  %v5523_v35 = vld [vmem:[#allocation2 + $0x140] sm:$0xf] }
 0x14e   : > { %2432 = vmatpush.bf16.msrb.mxu2 %v5088_v50  ;;  %v5571_v50 = vld [vmem:[#allocation2 + $0x1a0] sm:$0xf]  ;;  %v5444_v57 = vor.u32 %v6476_v49, %v5443_v47 }
 0x14f   : > { %2445 = vmatpush.bf16.msrb.mxu3 %v5216_v54  ;;  %v6540_v54 = vld [vmem:[#allocation2 + $0x2ac] sm:$0xf0]  ;;  %v5572_v58 = vor.u32 %v6508_v52, %v5571_v50  ;;  %v5379_v52 = vld [vmem:[#allocation2 + $0x20] sm:$0xf] }
 0x150   : > { %2407 = vmatpush.bf16.msrb.mxu0 %v4816_v60  ;;  %v5700_v59 = vor.u32 %v6540_v54, %v5699_v53  ;;  %v5427_v60 = vld [vmem:[#allocation2 + $0x80] sm:$0xf]  ;;  %v6460_v53 = vld [vmem:[#allocation2 + $0x2c] sm:$0xf0] }
 0x151   : > { %2420 = vmatpush.bf16.msrb.mxu1 %v4944_v63  ;;  %v5828_v63 = vor.u32 %v6572_v56, %v5827_v55  ;;  %v5428_v9 = vor.u32 %v6472_v61, %v5427_v60  ;;  %v5507_v54 = vld [vmem:[#allocation2 + $0x120] sm:$0xf]  ;;  %v6492_v56 = vld [vmem:[#allocation2 + $0x12c] sm:$0xf0]  ;;  %v5380_v61 = vor.u32 %v6460_v53, %v5379_v52 }
 0x152   : > { %2433 = vmatpush.bf16.msrb.mxu2 %v5072_v0  ;;  %v6504_v0 = vld [vmem:[#allocation2 + $0x18c] sm:$0xf0]  ;;  %v6371_v27 = vld [vmem:[#allocation2 + $0x7e0] sm:$0xf] }
 0x153   : > { %2446 = vmatpush.bf16.msrb.mxu3 %v5200_v5  ;;  %v5811_v5 = vld [vmem:[#allocation2 + $0x380] sm:$0xf]  ;;  %v5556_v10 = vor.u32 %v6504_v0, %v5555_v62  ;;  %v6556_v60 = vld [vmem:[#allocation2 + $0x32c] sm:$0xf0]  ;;  %v5508_v0 = vor.u32 %v6492_v56, %v5507_v54 }
 0x154   : > { %2408 = vmatpush.bf16.msrb.mxu0 %v4800_v15  ;;  %v2202_v4 = vpop.f32.mrf.mxu0  ;;  %v5539_v15 = vld [vmem:[#allocation2 + $0x160] sm:$0xf]  ;;  %v5812_v17 = vor.u32 %v6568_v6, %v5811_v5  ;;  %v6636_v53 = vld [vmem:[#allocation2 + $0x5ac] sm:$0xf0] }
 0x155   : > { %2421 = vmatpush.bf16.msrb.mxu1 %v4928_v21  ;;  %v2203_v7 = vadd.f32 %v2202_v4, %v7424_v48  ;;  %v2215_v8 = vpop.f32.mrf.mxu1  ;;  %v5667_v21 = vld [vmem:[#allocation2 + $0x260] sm:$0xf]  ;;  %v5540_v48 = vor.u32 %v6500_v19, %v5539_v15  ;;  %v6488_v4 = vld [vmem:[#allocation2 + $0x10c] sm:$0xf0] }
 0x156   : > { %2434 = vmatpush.bf16.msrb.mxu2 %v5056_v22  ;;  %v6532_v22 = vld [vmem:[#allocation2 + $0x26c] sm:$0xf0]  ;;  %v5363_v62 = vld [vmem:[#allocation2] sm:$0xf] }
 0x157   : > { %2447 = vmatpush.bf16.msrb.mxu3 %v5184_v28  ;;  %5354 = vmatmul.msk.bf16.vlgmr.msrb.gmra.mxu0 %vm7325_vm12, %v7169_v24  ;;  %v2216_v16 = vadd.f32 %v2215_v8, %v2203_v7  ;;  %v5412_v28 = vor.u32 %v6468_v12, %v5411_v11  ;;  %v5619_v5 = vld [vmem:[#allocation2 + $0x200] sm:$0xf]  ;;  %v6520_v8 = vld [vmem:[#allocation2 + $0x20c] sm:$0xf0] }
 0x158   : > { %3733 = vmatpush.bf16.msra.mxu0 %v5476_v31  ;;  %5356 = vmatmul.msk.bf16.vlgmr.msrb.gmra.mxu1 %vm7335_vm13, %v7169_v24  ;;  %v5668_v31 = vor.u32 %v6532_v22, %v5667_v21  ;;  %v5987_v11 = vld [vmem:[#allocation2 + $0x4e0] sm:$0xf]  ;;  %v6612_v12 = vld [vmem:[#allocation2 + $0x4ec] sm:$0xf0]  ;;  %v5492_v22 = vor.u32 %v6488_v4, %v5491_v2  ;;  %v5620_v26 = vor.u32 %v6520_v8, %v5619_v5 }
 0x159   : > { %3746 = vmatpush.bf16.msra.mxu1 %v5604_v32  ;;  %5358 = vmatmul.msk.bf16.vlgmr.msrb.gmra.mxu2 %vm7345_vm14, %v7169_v24  ;;  %v5395_v32 = vld [vmem:[#allocation2 + $0x40] sm:$0xf]  ;;  %v6676_v21 = vld [vmem:[#allocation2 + $0x6ec] sm:$0xf0] }
 0x15a   : > { %3759 = vmatpush.bf16.msra.mxu2 %v5732_v34  ;;  %5360 = vmatmul.msk.bf16.vlgmr.msrb.gmra.mxu3 %vm7355_vm15, %v7169_v24  ;;  %v6464_v34 = vld [vmem:[#allocation2 + $0x4c] sm:$0xf0]  ;;  %v6115_v15 = vld [vmem:[#allocation2 + $0x5e0] sm:$0xf] }
 0x15b   : > { %3772 = vmatpush.bf16.msra.mxu3 %v5860_v38  ;;  %v6496_v38 = vld [vmem:[#allocation2 + $0x14c] sm:$0xf0]  ;;  %v5396_v47 = vor.u32 %v6464_v34, %v5395_v32  ;;  %v6243_v19 = vld [vmem:[#allocation2 + $0x6e0] sm:$0xf] }
 0x15c   : > { %3734 = vmatpush.bf16.msra.mxu0 %v5460_v44  ;;  %v2228_v37 = vpop.f32.mrf.mxu2  ;;  %v2204_v42 = vpop.f32.mrf.mxu0  ;;  %v5779_v44 = vld [vmem:[#allocation2 + $0x340] sm:$0xf]  ;;  %v5524_v50 = vor.u32 %v6496_v38, %v5523_v35  ;;  %v6244_v34 = vor.u32 %v6676_v21, %v6243_v19  ;;  %v6664_v4 = vld [vmem:[#allocation2 + $0x68c] sm:$0xf0] }
 0x15d   : > { %3747 = vmatpush.bf16.msra.mxu1 %v5588_v45  ;;  %v2229_v40 = vadd.f32 %v2228_v37, %v2216_v16  ;;  %v2241_v41 = vpop.f32.mrf.mxu3  ;;  %v6560_v45 = vld [vmem:[#allocation2 + $0x34c] sm:$0xf0]  ;;  %v5971_v35 = vld [vmem:[#allocation2 + $0x4c0] sm:$0xf] }
 0x15e   : > { %3760 = vmatpush.bf16.msra.mxu2 %v5716_v46  ;;  %v2217_v46 = vpop.f32.mrf.mxu1  ;;  %v5780_v55 = vor.u32 %v6560_v45, %v5779_v44  ;;  %v6099_v37 = vld [vmem:[#allocation2 + $0x5c0] sm:$0xf]  ;;  %v6704_v42 = vld [vmem:[#allocation2 + $0x7cc] sm:$0xf0] }
 0x15f   : > { %3773 = vmatpush.bf16.msra.mxu3 %v5844_v51  ;;  %v7439_v49 = vadd.f32 %v2241_v41, %v2229_v40  ;;  %v5652_v51 = vor.u32 %v6528_v39, %v5651_v13  ;;  %v6640_v13 = vld [vmem:[#allocation2 + $0x5cc] sm:$0xf0]  ;;  %v6227_v39 = vld [vmem:[#allocation2 + $0x6c0] sm:$0xf] }
 0x160   : > { %3735 = vmatpush.bf16.msra.mxu0 %v5444_v57  ;;  %v5635_v57 = vld [vmem:[#allocation2 + $0x220] sm:$0xf]  ;;  %v6672_v40 = vld [vmem:[#allocation2 + $0x6cc] sm:$0xf0]  ;;  %v6100_v45 = vor.u32 %v6640_v13, %v6099_v37 }
 0x161   : > { %3748 = vmatpush.bf16.msra.mxu1 %v5572_v58  ;;  %v6524_v58 = vld [vmem:[#allocation2 + $0x22c] sm:$0xf0]  ;;  %v6355_v41 = vld [vmem:[#allocation2 + $0x7c0] sm:$0xf]  ;;  %v6228_v46 = vor.u32 %v6672_v40, %v6227_v39 }
 0x162   : > { %3761 = vmatpush.bf16.msra.mxu2 %v5700_v59  ;;  %v5763_v59 = vld [vmem:[#allocation2 + $0x320] sm:$0xf]  ;;  %v5636_v1 = vor.u32 %v6524_v58, %v5635_v57  ;;  %v6356_v52 = vor.u32 %v6704_v42, %v6355_v41  ;;  %v6700_v57 = vld [vmem:[#allocation2 + $0x7ac] sm:$0xf0] }
 0x163   : > { %3774 = vmatpush.bf16.msra.mxu3 %v5828_v63  ;;  %v6456_v63 = vld [vmem:[#allocation2 + $0xc] sm:$0xf0]  ;;  %v5764_v6 = vor.u32 %v6556_v60, %v5763_v59  ;;  %v6211_v54 = vld [vmem:[#allocation2 + $0x6a0] sm:$0xf] }
 0x164   : > { %3736 = vmatpush.bf16.msra.mxu0 %v5428_v9  ;;  %v2230_v7 = vpop.f32.mrf.mxu2  ;;  %v5747_v9 = vld [vmem:[#allocation2 + $0x300] sm:$0xf]  ;;  %v5364_v16 = vor.u32 %v6456_v63, %v5363_v62  ;;  %v6600_v62 = vld [vmem:[#allocation2 + $0x48c] sm:$0xf0] }
 0x165   : > { %3749 = vmatpush.bf16.msra.mxu1 %v5556_v10  ;;  %v6552_v10 = vld [vmem:[#allocation2 + $0x30c] sm:$0xf0]  ;;  %v6339_v56 = vld [vmem:[#allocation2 + $0x7a0] sm:$0xf] }
 0x166   : > { %3762 = vmatpush.bf16.msra.mxu2 %v5684_v3  ;;  %v2243_v3 = vpop.f32.mrf.mxu3  ;;  %v6067_v63 = vld [vmem:[#allocation2 + $0x580] sm:$0xf]  ;;  %v6696_v7 = vld [vmem:[#allocation2 + $0x78c] sm:$0xf0] }
 0x167   : > { %3775 = vmatpush.bf16.msra.mxu3 %v5812_v17  ;;  %v6644_v17 = vld [vmem:[#allocation2 + $0x5ec] sm:$0xf0]  ;;  %v6195_v2 = vld [vmem:[#allocation2 + $0x680] sm:$0xf] }
 0x168   : > { %3737 = vmatpush.bf16.msra.mxu0 %v5412_v28  ;;  %v6708_v28 = vld [vmem:[#allocation2 + $0x7ec] sm:$0xf0]  ;;  %v6116_v32 = vor.u32 %v6644_v17, %v6115_v15  ;;  %v6179_v21 = vld [vmem:[#allocation2 + $0x660] sm:$0xf] }
 0x169   : > { %3750 = vmatpush.bf16.msra.mxu1 %v5540_v48  ;;  %v5748_v48 = vor.u32 %v6552_v10, %v5747_v9  ;;  %v6372_v38 = vor.u32 %v6708_v28, %v6371_v27  ;;  %v6596_v15 = vld [vmem:[#allocation2 + $0x46c] sm:$0xf0]  ;;  %v6163_v13 = vld [vmem:[#allocation2 + $0x640] sm:$0xf] }
 0x16a   : > { %3763 = vmatpush.bf16.msra.mxu2 %v5668_v31  ;;  %v5988_v31 = vor.u32 %v6612_v12, %v5987_v11  ;;  %v6196_v11 = vor.u32 %v6664_v4, %v6195_v2  ;;  %v5923_v12 = vld [vmem:[#allocation2 + $0x460] sm:$0xf]  ;;  %v6628_v19 = vld [vmem:[#allocation2 + $0x56c] sm:$0xf0] }
 0x16b   : > { %3776 = vmatpush.bf16.msra.mxu3 %v5796_v36  ;;  %v6608_v36 = vld [vmem:[#allocation2 + $0x4cc] sm:$0xf0]  ;;  %v5924_v28 = vor.u32 %v6596_v15, %v5923_v12  ;;  %v6003_v4 = vld [vmem:[#allocation2 + $0x500] sm:$0xf]  ;;  %v6482_v12 = vld [vmem:[#allocation2 + $0xe4] sm:$0xf] }
 0x16c   : > { %3738 = vmatpush.bf16.msra.mxu0 %v5396_v47  ;;  %v5972_v44 = vor.u32 %v6608_v36, %v5971_v35  ;;  %v5955_v47 = vld [vmem:[#allocation2 + $0x4a0] sm:$0xf]  ;;  %v6692_v27 = vld [vmem:[#allocation2 + $0x76c] sm:$0xf0]  ;;  %v5477_v15 = vld [vmem:[#allocation2 + $0xf0] sm:$0xf0] }
 0x16d   : > { %3751 = vmatpush.bf16.msra.mxu1 %v5524_v50  ;;  %v6604_v50 = vld [vmem:[#allocation2 + $0x4ac] sm:$0xf0]  ;;  %v6035_v35 = vld [vmem:[#allocation2 + $0x540] sm:$0xf] }
 0x16e   : > { %3764 = vmatpush.bf16.msra.mxu2 %v5652_v51  ;;  %v6083_v51 = vld [vmem:[#allocation2 + $0x5a0] sm:$0xf]  ;;  %v5956_v58 = vor.u32 %v6604_v50, %v5955_v47  ;;  %v6656_v39 = vld [vmem:[#allocation2 + $0x64c] sm:$0xf0] }
 0x16f   : > { %3777 = vmatpush.bf16.msra.mxu3 %v5780_v55  ;;  %v6668_v55 = vld [vmem:[#allocation2 + $0x6ac] sm:$0xf0]  ;;  %v6084_v59 = vor.u32 %v6636_v53, %v6083_v51  ;;  %v5891_v53 = vld [vmem:[#allocation2 + $0x420] sm:$0xf] }
 0x170   : > { %3739 = vmatpush.bf16.msra.mxu0 %v5380_v61  ;;  %v6212_v60 = vor.u32 %v6668_v55, %v6211_v54  ;;  %v5939_v61 = vld [vmem:[#allocation2 + $0x480] sm:$0xf]  ;;  %v6588_v54 = vld [vmem:[#allocation2 + $0x42c] sm:$0xf0] }
 0x171   : > { %3752 = vmatpush.bf16.msra.mxu1 %v5508_v0  ;;  %v6340_v0 = vor.u32 %v6700_v57, %v6339_v56  ;;  %v5940_v9 = vor.u32 %v6600_v62, %v5939_v61  ;;  %v6019_v55 = vld [vmem:[#allocation2 + $0x520] sm:$0xf]  ;;  %v6620_v57 = vld [vmem:[#allocation2 + $0x52c] sm:$0xf0]  ;;  %v5892_v62 = vor.u32 %v6588_v54, %v5891_v53  ;;  %v6506_v53 = vld [vmem:[#allocation2 + $0x1a4] sm:$0xf] }
 0x172   : > { %3765 = vmatpush.bf16.msra.mxu2 %v5636_v1  ;;  %v6632_v1 = vld [vmem:[#allocation2 + $0x58c] sm:$0xf0] }
 0x173   : > { %3778 = vmatpush.bf16.msra.mxu3 %v5764_v6  ;;  %v6323_v6 = vld [vmem:[#allocation2 + $0x780] sm:$0xf]  ;;  %v6068_v3 = vor.u32 %v6632_v1, %v6067_v63  ;;  %v6684_v61 = vld [vmem:[#allocation2 + $0x72c] sm:$0xf0]  ;;  %v6020_v1 = vor.u32 %v6620_v57, %v6019_v55  ;;  %v5573_v55 = vld [vmem:[#allocation2 + $0x1b0] sm:$0xf0] }
 0x174   : > { %3740 = vmatpush.bf16.msra.mxu0 %v5364_v16  ;;  %v2254_v5 = vpop.f32.mrf.mxu0  ;;  %v6051_v16 = vld [vmem:[#allocation2 + $0x560] sm:$0xf]  ;;  %v6324_v17 = vor.u32 %v6696_v7, %v6323_v6  ;;  %v5701_v57 = vld [vmem:[#allocation2 + $0x2b0] sm:$0xf0] }
 0x175   : > { %3753 = vmatpush.bf16.msra.mxu1 %v5492_v22  ;;  %v2267_v8 = vpop.f32.mrf.mxu1  ;;  %v6660_v22 = vld [vmem:[#allocation2 + $0x66c] sm:$0xf0]  ;;  %v5875_v63 = vld [vmem:[#allocation2 + $0x400] sm:$0xf] }
 0x176   : > { %3766 = vmatpush.bf16.msra.mxu2 %v5620_v26  ;;  %v2268_v10 = vadd.f32 %v2267_v8, %v2254_v5  ;;  %v6307_v26 = vld [vmem:[#allocation2 + $0x760] sm:$0xf]  ;;  %v6616_v5 = vld [vmem:[#allocation2 + $0x50c] sm:$0xf0] }
 0x177   : > { %3779 = vmatpush.bf16.msra.mxu3 %v5748_v48  ;;  %6386 = vmatmul.msk.bf16.vlgmr.msra.gmra.mxu0 %vm7280_vm4, %v7169_v24  ;;  %v6052_v48 = vor.u32 %v6628_v19, %v6051_v16  ;;  %v6308_v36 = vor.u32 %v6692_v27, %v6307_v26  ;;  %v6131_v6 = vld [vmem:[#allocation2 + $0x600] sm:$0xf]  ;;  %v6514_v16 = vld [vmem:[#allocation2 + $0x1e4] sm:$0xf]  ;;  %v5605_v19 = vld [vmem:[#allocation2 + $0x1f0] sm:$0xf0]  ;;  %v6004_v26 = vor.u32 %v6616_v5, %v6003_v4 }
 0x178   : > { %3785 = vmatpush.bf16.msrb.mxu0 %v5988_v31  ;;  %6388 = vmatmul.msk.bf16.vlgmr.msra.gmra.mxu1 %vm7287_vm5, %v7169_v24  ;;  %v6180_v31 = vor.u32 %v6660_v22, %v6179_v21  ;;  %v6546_v21 = vld [vmem:[#allocation2 + $0x2e4] sm:$0xf]  ;;  %v5733_v22 = vld [vmem:[#allocation2 + $0x2f0] sm:$0xf0] }
 0x179   : > { %3798 = vmatpush.bf16.msrb.mxu1 %v6116_v32  ;;  %6390 = vmatmul.msk.bf16.vlgmr.msra.gmra.mxu2 %vm7297_vm6, %v7169_v24  ;;  %v5907_v32 = vld [vmem:[#allocation2 + $0x440] sm:$0xf]  ;;  %v5557_v4 = vld [vmem:[#allocation2 + $0x190] sm:$0xf0]  ;;  %v6534_v5 = vld [vmem:[#allocation2 + $0x284] sm:$0xf] }
 0x17a   : > { %3811 = vmatpush.bf16.msrb.mxu2 %v6244_v34  ;;  %6392 = vmatmul.msk.bf16.vlgmr.msra.gmra.mxu3 %vm7307_vm7, %v7169_v24  ;;  %v6592_v34 = vld [vmem:[#allocation2 + $0x44c] sm:$0xf0] }
 0x17b   : > { %3824 = vmatpush.bf16.msrb.mxu3 %v6372_v38  ;;  %v6624_v38 = vld [vmem:[#allocation2 + $0x54c] sm:$0xf0]  ;;  %v5908_v47 = vor.u32 %v6592_v34, %v5907_v32  ;;  %v5480_v32 = vor.u32 %v6482_v12, %v5477_v15  ;;  %v5608_v34 = vor.u32 %v6514_v16, %v5605_v19  ;;  %v6466_v16 = vld [vmem:[#allocation2 + $0x64] sm:$0xf] }
 0x17c   : > { %3786 = vmatpush.bf16.msrb.mxu0 %v5972_v44  ;;  %v2280_v37 = vpop.f32.mrf.mxu2  ;;  %v2256_v42 = vpop.f32.mrf.mxu0  ;;  %v6291_v44 = vld [vmem:[#allocation2 + $0x740] sm:$0xf]  ;;  %v6036_v51 = vor.u32 %v6624_v38, %v6035_v35  ;;  %v5736_v35 = vor.u32 %v6546_v21, %v5733_v22  ;;  %v6510_v38 = vld [vmem:[#allocation2 + $0x1c4] sm:$0xf] }
 0x17d   : > { %3799 = vmatpush.bf16.msrb.mxu1 %v6100_v45  ;;  %v2281_v40 = vadd.f32 %v2280_v37, %v2268_v10  ;;  %v2293_v41 = vpop.f32.mrf.mxu3  ;;  %v6688_v45 = vld [vmem:[#allocation2 + $0x74c] sm:$0xf0]  ;;  %v6259_v10 = vld [vmem:[#allocation2 + $0x700] sm:$0xf]  ;;  %v5461_v37 = vld [vmem:[#allocation2 + $0xd0] sm:$0xf0] }
 0x17e   : > { %3812 = vmatpush.bf16.msrb.mxu2 %v6228_v46  ;;  %v2269_v46 = vpop.f32.mrf.mxu1  ;;  %v6292_v56 = vor.u32 %v6688_v45, %v6291_v44  ;;  %v6574_v42 = vld [vmem:[#allocation2 + $0x3c4] sm:$0xf]  ;;  %v5845_v44 = vld [vmem:[#allocation2 + $0x3d0] sm:$0xf0] }
 0x17f   : > { %3825 = vmatpush.bf16.msrb.mxu3 %v6356_v52  ;;  %v7453_v50 = vadd.f32 %v2293_v41, %v2281_v40  ;;  %v6164_v52 = vor.u32 %v6656_v39, %v6163_v13  ;;  %v5589_v39 = vld [vmem:[#allocation2 + $0x1d0] sm:$0xf0]  ;;  %v6542_v40 = vld [vmem:[#allocation2 + $0x2c4] sm:$0xf]  ;;  %v5848_v54 = vor.u32 %v6574_v42, %v5845_v44 }
 0x180   : > { %3787 = vmatpush.bf16.msrb.mxu0 %v5956_v58  ;;  %v6147_v58 = vld [vmem:[#allocation2 + $0x620] sm:$0xf]  ;;  %v5717_v41 = vld [vmem:[#allocation2 + $0x2d0] sm:$0xf0]  ;;  %v5592_v46 = vor.u32 %v6510_v38, %v5589_v39  ;;  %v6498_v19 = vld [vmem:[#allocation2 + $0x164] sm:$0xf] }
 0x181   : > { %3800 = vmatpush.bf16.msrb.mxu1 %v6084_v59  ;;  %v6652_v59 = vld [vmem:[#allocation2 + $0x62c] sm:$0xf0]  ;;  %v5525_v39 = vld [vmem:[#allocation2 + $0x150] sm:$0xf0] }
 0x182   : > { %3813 = vmatpush.bf16.msrb.mxu2 %v6212_v60  ;;  %v6275_v60 = vld [vmem:[#allocation2 + $0x720] sm:$0xf]  ;;  %v6148_v2 = vor.u32 %v6652_v59, %v6147_v58  ;;  %v6570_v58 = vld [vmem:[#allocation2 + $0x3a4] sm:$0xf]  ;;  %v5829_v59 = vld [vmem:[#allocation2 + $0x3b0] sm:$0xf0] }
 0x183   : > { %3826 = vmatpush.bf16.msrb.mxu3 %v6340_v0  ;;  %v6584_v0 = vld [vmem:[#allocation2 + $0x40c] sm:$0xf0]  ;;  %v6276_v7 = vor.u32 %v6684_v61, %v6275_v60  ;;  %v5576_v61 = vor.u32 %v6506_v53, %v5573_v55 }
 0x184   : > { %3788 = vmatpush.bf16.msrb.mxu0 %v5940_v9  ;;  %v2282_v8 = vpop.f32.mrf.mxu2  ;;  %v6648_v9 = vld [vmem:[#allocation2 + $0x60c] sm:$0xf0] }
 0x185   : > { %3801 = vmatpush.bf16.msrb.mxu1 %v6068_v3  ;;  %v6680_v3 = vld [vmem:[#allocation2 + $0x70c] sm:$0xf0]  ;;  %v6132_v27 = vor.u32 %v6648_v9, %v6131_v6  ;;  %v5685_v6 = vld [vmem:[#allocation2 + $0x290] sm:$0xf0]  ;;  %v6566_v8 = vld [vmem:[#allocation2 + $0x384] sm:$0xf] }
 0x186   : > { %3814 = vmatpush.bf16.msrb.mxu2 %v6196_v11  ;;  %v2295_v11 = vpop.f32.mrf.mxu3  ;;  %v5813_v9 = vld [vmem:[#allocation2 + $0x390] sm:$0xf0]  ;;  %v5688_v15 = vor.u32 %v6534_v5, %v5685_v6 }
 0x187   : > { %3827 = vmatpush.bf16.msrb.mxu3 %v6324_v17  ;;  %v5876_v17 = vor.u32 %v6584_v0, %v5875_v63  ;;  %v6470_v63 = vld [vmem:[#allocation2 + $0x84] sm:$0xf]  ;;  %v5429_v0 = vld [vmem:[#allocation2 + $0x90] sm:$0xf0]  ;;  %v5816_v22 = vor.u32 %v6566_v8, %v5813_v9 }
 0x188   : > { %3789 = vmatpush.bf16.msrb.mxu0 %v5924_v28  ;;  %v6578_v28 = vld [vmem:[#allocation2 + $0x3e4] sm:$0xf]  ;;  %v5432_v11 = vor.u32 %v6470_v63, %v5429_v0  ;;  %v5765_v0 = vld [vmem:[#allocation2 + $0x330] sm:$0xf0] }
 0x189   : > { %3802 = vmatpush.bf16.msrb.mxu1 %v6052_v48  ;;  %v5861_v48 = vld [vmem:[#allocation2 + $0x3f0] sm:$0xf0]  ;;  %v6554_v63 = vld [vmem:[#allocation2 + $0x324] sm:$0xf] }
 0x18a   : > { %3815 = vmatpush.bf16.msrb.mxu2 %v6180_v31  ;;  %v6260_v31 = vor.u32 %v6680_v3, %v6259_v10  ;;  %v5864_v13 = vor.u32 %v6578_v28, %v5861_v48  ;;  %v5669_v28 = vld [vmem:[#allocation2 + $0x270] sm:$0xf0]  ;;  %v6562_v48 = vld [vmem:[#allocation2 + $0x364] sm:$0xf] }
 0x18b   : > { %3828 = vmatpush.bf16.msrb.mxu3 %v6308_v36  ;;  %v6478_v36 = vld [vmem:[#allocation2 + $0xc4] sm:$0xf]  ;;  %v5493_v8 = vld [vmem:[#allocation2 + $0x110] sm:$0xf0] }
 0x18c   : > { %3790 = vmatpush.bf16.msrb.mxu0 %v5908_v47  ;;  %v5464_v45 = vor.u32 %v6478_v36, %v5461_v37  ;;  %v5720_v47 = vor.u32 %v6542_v40, %v5717_v41  ;;  %v5397_v36 = vld [vmem:[#allocation2 + $0x50] sm:$0xf0]  ;;  %v6494_v37 = vld [vmem:[#allocation2 + $0x144] sm:$0xf] }
 0x18d   : > { %3803 = vmatpush.bf16.msrb.mxu1 %v6036_v51  ;;  %v6474_v51 = vld [vmem:[#allocation2 + $0xa4] sm:$0xf]  ;;  %v5653_v41 = vld [vmem:[#allocation2 + $0x250] sm:$0xf0] }
 0x18e   : > { %3816 = vmatpush.bf16.msrb.mxu2 %v6164_v52  ;;  %v5445_v52 = vld [vmem:[#allocation2 + $0xb0] sm:$0xf0]  ;;  %v6526_v40 = vld [vmem:[#allocation2 + $0x244] sm:$0xf] }
 0x18f   : > { %3829 = vmatpush.bf16.msrb.mxu3 %v6292_v56  ;;  %v6538_v56 = vld [vmem:[#allocation2 + $0x2a4] sm:$0xf]  ;;  %v5448_v60 = vor.u32 %v6474_v51, %v5445_v52  ;;  %v5656_v55 = vor.u32 %v6526_v40, %v5653_v41  ;;  %v6101_v41 = vld [vmem:[#allocation2 + $0x5d0] sm:$0xf0] }
 0x190   : > { %3791 = vmatpush.bf16.msrb.mxu0 %v5892_v62  ;;  %v5704_v62 = vor.u32 %v6538_v56, %v5701_v57  ;;  %v6458_v56 = vld [vmem:[#allocation2 + $0x24] sm:$0xf]  ;;  %v5381_v57 = vld [vmem:[#allocation2 + $0x30] sm:$0xf0] }
 0x191   : > { %3804 = vmatpush.bf16.msrb.mxu1 %v6020_v1  ;;  %v6502_v1 = vld [vmem:[#allocation2 + $0x184] sm:$0xf] }
 0x192   : > { %3817 = vmatpush.bf16.msrb.mxu2 %v6148_v2  ;;  %v5832_v2 = vor.u32 %v6570_v58, %v5829_v59  ;;  %v5560_v12 = vor.u32 %v6502_v1, %v5557_v4  ;;  %v6490_v58 = vld [vmem:[#allocation2 + $0x124] sm:$0xf]  ;;  %v5384_v1 = vor.u32 %v6458_v56, %v5381_v57  ;;  %v5365_v4 = vld [vmem:[#allocation2 + $0x10] sm:$0xf0] }
 0x193   : > { %3830 = vmatpush.bf16.msrb.mxu3 %v6276_v7  ;;  %v6518_v9 = vld [vmem:[#allocation2 + $0x204] sm:$0xf] }
 0x194   : > { %3792 = vmatpush.bf16.msrb.mxu0 %v5876_v17  ;;  %v2306_v7 = vpop.f32.mrf.mxu0  ;;  %v5413_v17 = vld [vmem:[#allocation2 + $0x70] sm:$0xf0]  ;;  %v6634_v56 = vld [vmem:[#allocation2 + $0x5a4] sm:$0xf] }
 0x195   : > { %3805 = vmatpush.bf16.msrb.mxu1 %v6004_v26  ;;  %v2307_v10 = vadd.f32 %v2306_v7, %v7453_v50  ;;  %v2319_v3 = vpop.f32.mrf.mxu1  ;;  %v5541_v26 = vld [vmem:[#allocation2 + $0x170] sm:$0xf0]  ;;  %v6486_v7 = vld [vmem:[#allocation2 + $0x104] sm:$0xf] }
 0x196   : > { %3818 = vmatpush.bf16.msrb.mxu2 %v6132_v27  ;;  %v6530_v27 = vld [vmem:[#allocation2 + $0x264] sm:$0xf]  ;;  %v5544_v50 = vor.u32 %v6498_v19, %v5541_v26  ;;  %v5989_v19 = vld [vmem:[#allocation2 + $0x4f0] sm:$0xf0] }
 0x197   : > { %3831 = vmatpush.bf16.msrb.mxu3 %v6260_v31  ;;  %6394 = vmatmul.msk.bf16.vlgmr.msrb.gmra.mxu0 %vm7325_vm12, %v7169_v24  ;;  %v2320_v21 = vadd.f32 %v2319_v3, %v2307_v10  ;;  %v5797_v31 = vld [vmem:[#allocation2 + $0x370] sm:$0xf0]  ;;  %v5768_v10 = vor.u32 %v6554_v63, %v5765_v0 }
 0x198   : > { %3837 = vmatpush.bf16.msra.mxu0 %v5480_v32  ;;  %6396 = vmatmul.msk.bf16.vlgmr.msrb.gmra.mxu1 %vm7335_vm13, %v7169_v24  ;;  %v5416_v32 = vor.u32 %v6466_v16, %v5413_v17  ;;  %v5800_v38 = vor.u32 %v6562_v48, %v5797_v31  ;;  %v6610_v17 = vld [vmem:[#allocation2 + $0x4e4] sm:$0xf]  ;;  %v6117_v26 = vld [vmem:[#allocation2 + $0x5f0] sm:$0xf0]  ;;  %v5496_v48 = vor.u32 %v6486_v7, %v5493_v8 }
 0x199   : > { %3850 = vmatpush.bf16.msra.mxu1 %v5608_v34  ;;  %6398 = vmatmul.msk.bf16.vlgmr.msrb.gmra.mxu2 %vm7345_vm14, %v7169_v24  ;;  %v5672_v34 = vor.u32 %v6530_v27, %v5669_v28  ;;  %v6674_v27 = vld [vmem:[#allocation2 + $0x6e4] sm:$0xf]  ;;  %v6245_v28 = vld [vmem:[#allocation2 + $0x6f0] sm:$0xf0] }
 0x19a   : > { %3863 = vmatpush.bf16.msra.mxu2 %v5736_v35  ;;  %6400 = vmatmul.msk.bf16.vlgmr.msrb.gmra.mxu3 %vm7355_vm15, %v7169_v24  ;;  %v6462_v35 = vld [vmem:[#allocation2 + $0x44] sm:$0xf]  ;;  %v6069_v7 = vld [vmem:[#allocation2 + $0x590] sm:$0xf0] }
 0x19b   : > { %3876 = vmatpush.bf16.msra.mxu3 %v5864_v13  ;;  %v5400_v52 = vor.u32 %v6462_v35, %v5397_v36  ;;  %v5992_v35 = vor.u32 %v6610_v17, %v5989_v19  ;;  %v6662_v8 = vld [vmem:[#allocation2 + $0x684] sm:$0xf] }
 0x19c   : > { %3838 = vmatpush.bf16.msra.mxu0 %v5464_v45  ;;  %v2332_v13 = vpop.f32.mrf.mxu2  ;;  %v2308_v45 = vpop.f32.mrf.mxu0 }
 0x19d   : > { %3851 = vmatpush.bf16.msra.mxu1 %v5592_v46  ;;  %v2333_v42 = vadd.f32 %v2332_v13, %v2320_v21  ;;  %v2345_v44 = vpop.f32.mrf.mxu3  ;;  %v6558_v46 = vld [vmem:[#allocation2 + $0x344] sm:$0xf]  ;;  %v2321_v51 = vpop.f32.mrf.mxu1  ;;  %v5973_v13 = vld [vmem:[#allocation2 + $0x4d0] sm:$0xf0] }
 0x19e   : > { %3864 = vmatpush.bf16.msra.mxu2 %v5720_v47  ;;  %v5781_v47 = vld [vmem:[#allocation2 + $0x350] sm:$0xf0]  ;;  %v6642_v21 = vld [vmem:[#allocation2 + $0x5e4] sm:$0xf] }
 0x19f   : > { %3877 = vmatpush.bf16.msra.mxu3 %v5848_v54  ;;  %v7468_v53 = vadd.f32 %v2345_v44, %v2333_v42  ;;  %v5528_v54 = vor.u32 %v6494_v37, %v5525_v39  ;;  %v5784_v59 = vor.u32 %v6558_v46, %v5781_v47  ;;  %v6120_v36 = vor.u32 %v6642_v21, %v6117_v26  ;;  %v6638_v39 = vld [vmem:[#allocation2 + $0x5c4] sm:$0xf]  ;;  %v6229_v44 = vld [vmem:[#allocation2 + $0x6d0] sm:$0xf0] }
 0x1a0   : > { %3839 = vmatpush.bf16.msra.mxu0 %v5448_v60  ;;  %v5509_v60 = vld [vmem:[#allocation2 + $0x130] sm:$0xf0]  ;;  %v6248_v37 = vor.u32 %v6674_v27, %v6245_v28  ;;  %v6670_v42 = vld [vmem:[#allocation2 + $0x6c4] sm:$0xf]  ;;  %v6104_v51 = vor.u32 %v6638_v39, %v6101_v41 }
 0x1a1   : > { %3852 = vmatpush.bf16.msra.mxu1 %v5576_v61  ;;  %v6522_v61 = vld [vmem:[#allocation2 + $0x224] sm:$0xf]  ;;  %v5512_v5 = vor.u32 %v6490_v58, %v5509_v60  ;;  %v6357_v46 = vld [vmem:[#allocation2 + $0x7d0] sm:$0xf0] }
 0x1a2   : > { %3865 = vmatpush.bf16.msra.mxu2 %v5704_v62  ;;  %v5637_v62 = vld [vmem:[#allocation2 + $0x230] sm:$0xf0]  ;;  %v6702_v45 = vld [vmem:[#allocation2 + $0x7c4] sm:$0xf] }
 0x1a3   : > { %3878 = vmatpush.bf16.msra.mxu3 %v5832_v2  ;;  %v6454_v2 = vld [vmem:[#allocation2 + $0x4] sm:$0xf]  ;;  %v5640_v6 = vor.u32 %v6522_v61, %v5637_v62  ;;  %v6360_v57 = vor.u32 %v6702_v45, %v6357_v46  ;;  %v6085_v58 = vld [vmem:[#allocation2 + $0x5b0] sm:$0xf0] }
 0x1a4   : > { %3840 = vmatpush.bf16.msra.mxu0 %v5432_v11  ;;  %v2334_v3 = vpop.f32.mrf.mxu2  ;;  %v5621_v11 = vld [vmem:[#allocation2 + $0x210] sm:$0xf0]  ;;  %v6698_v61 = vld [vmem:[#allocation2 + $0x7a4] sm:$0xf]  ;;  %v6088_v0 = vor.u32 %v6634_v56, %v6085_v58 }
 0x1a5   : > { %3853 = vmatpush.bf16.msra.mxu1 %v5560_v12  ;;  %v6550_v12 = vld [vmem:[#allocation2 + $0x304] sm:$0xf]  ;;  %v2347_v16 = vpop.f32.mrf.mxu3  ;;  %v5624_v31 = vor.u32 %v6518_v9, %v5621_v11  ;;  %v6213_v60 = vld [vmem:[#allocation2 + $0x6b0] sm:$0xf0] }
 0x1a6   : > { %3866 = vmatpush.bf16.msra.mxu2 %v5688_v15  ;;  %v5749_v15 = vld [vmem:[#allocation2 + $0x310] sm:$0xf0]  ;;  %v6694_v3 = vld [vmem:[#allocation2 + $0x784] sm:$0xf] }
 0x1a7   : > { %3879 = vmatpush.bf16.msra.mxu3 %v5816_v22  ;;  %v5368_v22 = vor.u32 %v6454_v2, %v5365_v4  ;;  %v6341_v62 = vld [vmem:[#allocation2 + $0x7b0] sm:$0xf0]  ;;  %v6598_v2 = vld [vmem:[#allocation2 + $0x484] sm:$0xf] }
 0x1a8   : > { %3841 = vmatpush.bf16.msra.mxu0 %v5416_v32  ;;  %v6706_v32 = vld [vmem:[#allocation2 + $0x7e4] sm:$0xf]  ;;  %v5941_v4 = vld [vmem:[#allocation2 + $0x490] sm:$0xf0] }
 0x1a9   : > { %3854 = vmatpush.bf16.msra.mxu1 %v5544_v50  ;;  %v6373_v50 = vld [vmem:[#allocation2 + $0x7f0] sm:$0xf0]  ;;  %v6594_v21 = vld [vmem:[#allocation2 + $0x464] sm:$0xf] }
 0x1aa   : > { %3867 = vmatpush.bf16.msra.mxu2 %v5672_v34  ;;  %v5752_v34 = vor.u32 %v6550_v12, %v5749_v15  ;;  %v6376_v40 = vor.u32 %v6706_v32, %v6373_v50  ;;  %v6197_v9 = vld [vmem:[#allocation2 + $0x690] sm:$0xf0]  ;;  %v5944_v15 = vor.u32 %v6598_v2, %v5941_v4  ;;  %v6626_v26 = vld [vmem:[#allocation2 + $0x564] sm:$0xf] }
 0x1ab   : > { %3880 = vmatpush.bf16.msra.mxu3 %v5800_v38  ;;  %v6606_v38 = vld [vmem:[#allocation2 + $0x4c4] sm:$0xf]  ;;  %v6325_v11 = vld [vmem:[#allocation2 + $0x790] sm:$0xf0]  ;;  %v6200_v19 = vor.u32 %v6662_v8, %v6197_v9 }
 0x1ac   : > { %3842 = vmatpush.bf16.msra.mxu0 %v5400_v52  ;;  %v5976_v47 = vor.u32 %v6606_v38, %v5973_v13  ;;  %v6232_v52 = vor.u32 %v6670_v42, %v6229_v44  ;;  %v6328_v27 = vor.u32 %v6694_v3, %v6325_v11  ;;  %v6053_v28 = vld [vmem:[#allocation2 + $0x570] sm:$0xf0]  ;;  %v6690_v32 = vld [vmem:[#allocation2 + $0x764] sm:$0xf] }
 0x1ad   : > { %3855 = vmatpush.bf16.msra.mxu1 %v5528_v54  ;;  %v6602_v54 = vld [vmem:[#allocation2 + $0x4a4] sm:$0xf]  ;;  %v6309_v50 = vld [vmem:[#allocation2 + $0x770] sm:$0xf0] }
 0x1ae   : > { %3868 = vmatpush.bf16.msra.mxu2 %v5656_v55  ;;  %v5957_v55 = vld [vmem:[#allocation2 + $0x4b0] sm:$0xf0]  ;;  %v6622_v13 = vld [vmem:[#allocation2 + $0x544] sm:$0xf]  ;;  %v6312_v39 = vor.u32 %v6690_v32, %v6309_v50  ;;  %v6549_v32 = vld [vmem:[#allocation2 + $0x2f4] sm:$0xf0] }
 0x1af   : > { %3881 = vmatpush.bf16.msra.mxu3 %v5784_v59  ;;  %v6666_v59 = vld [vmem:[#allocation2 + $0x6a4] sm:$0xf]  ;;  %v5960_v63 = vor.u32 %v6602_v54, %v5957_v55  ;;  %v5909_v38 = vld [vmem:[#allocation2 + $0x450] sm:$0xf0] }
 0x1b0   : > { %3843 = vmatpush.bf16.msra.mxu0 %v5384_v1  ;;  %v6216_v1 = vor.u32 %v6666_v59, %v6213_v60  ;;  %v6037_v41 = vld [vmem:[#allocation2 + $0x550] sm:$0xf0]  ;;  %v6654_v42 = vld [vmem:[#allocation2 + $0x644] sm:$0xf] }
 0x1b1   : > { %3856 = vmatpush.bf16.msra.mxu1 %v5512_v5  ;;  %v6630_v5 = vld [vmem:[#allocation2 + $0x584] sm:$0xf]  ;;  %v6165_v44 = vld [vmem:[#allocation2 + $0x650] sm:$0xf0] }
 0x1b2   : > { %3869 = vmatpush.bf16.msra.mxu2 %v5640_v6  ;;  %v6344_v6 = vor.u32 %v6698_v61, %v6341_v62  ;;  %v6072_v17 = vor.u32 %v6630_v5, %v6069_v7  ;;  %v6168_v58 = vor.u32 %v6654_v42, %v6165_v44  ;;  %v6586_v59 = vld [vmem:[#allocation2 + $0x424] sm:$0xf]  ;;  %v5893_v60 = vld [vmem:[#allocation2 + $0x430] sm:$0xf0]  ;;  %v5595_v42 = vld [vmem:[#allocation2 + $0x1c8] sm:$0xf] }
 0x1b3   : > { %3882 = vmatpush.bf16.msra.mxu3 %v5768_v10  ;;  %v6618_v61 = vld [vmem:[#allocation2 + $0x524] sm:$0xf]  ;;  %v6277_v4 = vld [vmem:[#allocation2 + $0x730] sm:$0xf0]  ;;  %v5896_v5 = vor.u32 %v6586_v59, %v5893_v60  ;;  %v6477_v59 = vld [vmem:[#allocation2 + $0xb4] sm:$0xf0] }
 0x1b4   : > { %3844 = vmatpush.bf16.msra.mxu0 %v5368_v22  ;;  %v2358_v10 = vpop.f32.mrf.mxu0  ;;  %v5925_v22 = vld [vmem:[#allocation2 + $0x470] sm:$0xf0]  ;;  %v6682_v2 = vld [vmem:[#allocation2 + $0x724] sm:$0xf]  ;;  %v5579_v60 = vld [vmem:[#allocation2 + $0x1a8] sm:$0xf] }
 0x1b5   : > { %3857 = vmatpush.bf16.msra.mxu1 %v5496_v48  ;;  %v2371_v12 = vpop.f32.mrf.mxu1  ;;  %v6658_v48 = vld [vmem:[#allocation2 + $0x664] sm:$0xf]  ;;  %v5877_v7 = vld [vmem:[#allocation2 + $0x410] sm:$0xf0] }
 0x1b6   : > { %3870 = vmatpush.bf16.msra.mxu2 %v5624_v31  ;;  %v2372_v16 = vadd.f32 %v2371_v12, %v2358_v10  ;;  %v6181_v31 = vld [vmem:[#allocation2 + $0x670] sm:$0xf0]  ;;  %v6614_v10 = vld [vmem:[#allocation2 + $0x504] sm:$0xf]  ;;  %v6280_v12 = vor.u32 %v6682_v2, %v6277_v4  ;;  %v6573_v2 = vld [vmem:[#allocation2 + $0x3b4] sm:$0xf0] }
 0x1b7   : > { %3883 = vmatpush.bf16.msra.mxu3 %v5752_v34  ;;  %6402 = vmatmul.msk.bf16.vlgmr.msra.gmra.mxu0 %vm7280_vm4, %v7169_v24  ;;  %v5928_v34 = vor.u32 %v6594_v21, %v5925_v22  ;;  %v6005_v3 = vld [vmem:[#allocation2 + $0x510] sm:$0xf0]  ;;  %v6646_v11 = vld [vmem:[#allocation2 + $0x604] sm:$0xf]  ;;  %v5483_v22 = vld [vmem:[#allocation2 + $0xe8] sm:$0xf] }
 0x1b8   : > { %3889 = vmatpush.bf16.msrb.mxu0 %v5992_v35  ;;  %6404 = vmatmul.msk.bf16.vlgmr.msra.gmra.mxu1 %vm7287_vm5, %v7169_v24  ;;  %v6056_v35 = vor.u32 %v6626_v26, %v6053_v28  ;;  %v6485_v26 = vld [vmem:[#allocation2 + $0xf4] sm:$0xf0]  ;;  %v6008_v50 = vor.u32 %v6614_v10, %v6005_v3 }
 0x1b9   : > { %3902 = vmatpush.bf16.msrb.mxu1 %v6120_v36  ;;  %6406 = vmatmul.msk.bf16.vlgmr.msra.gmra.mxu2 %vm7297_vm6, %v7169_v24  ;;  %v6184_v36 = vor.u32 %v6658_v48, %v6181_v31  ;;  %v6517_v48 = vld [vmem:[#allocation2 + $0x1f4] sm:$0xf0]  ;;  %v5739_v31 = vld [vmem:[#allocation2 + $0x2e8] sm:$0xf] }
 0x1ba   : > { %3915 = vmatpush.bf16.msrb.mxu2 %v6248_v37  ;;  %6408 = vmatmul.msk.bf16.vlgmr.msra.gmra.mxu3 %vm7307_vm7, %v7169_v24  ;;  %v6590_v37 = vld [vmem:[#allocation2 + $0x444] sm:$0xf]  ;;  %v6505_v3 = vld [vmem:[#allocation2 + $0x194] sm:$0xf0] }
 0x1bb   : > { %3928 = vmatpush.bf16.msrb.mxu3 %v6376_v40  ;;  %v5912_v55 = vor.u32 %v6590_v37, %v5909_v38  ;;  %v5484_v38 = vor.u32 %v6485_v26, %v5483_v22 }
 0x1bc   : > { %3890 = vmatpush.bf16.msrb.mxu0 %v5976_v47  ;;  %v2384_v40 = vpop.f32.mrf.mxu2  ;;  %v2360_v47 = vpop.f32.mrf.mxu0 }
 0x1bd   : > { %3903 = vmatpush.bf16.msrb.mxu1 %v6104_v51  ;;  %v2385_v45 = vadd.f32 %v2384_v40, %v2372_v16  ;;  %v2397_v46 = vpop.f32.mrf.mxu3  ;;  %v6686_v51 = vld [vmem:[#allocation2 + $0x744] sm:$0xf]  ;;  %v2373_v54 = vpop.f32.mrf.mxu1  ;;  %v6133_v16 = vld [vmem:[#allocation2 + $0x610] sm:$0xf0]  ;;  %v5467_v40 = vld [vmem:[#allocation2 + $0xc8] sm:$0xf] }
 0x1be   : > { %3916 = vmatpush.bf16.msrb.mxu2 %v6232_v52  ;;  %v6293_v52 = vld [vmem:[#allocation2 + $0x750] sm:$0xf0]  ;;  %v6545_v47 = vld [vmem:[#allocation2 + $0x2d4] sm:$0xf0] }
 0x1bf   : > { %3929 = vmatpush.bf16.msrb.mxu3 %v6360_v57  ;;  %v7482_v56 = vadd.f32 %v2397_v46, %v2385_v45  ;;  %v6040_v57 = vor.u32 %v6622_v13, %v6037_v41  ;;  %v6296_v62 = vor.u32 %v6686_v51, %v6293_v52  ;;  %v6481_v41 = vld [vmem:[#allocation2 + $0xd4] sm:$0xf0]  ;;  %v5723_v46 = vld [vmem:[#allocation2 + $0x2c8] sm:$0xf] }
 0x1c0   : > { %3891 = vmatpush.bf16.msrb.mxu0 %v5960_v63  ;;  %v6021_v63 = vld [vmem:[#allocation2 + $0x530] sm:$0xf0]  ;;  %v6513_v45 = vld [vmem:[#allocation2 + $0x1d4] sm:$0xf0]  ;;  %v5851_v51 = vld [vmem:[#allocation2 + $0x3c8] sm:$0xf]  ;;  %v5468_v54 = vor.u32 %v6481_v41, %v5467_v40 }
 0x1c1   : > { %3904 = vmatpush.bf16.msrb.mxu1 %v6088_v0  ;;  %v6650_v0 = vld [vmem:[#allocation2 + $0x624] sm:$0xf]  ;;  %v6024_v8 = vor.u32 %v6618_v61, %v6021_v63  ;;  %v6577_v52 = vld [vmem:[#allocation2 + $0x3d4] sm:$0xf0]  ;;  %v5707_v63 = vld [vmem:[#allocation2 + $0x2a8] sm:$0xf] }
 0x1c2   : > { %3917 = vmatpush.bf16.msrb.mxu2 %v6216_v1  ;;  %v6149_v1 = vld [vmem:[#allocation2 + $0x630] sm:$0xf0]  ;;  %v5852_v61 = vor.u32 %v6577_v52, %v5851_v51  ;;  %v5403_v40 = vld [vmem:[#allocation2 + $0x48] sm:$0xf]  ;;  %v6465_v41 = vld [vmem:[#allocation2 + $0x54] sm:$0xf0] }
 0x1c3   : > { %3930 = vmatpush.bf16.msrb.mxu3 %v6344_v6  ;;  %v6582_v6 = vld [vmem:[#allocation2 + $0x404] sm:$0xf]  ;;  %v6152_v9 = vor.u32 %v6650_v0, %v6149_v1  ;;  %v6541_v0 = vld [vmem:[#allocation2 + $0x2b4] sm:$0xf0]  ;;  %v5835_v1 = vld [vmem:[#allocation2 + $0x3a8] sm:$0xf] }
 0x1c4   : > { %3892 = vmatpush.bf16.msrb.mxu0 %v5944_v15  ;;  %v2386_v15 = vpop.f32.mrf.mxu2  ;;  %v5880_v28 = vor.u32 %v6582_v6, %v5877_v7  ;;  %v5708_v6 = vor.u32 %v6541_v0, %v5707_v63  ;;  %v5435_v7 = vld [vmem:[#allocation2 + $0x88] sm:$0xf]  ;;  %v5836_v10 = vor.u32 %v6573_v2, %v5835_v1  ;;  %v6529_v51 = vld [vmem:[#allocation2 + $0x254] sm:$0xf0] }
 0x1c5   : > { %3905 = vmatpush.bf16.msrb.mxu1 %v6072_v17  ;;  %v6678_v17 = vld [vmem:[#allocation2 + $0x704] sm:$0xf]  ;;  %v2399_v21 = vpop.f32.mrf.mxu3  ;;  %v5387_v0 = vld [vmem:[#allocation2 + $0x28] sm:$0xf]  ;;  %v6461_v1 = vld [vmem:[#allocation2 + $0x34] sm:$0xf0] }
 0x1c6   : > { %3918 = vmatpush.bf16.msrb.mxu2 %v6200_v19  ;;  %v6261_v19 = vld [vmem:[#allocation2 + $0x710] sm:$0xf0]  ;;  %v5515_v2 = vld [vmem:[#allocation2 + $0x128] sm:$0xf] }
 0x1c7   : > { %3931 = vmatpush.bf16.msrb.mxu3 %v6328_v27  ;;  %v5611_v27 = vld [vmem:[#allocation2 + $0x1e8] sm:$0xf]  ;;  %v6264_v37 = vor.u32 %v6678_v17, %v6261_v19  ;;  %v6569_v17 = vld [vmem:[#allocation2 + $0x394] sm:$0xf0] }
 0x1c8   : > { %3893 = vmatpush.bf16.msrb.mxu0 %v5928_v34  ;;  %v6136_v34 = vor.u32 %v6646_v11, %v6133_v16  ;;  %v5612_v13 = vor.u32 %v6517_v48, %v5611_v27  ;;  %v5691_v11 = vld [vmem:[#allocation2 + $0x288] sm:$0xf]  ;;  %v6469_v48 = vld [vmem:[#allocation2 + $0x74] sm:$0xf0] }
 0x1c9   : > { %3906 = vmatpush.bf16.msrb.mxu1 %v6056_v35  ;;  %v5867_v35 = vld [vmem:[#allocation2 + $0x3e8] sm:$0xf] }
 0x1ca   : > { %3919 = vmatpush.bf16.msrb.mxu2 %v6184_v36  ;;  %v6581_v36 = vld [vmem:[#allocation2 + $0x3f4] sm:$0xf0]  ;;  %v5819_v16 = vld [vmem:[#allocation2 + $0x388] sm:$0xf] }
 0x1cb   : > { %3932 = vmatpush.bf16.msrb.mxu3 %v6312_v39  ;;  %v5740_v39 = vor.u32 %v6549_v32, %v5739_v31  ;;  %v5868_v44 = vor.u32 %v6581_v36, %v5867_v35  ;;  %v5547_v31 = vld [vmem:[#allocation2 + $0x168] sm:$0xf]  ;;  %v6533_v36 = vld [vmem:[#allocation2 + $0x274] sm:$0xf0] }
 0x1cc   : > { %3894 = vmatpush.bf16.msrb.mxu0 %v5912_v55  ;;  %v5596_v55 = vor.u32 %v6513_v45, %v5595_v42  ;;  %v5675_v35 = vld [vmem:[#allocation2 + $0x268] sm:$0xf] }
 0x1cd   : > { %3907 = vmatpush.bf16.msrb.mxu1 %v6040_v57  ;;  %v5724_v57 = vor.u32 %v6545_v47, %v5723_v46  ;;  %v5531_v42 = vld [vmem:[#allocation2 + $0x148] sm:$0xf]  ;;  %v6497_v46 = vld [vmem:[#allocation2 + $0x154] sm:$0xf0] }
 0x1ce   : > { %3920 = vmatpush.bf16.msrb.mxu2 %v6168_v58  ;;  %v5451_v58 = vld [vmem:[#allocation2 + $0xa8] sm:$0xf] }
 0x1cf   : > { %3933 = vmatpush.bf16.msrb.mxu3 %v6296_v62  ;;  %v6509_v62 = vld [vmem:[#allocation2 + $0x1b4] sm:$0xf0]  ;;  %v5452_v4 = vor.u32 %v6477_v59, %v5451_v58  ;;  %v5659_v47 = vld [vmem:[#allocation2 + $0x248] sm:$0xf] }
 0x1d0   : > { %3895 = vmatpush.bf16.msrb.mxu0 %v5896_v5  ;;  %v5580_v5 = vor.u32 %v6509_v62, %v5579_v60  ;;  %v6561_v58 = vld [vmem:[#allocation2 + $0x354] sm:$0xf0]  ;;  %v5404_v60 = vor.u32 %v6465_v41, %v5403_v40  ;;  %v5532_v62 = vor.u32 %v6497_v46, %v5531_v42  ;;  %v5660_v63 = vor.u32 %v6529_v51, %v5659_v47  ;;  %v6107_v47 = vld [vmem:[#allocation2 + $0x5c8] sm:$0xf] }
 0x1d1   : > { %3908 = vmatpush.bf16.msrb.mxu1 %v6024_v8  ;;  %v6473_v8 = vld [vmem:[#allocation2 + $0x94] sm:$0xf0] }
 0x1d2   : > { %3921 = vmatpush.bf16.msrb.mxu2 %v6152_v9  ;;  %v5563_v9 = vld [vmem:[#allocation2 + $0x188] sm:$0xf]  ;;  %v5436_v22 = vor.u32 %v6473_v8, %v5435_v7  ;;  %v6525_v7 = vld [vmem:[#allocation2 + $0x234] sm:$0xf0] }
 0x1d3   : > { %3934 = vmatpush.bf16.msrb.mxu3 %v6280_v12  ;;  %v6537_v12 = vld [vmem:[#allocation2 + $0x294] sm:$0xf0]  ;;  %v5564_v26 = vor.u32 %v6505_v3, %v5563_v9  ;;  %v5771_v8 = vld [vmem:[#allocation2 + $0x328] sm:$0xf] }
 0x1d4   : > { %3896 = vmatpush.bf16.msrb.mxu0 %v5880_v28  ;;  %v2410_v15 = vpop.f32.mrf.mxu0  ;;  %v5692_v27 = vor.u32 %v6537_v12, %v5691_v11  ;;  %v5419_v28 = vld [vmem:[#allocation2 + $0x68] sm:$0xf]  ;;  %v6557_v9 = vld [vmem:[#allocation2 + $0x334] sm:$0xf0] }
 0x1d5   : > { %3909 = vmatpush.bf16.msrb.mxu1 %v6008_v50  ;;  %v2411_v19 = vadd.f32 %v2410_v15, %v7482_v56  ;;  %v2423_v21 = vpop.f32.mrf.mxu1  ;;  %v5820_v50 = vor.u32 %v6569_v17, %v5819_v16  ;;  %v5371_v3 = vld [vmem:[#allocation2 + $0x8] sm:$0xf]  ;;  %v6457_v11 = vld [vmem:[#allocation2 + $0x14] sm:$0xf0] }
 0x1d6   : > { %3922 = vmatpush.bf16.msrb.mxu2 %v6136_v34  ;;  %v6501_v34 = vld [vmem:[#allocation2 + $0x174] sm:$0xf0]  ;;  %v5499_v16 = vld [vmem:[#allocation2 + $0x108] sm:$0xf] }
 0x1d7   : > { %3935 = vmatpush.bf16.msrb.mxu3 %v6264_v37  ;;  %6410 = vmatmul.msk.bf16.vlgmr.msrb.gmra.mxu0 %vm7325_vm12, %v7169_v24  ;;  %v2424_v32 = vadd.f32 %v2423_v21, %v2411_v19  ;;  %v5803_v37 = vld [vmem:[#allocation2 + $0x368] sm:$0xf]  ;;  %v5548_v56 = vor.u32 %v6501_v34, %v5547_v31  ;;  %v6489_v17 = vld [vmem:[#allocation2 + $0x114] sm:$0xf0]  ;;  %v5772_v21 = vor.u32 %v6557_v9, %v5771_v8 }
 0x1d8   : > { %3941 = vmatpush.bf16.msra.mxu0 %v5484_v38  ;;  %6412 = vmatmul.msk.bf16.vlgmr.msrb.gmra.mxu1 %vm7335_vm13, %v7169_v24  ;;  %v6565_v38 = vld [vmem:[#allocation2 + $0x374] sm:$0xf0]  ;;  %v5627_v19 = vld [vmem:[#allocation2 + $0x208] sm:$0xf]  ;;  %v5372_v34 = vor.u32 %v6457_v11, %v5371_v3 }
 0x1d9   : > { %3954 = vmatpush.bf16.msra.mxu1 %v5612_v13  ;;  %6414 = vmatmul.msk.bf16.vlgmr.msrb.gmra.mxu2 %vm7345_vm14, %v7169_v24  ;;  %v5420_v13 = vor.u32 %v6469_v48, %v5419_v28  ;;  %v6553_v28 = vld [vmem:[#allocation2 + $0x314] sm:$0xf0]  ;;  %v5995_v31 = vld [vmem:[#allocation2 + $0x4e8] sm:$0xf] }
 0x1da   : > { %3967 = vmatpush.bf16.msra.mxu2 %v5740_v39  ;;  %6416 = vmatmul.msk.bf16.vlgmr.msrb.gmra.mxu3 %vm7355_vm15, %v7169_v24  ;;  %v5676_v39 = vor.u32 %v6533_v36, %v5675_v35  ;;  %v6645_v35 = vld [vmem:[#allocation2 + $0x5f4] sm:$0xf0]  ;;  %v6251_v36 = vld [vmem:[#allocation2 + $0x6e8] sm:$0xf] }
 0x1db   : > { %3980 = vmatpush.bf16.msra.mxu3 %v5868_v44  ;;  %v5804_v44 = vor.u32 %v6565_v38, %v5803_v37  ;;  %v6677_v37 = vld [vmem:[#allocation2 + $0x6f4] sm:$0xf0]  ;;  %v5500_v38 = vor.u32 %v6489_v17, %v5499_v16  ;;  %v5947_v11 = vld [vmem:[#allocation2 + $0x488] sm:$0xf] }
 0x1dc   : > { %3942 = vmatpush.bf16.msra.mxu0 %v5468_v54  ;;  %v2436_v45 = vpop.f32.mrf.mxu2  ;;  %v6609_v46 = vld [vmem:[#allocation2 + $0x4d4] sm:$0xf0] }
 0x1dd   : > { %3955 = vmatpush.bf16.msra.mxu1 %v5596_v55  ;;  %v2437_v52 = vadd.f32 %v2436_v45, %v2424_v32  ;;  %v2449_v54 = vpop.f32.mrf.mxu3  ;;  %v2412_v55 = vpop.f32.mrf.mxu0  ;;  %v6613_v32 = vld [vmem:[#allocation2 + $0x4f4] sm:$0xf0]  ;;  %v5979_v45 = vld [vmem:[#allocation2 + $0x4c8] sm:$0xf] }
 0x1de   : > { %3968 = vmatpush.bf16.msra.mxu2 %v5724_v57  ;;  %v5787_v57 = vld [vmem:[#allocation2 + $0x348] sm:$0xf]  ;;  %v2425_v59 = vpop.f32.mrf.mxu1  ;;  %v5996_v41 = vor.u32 %v6613_v32, %v5995_v31  ;;  %v6673_v55 = vld [vmem:[#allocation2 + $0x6d4] sm:$0xf0] }
 0x1df   : > { %3981 = vmatpush.bf16.msra.mxu3 %v5852_v61  ;;  %v7497_v61 = vadd.f32 %v2449_v54, %v2437_v52  ;;  %v6641_v52 = vld [vmem:[#allocation2 + $0x5d4] sm:$0xf0]  ;;  %v6235_v54 = vld [vmem:[#allocation2 + $0x6c8] sm:$0xf]  ;;  %v5980_v59 = vor.u32 %v6609_v46, %v5979_v45 }
 0x1e0   : > { %3943 = vmatpush.bf16.msra.mxu0 %v5452_v4  ;;  %v5788_v4 = vor.u32 %v6561_v58, %v5787_v57  ;;  %v6363_v57 = vld [vmem:[#allocation2 + $0x7c8] sm:$0xf]  ;;  %v6705_v58 = vld [vmem:[#allocation2 + $0x7d4] sm:$0xf0] }
 0x1e1   : > { %3956 = vmatpush.bf16.msra.mxu1 %v5580_v5  ;;  %v6493_v5 = vld [vmem:[#allocation2 + $0x134] sm:$0xf0]  ;;  %v6043_v46 = vld [vmem:[#allocation2 + $0x548] sm:$0xf] }
 0x1e2   : > { %3969 = vmatpush.bf16.msra.mxu2 %v5708_v6  ;;  %v5643_v6 = vld [vmem:[#allocation2 + $0x228] sm:$0xf]  ;;  %v5516_v12 = vor.u32 %v6493_v5, %v5515_v2  ;;  %v6364_v2 = vor.u32 %v6705_v58, %v6363_v57  ;;  %v6701_v8 = vld [vmem:[#allocation2 + $0x7b4] sm:$0xf0] }
 0x1e3   : > { %3982 = vmatpush.bf16.msra.mxu3 %v5836_v10  ;;  %v5388_v10 = vor.u32 %v6461_v1, %v5387_v0  ;;  %v5644_v15 = vor.u32 %v6525_v7, %v5643_v6  ;;  %v6605_v0 = vld [vmem:[#allocation2 + $0x4b4] sm:$0xf0]  ;;  %v6091_v1 = vld [vmem:[#allocation2 + $0x5a8] sm:$0xf] }
 0x1e4   : > { %3944 = vmatpush.bf16.msra.mxu0 %v5436_v22  ;;  %v2438_v22 = vpop.f32.mrf.mxu2  ;;  %v6219_v5 = vld [vmem:[#allocation2 + $0x6a8] sm:$0xf]  ;;  %v6669_v6 = vld [vmem:[#allocation2 + $0x6b4] sm:$0xf0] }
 0x1e5   : > { %3957 = vmatpush.bf16.msra.mxu1 %v5564_v26  ;;  %v6521_v26 = vld [vmem:[#allocation2 + $0x214] sm:$0xf0]  ;;  %v2451_v48 = vpop.f32.mrf.mxu3  ;;  %v6347_v7 = vld [vmem:[#allocation2 + $0x7a8] sm:$0xf]  ;;  %v6220_v3 = vor.u32 %v6669_v6, %v6219_v5 }
 0x1e6   : > { %3970 = vmatpush.bf16.msra.mxu2 %v5692_v27  ;;  %v5755_v27 = vld [vmem:[#allocation2 + $0x308] sm:$0xf]  ;;  %v6348_v16 = vor.u32 %v6701_v8, %v6347_v7  ;;  %v6633_v17 = vld [vmem:[#allocation2 + $0x594] sm:$0xf0] }
 0x1e7   : > { %3983 = vmatpush.bf16.msra.mxu3 %v5820_v50  ;;  %v6123_v50 = vld [vmem:[#allocation2 + $0x5e8] sm:$0xf]  ;;  %v5756_v40 = vor.u32 %v6553_v28, %v5755_v27  ;;  %v6697_v27 = vld [vmem:[#allocation2 + $0x794] sm:$0xf0] }
 0x1e8   : > { %3945 = vmatpush.bf16.msra.mxu0 %v5420_v13  ;;  %v5628_v13 = vor.u32 %v6521_v26, %v5627_v19  ;;  %v6124_v42 = vor.u32 %v6645_v35, %v6123_v50  ;;  %v6203_v19 = vld [vmem:[#allocation2 + $0x688] sm:$0xf]  ;;  %v6593_v45 = vld [vmem:[#allocation2 + $0x454] sm:$0xf0] }
 0x1e9   : > { %3958 = vmatpush.bf16.msra.mxu1 %v5548_v56  ;;  %v6379_v56 = vld [vmem:[#allocation2 + $0x7e8] sm:$0xf]  ;;  %v6621_v7 = vld [vmem:[#allocation2 + $0x534] sm:$0xf0] }
 0x1ea   : > { %3971 = vmatpush.bf16.msra.mxu2 %v5676_v39  ;;  %v6709_v39 = vld [vmem:[#allocation2 + $0x7f4] sm:$0xf0]  ;;  %v6331_v26 = vld [vmem:[#allocation2 + $0x788] sm:$0xf] }
 0x1eb   : > { %3984 = vmatpush.bf16.msra.mxu3 %v5804_v44  ;;  %v6252_v44 = vor.u32 %v6677_v37, %v6251_v36  ;;  %v6380_v51 = vor.u32 %v6709_v39, %v6379_v56  ;;  %v5931_v50 = vld [vmem:[#allocation2 + $0x468] sm:$0xf]  ;;  %v6332_v36 = vor.u32 %v6697_v27, %v6331_v26  ;;  %v6629_v37 = vld [vmem:[#allocation2 + $0x574] sm:$0xf0] }
 0x1ec   : > { %3946 = vmatpush.bf16.msra.mxu0 %v5404_v60  ;;  %v6108_v60 = vor.u32 %v6641_v52, %v6107_v47  ;;  %v6059_v35 = vld [vmem:[#allocation2 + $0x568] sm:$0xf]  ;;  %v6693_v39 = vld [vmem:[#allocation2 + $0x774] sm:$0xf0] }
 0x1ed   : > { %3959 = vmatpush.bf16.msra.mxu1 %v5532_v62  ;;  %v6236_v62 = vor.u32 %v6673_v55, %v6235_v54  ;;  %v6315_v56 = vld [vmem:[#allocation2 + $0x768] sm:$0xf]  ;;  %v6625_v52 = vld [vmem:[#allocation2 + $0x554] sm:$0xf0] }
 0x1ee   : > { %3972 = vmatpush.bf16.msra.mxu2 %v5660_v63  ;;  %v5963_v63 = vld [vmem:[#allocation2 + $0x4a8] sm:$0xf]  ;;  %v6316_v47 = vor.u32 %v6693_v39, %v6315_v56  ;;  %v6657_v55 = vld [vmem:[#allocation2 + $0x654] sm:$0xf0]  ;;  %v6547_v56 = vld [vmem:[#allocation2 + $0x2ec] sm:$0xf] }
 0x1ef   : > { %3985 = vmatpush.bf16.msra.mxu3 %v5788_v4  ;;  %v6637_v4 = vld [vmem:[#allocation2 + $0x5b4] sm:$0xf0]  ;;  %v5964_v9 = vor.u32 %v6605_v0, %v5963_v63  ;;  %v6171_v54 = vld [vmem:[#allocation2 + $0x648] sm:$0xf]  ;;  %v6044_v0 = vor.u32 %v6625_v52, %v6043_v46  ;;  %v5741_v39 = vld [vmem:[#allocation2 + $0x2f8] sm:$0xf0] }
 0x1f0   : > { %3947 = vmatpush.bf16.msra.mxu0 %v5388_v10  ;;  %v6092_v10 = vor.u32 %v6637_v4, %v6091_v1  ;;  %v6172_v1 = vor.u32 %v6657_v55, %v6171_v54  ;;  %v6589_v4 = vld [vmem:[#allocation2 + $0x434] sm:$0xf0]  ;;  %v6027_v5 = vld [vmem:[#allocation2 + $0x528] sm:$0xf]  ;;  %v5744_v54 = vor.u32 %v6547_v56, %v5741_v39  ;;  %v6479_v55 = vld [vmem:[#allocation2 + $0xcc] sm:$0xf] }
 0x1f1   : > { %3960 = vmatpush.bf16.msra.mxu1 %v5516_v12  ;;  %v6601_v12 = vld [vmem:[#allocation2 + $0x494] sm:$0xf0]  ;;  %v6155_v8 = vld [vmem:[#allocation2 + $0x628] sm:$0xf] }
 0x1f2   : > { %3973 = vmatpush.bf16.msra.mxu2 %v5644_v15  ;;  %v6075_v15 = vld [vmem:[#allocation2 + $0x588] sm:$0xf]  ;;  %v5948_v48 = vor.u32 %v6601_v12, %v5947_v11 }
 0x1f3   : > { %3986 = vmatpush.bf16.msra.mxu3 %v5772_v21  ;;  %v6665_v21 = vld [vmem:[#allocation2 + $0x694] sm:$0xf0]  ;;  %v6076_v31 = vor.u32 %v6633_v17, %v6075_v15  ;;  %v5883_v12 = vld [vmem:[#allocation2 + $0x408] sm:$0xf] }
 0x1f4   : > { %3948 = vmatpush.bf16.msra.mxu0 %v5372_v34  ;;  %v7511_v22 = vpop.f32.mrf.mxu0  ;;  %v6204_v32 = vor.u32 %v6665_v21, %v6203_v19  ;;  %v6597_v34 = vld [vmem:[#allocation2 + $0x474] sm:$0xf0]  ;;  %v6011_v19 = vld [vmem:[#allocation2 + $0x508] sm:$0xf] }
 0x1f5   : > { %3961 = vmatpush.bf16.msra.mxu1 %v5500_v38  ;;  %v7513_v28 = vpop.f32.mrf.mxu1  ;;  %v6187_v38 = vld [vmem:[#allocation2 + $0x668] sm:$0xf]  ;;  %v6585_v15 = vld [vmem:[#allocation2 + $0x414] sm:$0xf0] }
 0x1f6   : > { %3974 = vmatpush.bf16.msra.mxu2 %v5628_v13  ;;  %v6661_v13 = vld [vmem:[#allocation2 + $0x674] sm:$0xf0]  ;;  %v6139_v26 = vld [vmem:[#allocation2 + $0x608] sm:$0xf] }
 0x1f7   : > { %3987 = vmatpush.bf16.msra.mxu3 %v5756_v40  ;;  %6418 = vmatmul.msk.bf16.vlgmr.msra.gmra.mxu0 %vm7280_vm4, %v7169_v24  ;;  %v5932_v40 = vor.u32 %v6597_v34, %v5931_v50  ;;  %v6617_v21 = vld [vmem:[#allocation2 + $0x514] sm:$0xf0] }
 0x1f8   : > { %3993 = vmatpush.bf16.msrb.mxu0 %v5996_v41  ;;  %6420 = vmatmul.msk.bf16.vlgmr.msra.gmra.mxu1 %vm7287_vm5, %v7169_v24  ;;  %v6060_v41 = vor.u32 %v6629_v37, %v6059_v35  ;;  %v6681_v50 = vld [vmem:[#allocation2 + $0x714] sm:$0xf0]  ;;  %v6483_v35 = vld [vmem:[#allocation2 + $0xec] sm:$0xf] }
 0x1f9   : > { %4006 = vmatpush.bf16.msrb.mxu1 %v6124_v42  ;;  %6422 = vmatmul.msk.bf16.vlgmr.msra.gmra.mxu2 %vm7297_vm6, %v7169_v24  ;;  %v6188_v42 = vor.u32 %v6661_v13, %v6187_v38  ;;  %v6515_v37 = vld [vmem:[#allocation2 + $0x1ec] sm:$0xf]  ;;  %v5884_v38 = vor.u32 %v6585_v15, %v5883_v12  ;;  %v5613_v13 = vld [vmem:[#allocation2 + $0x1f8] sm:$0xf0] }
 0x1fa   : > { %4019 = vmatpush.bf16.msrb.mxu2 %v6252_v44  ;;  %6424 = vmatmul.msk.bf16.vlgmr.msra.gmra.mxu3 %vm7307_vm7, %v7169_v24  ;;  %v5915_v44 = vld [vmem:[#allocation2 + $0x448] sm:$0xf]  ;;  %v5616_v52 = vor.u32 %v6515_v37, %v5613_v13  ;;  %v5837_v15 = vld [vmem:[#allocation2 + $0x3b8] sm:$0xf0] }
 0x1fb   : > { %4032 = vmatpush.bf16.msrb.mxu3 %v6380_v51  ;;  %v5916_v63 = vor.u32 %v6593_v45, %v5915_v44  ;;  %v5869_v44 = vld [vmem:[#allocation2 + $0x3f8] sm:$0xf0] }
 0x1fc   : > { %3994 = vmatpush.bf16.msrb.mxu0 %v5980_v59  ;;  %v7515_v51 = vpop.f32.mrf.mxu2  ;;  %v3744_v58 = vpop.f32.mrf.mxu0  ;;  %v6299_v59 = vld [vmem:[#allocation2 + $0x748] sm:$0xf] }
 0x1fd   : > { %4007 = vmatpush.bf16.msrb.mxu1 %v6108_v60  ;;  %v7517_v57 = vpop.f32.mrf.mxu3  ;;  %v6689_v60 = vld [vmem:[#allocation2 + $0x754] sm:$0xf0]  ;;  %v5469_v58 = vld [vmem:[#allocation2 + $0xd8] sm:$0xf0] }
 0x1fe   : > { %4020 = vmatpush.bf16.msrb.mxu2 %v6236_v62  ;;  %v3757_v62 = vpop.f32.mrf.mxu1  ;;  %v6300_v6 = vor.u32 %v6689_v60, %v6299_v59  ;;  %v6511_v59 = vld [vmem:[#allocation2 + $0x1cc] sm:$0xf] }
 0x1ff   : > { %4033 = vmatpush.bf16.msrb.mxu3 %v6364_v2  ;;  %v5899_v2 = vld [vmem:[#allocation2 + $0x428] sm:$0xf]  ;;  %v5597_v62 = vld [vmem:[#allocation2 + $0x1d8] sm:$0xf0] }
 0x200   : > { %3995 = vmatpush.bf16.msrb.mxu0 %v5964_v9  ;;  %v6653_v9 = vld [vmem:[#allocation2 + $0x634] sm:$0xf0]  ;;  %v5900_v11 = vor.u32 %v6589_v4, %v5899_v2  ;;  %v5853_v2 = vld [vmem:[#allocation2 + $0x3d8] sm:$0xf0]  ;;  %v5472_v4 = vor.u32 %v6479_v55, %v5469_v58 }
 0x201   : > { %4008 = vmatpush.bf16.msrb.mxu1 %v6092_v10  ;;  %v6283_v10 = vld [vmem:[#allocation2 + $0x728] sm:$0xf]  ;;  %v6156_v17 = vor.u32 %v6653_v9, %v6155_v8  ;;  %v6507_v8 = vld [vmem:[#allocation2 + $0x1ac] sm:$0xf] }
 0x202   : > { %4021 = vmatpush.bf16.msrb.mxu2 %v6220_v3  ;;  %v6685_v3 = vld [vmem:[#allocation2 + $0x734] sm:$0xf0] }
 0x203   : > { %4034 = vmatpush.bf16.msrb.mxu3 %v6348_v16  ;;  %v6028_v16 = vor.u32 %v6621_v7, %v6027_v5  ;;  %v6284_v27 = vor.u32 %v6685_v3, %v6283_v10  ;;  %v5453_v7 = vld [vmem:[#allocation2 + $0xb8] sm:$0xf0]  ;;  %v6539_v3 = vld [vmem:[#allocation2 + $0x2ac] sm:$0xf] }
 0x204   : > { %3996 = vmatpush.bf16.msrb.mxu0 %v5948_v48  ;;  %v3770_v48 = vpop.f32.mrf.mxu2  ;;  %v5581_v10 = vld [vmem:[#allocation2 + $0x1b8] sm:$0xf0] }
 0x205   : > { %4009 = vmatpush.bf16.msrb.mxu1 %v6076_v31  ;;  %v6649_v31 = vld [vmem:[#allocation2 + $0x614] sm:$0xf0]  ;;  %v3783_v34 = vpop.f32.mrf.mxu3  ;;  %v5565_v48 = vld [vmem:[#allocation2 + $0x198] sm:$0xf0] }
 0x206   : > { %4022 = vmatpush.bf16.msrb.mxu2 %v6204_v32  ;;  %v6267_v32 = vld [vmem:[#allocation2 + $0x708] sm:$0xf] }
 0x207   : > { %4035 = vmatpush.bf16.msrb.mxu3 %v6332_v36  ;;  %v5485_v36 = vld [vmem:[#allocation2 + $0xf8] sm:$0xf0]  ;;  %v6268_v45 = vor.u32 %v6681_v50, %v6267_v32 }
 0x208   : > { %3997 = vmatpush.bf16.msrb.mxu0 %v5932_v40  ;;  %v6012_v40 = vor.u32 %v6617_v21, %v6011_v19  ;;  %v5488_v46 = vor.u32 %v6483_v35, %v5485_v36  ;;  %v6471_v19 = vld [vmem:[#allocation2 + $0x8c] sm:$0xf]  ;;  %v5437_v21 = vld [vmem:[#allocation2 + $0x98] sm:$0xf0] }
 0x209   : > { %4010 = vmatpush.bf16.msrb.mxu1 %v6060_v41  ;;  %v6140_v41 = vor.u32 %v6649_v31, %v6139_v26  ;;  %v6503_v26 = vld [vmem:[#allocation2 + $0x18c] sm:$0xf]  ;;  %v5693_v32 = vld [vmem:[#allocation2 + $0x298] sm:$0xf0] }
 0x20a   : > { %4023 = vmatpush.bf16.msrb.mxu2 %v6188_v42  ;;  %v6579_v42 = vld [vmem:[#allocation2 + $0x3ec] sm:$0xf]  ;;  %v5821_v36 = vld [vmem:[#allocation2 + $0x398] sm:$0xf0]  ;;  %v5568_v56 = vor.u32 %v6503_v26, %v5565_v48 }
 0x20b   : > { %4036 = vmatpush.bf16.msrb.mxu3 %v6316_v47  ;;  %v3743_v47 = vadd.f32 %v7511_v22, %v7410_v43  ;;  %v5872_v60 = vor.u32 %v6579_v42, %v5869_v44  ;;  %v5600_v43 = vor.u32 %v6511_v59, %v5597_v62  ;;  %v6535_v31 = vld [vmem:[#allocation2 + $0x28c] sm:$0xf]  ;;  %v5405_v62 = vld [vmem:[#allocation2 + $0x58] sm:$0xf0] }
 0x20c   : > { %3998 = vmatpush.bf16.msrb.mxu0 %v5916_v63  ;;  %v6543_v63 = vld [vmem:[#allocation2 + $0x2cc] sm:$0xf]  ;;  %v5696_v39 = vor.u32 %v6535_v31, %v5693_v32  ;;  %v5773_v48 = vld [vmem:[#allocation2 + $0x338] sm:$0xf0] }
 0x20d   : > { %4011 = vmatpush.bf16.msrb.mxu1 %v6044_v0  ;;  %v5725_v0 = vld [vmem:[#allocation2 + $0x2d8] sm:$0xf0]  ;;  %v3756_v5 = vadd.f32 %v7513_v28, %v3743_v47  ;;  %v6571_v28 = vld [vmem:[#allocation2 + $0x3ac] sm:$0xf] }
 0x20e   : > { %4024 = vmatpush.bf16.msrb.mxu2 %v6172_v1  ;;  %v6575_v1 = vld [vmem:[#allocation2 + $0x3cc] sm:$0xf]  ;;  %v5728_v22 = vor.u32 %v6543_v63, %v5725_v0 }
 0x20f   : > { %4037 = vmatpush.bf16.msrb.mxu3 %v6300_v6  ;;  %v6475_v6 = vld [vmem:[#allocation2 + $0xac] sm:$0xf]  ;;  %v5856_v9 = vor.u32 %v6575_v1, %v5853_v2  ;;  %v3769_v12 = vadd.f32 %v7515_v51, %v3756_v5  ;;  %v5533_v2 = vld [vmem:[#allocation2 + $0x158] sm:$0xf0] }
 0x210   : > { %3999 = vmatpush.bf16.msrb.mxu0 %v5900_v11  ;;  %v5709_v11 = vld [vmem:[#allocation2 + $0x2b8] sm:$0xf0]  ;;  %v6567_v35 = vld [vmem:[#allocation2 + $0x38c] sm:$0xf] }
 0x211   : > { %4012 = vmatpush.bf16.msrb.mxu1 %v6028_v16  ;;  %v5456_v16 = vor.u32 %v6475_v6, %v5453_v7  ;;  %v5712_v51 = vor.u32 %v6539_v3, %v5709_v11  ;;  %v3782_v50 = vadd.f32 %v7517_v57, %v3769_v12  ;;  %v6499_v42 = vld [vmem:[#allocation2 + $0x16c] sm:$0xf]  ;;  %v5824_v44 = vor.u32 %v6567_v35, %v5821_v36  ;;  %v5661_v5 = vld [vmem:[#allocation2 + $0x258] sm:$0xf0] }
 0x212   : > { %4025 = vmatpush.bf16.msrb.mxu2 %v6156_v17  ;;  %v5584_v17 = vor.u32 %v6507_v8, %v5581_v10  ;;  %v6531_v57 = vld [vmem:[#allocation2 + $0x26c] sm:$0xf]  ;;  %v5789_v8 = vld [vmem:[#allocation2 + $0x358] sm:$0xf0] }
 0x213   : > { %4038 = vmatpush.bf16.msrb.mxu3 %v6284_v27  ;;  %v5840_v27 = vor.u32 %v6571_v28, %v5837_v15  ;;  %v6563_v47 = vld [vmem:[#allocation2 + $0x36c] sm:$0xf]  ;;  %v5389_v15 = vld [vmem:[#allocation2 + $0x38] sm:$0xf0] }
 0x214   : > { %4000 = vmatpush.bf16.msrb.mxu0 %v5884_v38  ;;  %v3794_v34 = vpop.f32.mrf.mxu0  ;;  %v5440_v38 = vor.u32 %v6471_v19, %v5437_v21  ;;  %v6495_v63 = vld [vmem:[#allocation2 + $0x14c] sm:$0xf]  ;;  %v5645_v21 = vld [vmem:[#allocation2 + $0x238] sm:$0xf0] }
 0x215   : > { %4013 = vmatpush.bf16.msrb.mxu1 %v6012_v40  ;;  %v3807_v37 = vpop.f32.mrf.mxu1  ;;  %v3795_v13 = vadd.f32 %v3794_v34, %v3782_v50  ;;  %v6467_v40 = vld [vmem:[#allocation2 + $0x6c] sm:$0xf]  ;;  %v5536_v11 = vor.u32 %v6495_v63, %v5533_v2  ;;  %v5373_v50 = vld [vmem:[#allocation2 + $0x18] sm:$0xf0] }
 0x216   : > { %4026 = vmatpush.bf16.msrb.mxu2 %v6140_v41  ;;  %v5421_v41 = vld [vmem:[#allocation2 + $0x78] sm:$0xf0]  ;;  %v6559_v7 = vld [vmem:[#allocation2 + $0x34c] sm:$0xf] }
 0x217   : > { %4039 = vmatpush.bf16.msrb.mxu3 %v6268_v45  ;;  %6426 = vmatmul.msk.bf16.vlgmr.msrb.gmra.mxu0 %vm7325_vm12, %v7169_v24  ;;  %v5549_v45 = vld [vmem:[#allocation2 + $0x178] sm:$0xf0]  ;;  %v3808_v55 = vadd.f32 %v3807_v37, %v3795_v13  ;;  %v6459_v28 = vld [vmem:[#allocation2 + $0x2c] sm:$0xf] }
 0x218   : > { %4045 = vmatpush.bf16.msra.mxu0 %v5488_v46  ;;  %6428 = vmatmul.msk.bf16.vlgmr.msrb.gmra.mxu1 %vm7335_vm13, %v7169_v24  ;;  %v5677_v46 = vld [vmem:[#allocation2 + $0x278] sm:$0xf0]  ;;  %v5552_v58 = vor.u32 %v6499_v42, %v5549_v45  ;;  %v6523_v19 = vld [vmem:[#allocation2 + $0x22c] sm:$0xf]  ;;  %v5392_v31 = vor.u32 %v6459_v28, %v5389_v15 }
 0x219   : > { %4058 = vmatpush.bf16.msra.mxu1 %v5616_v52  ;;  %6430 = vmatmul.msk.bf16.vlgmr.msrb.gmra.mxu2 %vm7345_vm14, %v7169_v24  ;;  %v5805_v52 = vld [vmem:[#allocation2 + $0x378] sm:$0xf0]  ;;  %v5680_v59 = vor.u32 %v6531_v57, %v5677_v46  ;;  %v6455_v32 = vld [vmem:[#allocation2 + $0xc] sm:$0xf]  ;;  %v5648_v35 = vor.u32 %v6523_v19, %v5645_v21 }
 0x21a   : > { %4071 = vmatpush.bf16.msra.mxu2 %v5744_v54  ;;  %6432 = vmatmul.msk.bf16.vlgmr.msrb.gmra.mxu3 %vm7355_vm15, %v7169_v24  ;;  %v5424_v54 = vor.u32 %v6467_v40, %v5421_v41  ;;  %v5808_v0 = vor.u32 %v6563_v47, %v5805_v52  ;;  %v6487_v36 = vld [vmem:[#allocation2 + $0x10c] sm:$0xf]  ;;  %v5501_v37 = vld [vmem:[#allocation2 + $0x118] sm:$0xf0]  ;;  %v5376_v46 = vor.u32 %v6455_v32, %v5373_v50 }
 0x21b   : > { %4084 = vmatpush.bf16.msra.mxu3 %v5872_v60  ;;  %v6463_v60 = vld [vmem:[#allocation2 + $0x4c] sm:$0xf]  ;;  %v5757_v41 = vld [vmem:[#allocation2 + $0x318] sm:$0xf0] }
 0x21c   : > { %4046 = vmatpush.bf16.msra.mxu0 %v5472_v4  ;;  %v3820_v1 = vpop.f32.mrf.mxu2  ;;  %v6527_v4 = vld [vmem:[#allocation2 + $0x24c] sm:$0xf]  ;;  %v3796_v6 = vpop.f32.mrf.mxu0  ;;  %v5408_v10 = vor.u32 %v6463_v60, %v5405_v62  ;;  %v5997_v45 = vld [vmem:[#allocation2 + $0x4f8] sm:$0xf0] }
 0x21d   : > { %4059 = vmatpush.bf16.msra.mxu1 %v5600_v43  ;;  %v3821_v43 = vadd.f32 %v3820_v1, %v3808_v55  ;;  %v5664_v12 = vor.u32 %v6527_v4, %v5661_v5  ;;  %v6551_v40 = vld [vmem:[#allocation2 + $0x30c] sm:$0xf]  ;;  %v6125_v47 = vld [vmem:[#allocation2 + $0x5f8] sm:$0xf0]  ;;  %v5504_v55 = vor.u32 %v6487_v36, %v5501_v37 }
 0x21e   : > { %4072 = vmatpush.bf16.msra.mxu2 %v5728_v22  ;;  %v3833_v22 = vpop.f32.mrf.mxu3  ;;  %v6643_v57 = vld [vmem:[#allocation2 + $0x5ec] sm:$0xf]  ;;  %v6381_v60 = vld [vmem:[#allocation2 + $0x7f8] sm:$0xf0]  ;;  %v5760_v62 = vor.u32 %v6551_v40, %v5757_v41 }
 0x21f   : > { %4085 = vmatpush.bf16.msra.mxu3 %v5856_v9  ;;  %v3809_v9 = vpop.f32.mrf.mxu1  ;;  %v3834_v3 = vadd.f32 %v3833_v22, %v3821_v43  ;;  %v6675_v52 = vld [vmem:[#allocation2 + $0x6ec] sm:$0xf]  ;;  %v5981_v4 = vld [vmem:[#allocation2 + $0x4d8] sm:$0xf0] }
 0x220   : > { %4047 = vmatpush.bf16.msra.mxu0 %v5456_v16  ;;  %v6491_v16 = vld [vmem:[#allocation2 + $0x12c] sm:$0xf]  ;;  %v6109_v22 = vld [vmem:[#allocation2 + $0x5d8] sm:$0xf0] }
 0x221   : > { %4060 = vmatpush.bf16.msra.mxu1 %v5584_v17  ;;  %v5792_v17 = vor.u32 %v6559_v7, %v5789_v8  ;;  %v4149_v26 = vmul.f32 22.627417, %v3834_v3  ;;  %v6607_v2 = vld [vmem:[#allocation2 + $0x4cc] sm:$0xf]  ;;  %v6237_v7 = vld [vmem:[#allocation2 + $0x6d8] sm:$0xf0] }
 0x222   : > { %4073 = vmatpush.bf16.msra.mxu2 %v5712_v51  ;;  %v5517_v51 = vld [vmem:[#allocation2 + $0x138] sm:$0xf0]  ;;  %v6639_v5 = vld [vmem:[#allocation2 + $0x5cc] sm:$0xf] }
 0x223   : > { %4086 = vmatpush.bf16.msra.mxu3 %v5840_v27  ;;  %v6555_v27 = vld [vmem:[#allocation2 + $0x32c] sm:$0xf]  ;;  %4153 = vst [vmem:[%s7542_s26] sm:$0xff] %v4149_v26  ;;  %v5520_v34 = vor.u32 %v6491_v16, %v5517_v51  ;;  %v6365_v9 = vld [vmem:[#allocation2 + $0x7d8] sm:$0xf0]  ;;  %v6112_v3 = vor.u32 %v6639_v5, %v6109_v22 }
 0x224   : > { %4048 = vmatpush.bf16.msra.mxu0 %v5440_v38  ;;  %v6519_v38 = vld [vmem:[#allocation2 + $0x20c] sm:$0xf]  ;;  %v5776_v13 = vor.u32 %v6555_v27, %v5773_v48  ;;  %v5965_v28 = vld [vmem:[#allocation2 + $0x4b8] sm:$0xf0] }
 0x225   : > { %4061 = vmatpush.bf16.msra.mxu1 %v5568_v56  ;;  %v3822_v56 = vpop.f32.mrf.mxu2  ;;  %v6671_v6 = vld [vmem:[#allocation2 + $0x6cc] sm:$0xf]  ;;  %v6221_v19 = vld [vmem:[#allocation2 + $0x6b8] sm:$0xf0] }
 0x226   : > { %4074 = vmatpush.bf16.msra.mxu2 %v5696_v39  ;;  %v5629_v39 = vld [vmem:[#allocation2 + $0x218] sm:$0xf0]  ;;  %v3835_v42 = vpop.f32.mrf.mxu3  ;;  %v6703_v8 = vld [vmem:[#allocation2 + $0x7cc] sm:$0xf] }
 0x227   : > { %4087 = vmatpush.bf16.msra.mxu3 %v5824_v44  ;;  %v6611_v44 = vld [vmem:[#allocation2 + $0x4ec] sm:$0xf]  ;;  %v6368_v16 = vor.u32 %v6703_v8, %v6365_v9  ;;  %v6349_v26 = vld [vmem:[#allocation2 + $0x7b8] sm:$0xf0] }
 0x228   : > { %4049 = vmatpush.bf16.msra.mxu0 %v5424_v54  ;;  %v6253_v54 = vld [vmem:[#allocation2 + $0x6f8] sm:$0xf0]  ;;  %v6000_v63 = vor.u32 %v6611_v44, %v5997_v45  ;;  %v6635_v15 = vld [vmem:[#allocation2 + $0x5ac] sm:$0xf] }
 0x229   : > { %4062 = vmatpush.bf16.msra.mxu1 %v5552_v58  ;;  %v5632_v58 = vor.u32 %v6519_v38, %v5629_v39  ;;  %v6256_v1 = vor.u32 %v6675_v52, %v6253_v54  ;;  %v6667_v51 = vld [vmem:[#allocation2 + $0x6ac] sm:$0xf]  ;;  %v5949_v32 = vld [vmem:[#allocation2 + $0x498] sm:$0xf0] }
 0x22a   : > { %4075 = vmatpush.bf16.msra.mxu2 %v5680_v59  ;;  %v6707_v59 = vld [vmem:[#allocation2 + $0x7ec] sm:$0xf]  ;;  %v6224_v48 = vor.u32 %v6667_v51, %v6221_v19  ;;  %v6333_v38 = vld [vmem:[#allocation2 + $0x798] sm:$0xf0] }
 0x22b   : > { %4088 = vmatpush.bf16.msra.mxu3 %v5808_v0  ;;  %v6128_v0 = vor.u32 %v6643_v57, %v6125_v47  ;;  %v6384_v43 = vor.u32 %v6707_v59, %v6381_v60  ;;  %v6699_v21 = vld [vmem:[#allocation2 + $0x7ac] sm:$0xf]  ;;  %v5933_v41 = vld [vmem:[#allocation2 + $0x478] sm:$0xf0] }
 0x22c   : > { %4050 = vmatpush.bf16.msra.mxu0 %v5408_v10  ;;  %v5984_v10 = vor.u32 %v6607_v2, %v5981_v4  ;;  %v6352_v50 = vor.u32 %v6699_v21, %v6349_v26  ;;  %v6695_v37 = vld [vmem:[#allocation2 + $0x78c] sm:$0xf]  ;;  %v6061_v45 = vld [vmem:[#allocation2 + $0x578] sm:$0xf0] }
 0x22d   : > { %4063 = vmatpush.bf16.msra.mxu1 %v5536_v11  ;;  %v6240_v11 = vor.u32 %v6671_v6, %v6237_v7  ;;  %v6595_v40 = vld [vmem:[#allocation2 + $0x46c] sm:$0xf]  ;;  %v6336_v44 = vor.u32 %v6695_v37, %v6333_v38  ;;  %v6317_v52 = vld [vmem:[#allocation2 + $0x778] sm:$0xf0] }
 0x22e   : > { %4076 = vmatpush.bf16.msra.mxu2 %v5664_v12  ;;  %v6603_v12 = vld [vmem:[#allocation2 + $0x4ac] sm:$0xf]  ;;  %v5936_v54 = vor.u32 %v6595_v40, %v5933_v41  ;;  %v5917_v60 = vld [vmem:[#allocation2 + $0x458] sm:$0xf0] }
 0x22f   : > { %4089 = vmatpush.bf16.msra.mxu3 %v5792_v17  ;;  %v6093_v17 = vld [vmem:[#allocation2 + $0x5b8] sm:$0xf0]  ;;  %v5968_v20 = vor.u32 %v6603_v12, %v5965_v28  ;;  %v6627_v42 = vld [vmem:[#allocation2 + $0x56c] sm:$0xf] }
 0x230   : > { %4051 = vmatpush.bf16.msra.mxu0 %v5392_v31  ;;  %v6096_v27 = vor.u32 %v6635_v15, %v6093_v17  ;;  %v6599_v31 = vld [vmem:[#allocation2 + $0x48c] sm:$0xf]  ;;  %v6173_v4 = vld [vmem:[#allocation2 + $0x658] sm:$0xf0] }
 0x231   : > { %4064 = vmatpush.bf16.msra.mxu1 %v5520_v34  ;;  %v6077_v34 = vld [vmem:[#allocation2 + $0x598] sm:$0xf0]  ;;  %v6659_v57 = vld [vmem:[#allocation2 + $0x66c] sm:$0xf] }
 0x232   : > { %4077 = vmatpush.bf16.msra.mxu2 %v5648_v35  ;;  %v6205_v35 = vld [vmem:[#allocation2 + $0x698] sm:$0xf0]  ;;  %v6080_v56 = vor.u32 %v6631_v25, %v6077_v34  ;;  %v6691_v47 = vld [vmem:[#allocation2 + $0x76c] sm:$0xf] }
 0x233   : > { %4090 = vmatpush.bf16.msra.mxu3 %v5776_v13  ;;  %v5952_v13 = vor.u32 %v6599_v31, %v5949_v32  ;;  %v6208_v39 = vor.u32 %v6663_v29, %v6205_v35  ;;  %v6591_v59 = vld [vmem:[#allocation2 + $0x44c] sm:$0xf]  ;;  %v6301_v6 = vld [vmem:[#allocation2 + $0x758] sm:$0xf0] }
 0x234   : > { %4052 = vmatpush.bf16.msra.mxu0 %v5376_v46  ;;  %v7557_v36 = vpop.f32.mrf.mxu0  ;;  %v6189_v46 = vld [vmem:[#allocation2 + $0x678] sm:$0xf0]  ;;  %v6655_v2 = vld [vmem:[#allocation2 + $0x64c] sm:$0xf]  ;;  %v5920_v8 = vor.u32 %v6591_v59, %v5917_v60 }
 0x235   : > { %4065 = vmatpush.bf16.msra.mxu1 %v5504_v55  ;;  %v7559_v33 = vpop.f32.mrf.mxu1  ;;  %v6064_v55 = vor.u32 %v6627_v42, %v6061_v45  ;;  %v6687_v22 = vld [vmem:[#allocation2 + $0x74c] sm:$0xf]  ;;  %v6029_v15 = vld [vmem:[#allocation2 + $0x538] sm:$0xf0]  ;;  %v3847_v41 = vadd.f32 %v7557_v36, %v7439_v49 }
 0x236   : > { %4078 = vmatpush.bf16.msra.mxu2 %v5632_v58  ;;  %v6192_v58 = vor.u32 %v6659_v57, %v6189_v46  ;;  %v6619_v12 = vld [vmem:[#allocation2 + $0x52c] sm:$0xf]  ;;  %v6304_v28 = vor.u32 %v6687_v22, %v6301_v6  ;;  %v6157_v17 = vld [vmem:[#allocation2 + $0x638] sm:$0xf0] }
 0x237   : > { %4091 = vmatpush.bf16.msra.mxu3 %v5760_v62  ;;  %6434 = vmatmul.msk.bf16.vlgmr.msra.gmra.mxu0 %vm7280_vm4, %v7169_v24  ;;  %v6623_v62 = vld [vmem:[#allocation2 + $0x54c] sm:$0xf]  ;;  %v6285_v19 = vld [vmem:[#allocation2 + $0x738] sm:$0xf0]  ;;  %v6032_v26 = vor.u32 %v6619_v12, %v6029_v15  ;;  %v3860_v42 = vadd.f32 %v7559_v33, %v3847_v41 }
 0x238   : > { %4097 = vmatpush.bf16.msrb.mxu0 %v6000_v63  ;;  %6436 = vmatmul.msk.bf16.vlgmr.msra.gmra.mxu1 %vm7287_vm5, %v7169_v24  ;;  %v6320_v63 = vor.u32 %v6691_v47, %v6317_v52  ;;  %v6683_v51 = vld [vmem:[#allocation2 + $0x72c] sm:$0xf]  ;;  %v6141_v29 = vld [vmem:[#allocation2 + $0x618] sm:$0xf0] }
 0x239   : > { %4110 = vmatpush.bf16.msrb.mxu1 %v6128_v0  ;;  %6438 = vmatmul.msk.bf16.vlgmr.msra.gmra.mxu2 %vm7297_vm6, %v7169_v24  ;;  %v6615_v31 = vld [vmem:[#allocation2 + $0x50c] sm:$0xf]  ;;  %v6288_v32 = vor.u32 %v6683_v51, %v6285_v19  ;;  %v6269_v38 = vld [vmem:[#allocation2 + $0x718] sm:$0xf0] }
 0x23a   : > { %4123 = vmatpush.bf16.msrb.mxu2 %v6256_v1  ;;  %6440 = vmatmul.msk.bf16.vlgmr.msra.gmra.mxu3 %vm7307_vm7, %v7169_v24  ;;  %v6045_v1 = vld [vmem:[#allocation2 + $0x558] sm:$0xf0]  ;;  %v6647_v34 = vld [vmem:[#allocation2 + $0x60c] sm:$0xf] }
 0x23b   : > { %4136 = vmatpush.bf16.msrb.mxu3 %v6384_v43  ;;  %v6048_v9 = vor.u32 %v6623_v62, %v6045_v1  ;;  %v6679_v37 = vld [vmem:[#allocation2 + $0x70c] sm:$0xf] }
 0x23c   : > { %4098 = vmatpush.bf16.msrb.mxu0 %v5984_v10  ;;  %v3872_v0 = vpop.f32.mrf.mxu2  ;;  %v3848_v43 = vpop.f32.mrf.mxu0  ;;  %v6176_v10 = vor.u32 %v6655_v2, %v6173_v4  ;;  %v6272_v40 = vor.u32 %v6679_v37, %v6269_v38 }
 0x23d   : > { %4111 = vmatpush.bf16.msrb.mxu1 %v6112_v3  ;;  %v3885_v5 = vpop.f32.mrf.mxu3  ;;  %v3861_v7 = vpop.f32.mrf.mxu1  ;;  %v6587_v3 = vld [vmem:[#allocation2 + $0x42c] sm:$0xf]  ;;  %v3873_v49 = vadd.f32 %v3872_v0, %v3860_v42 }
 0x23e   : > { %4124 = vmatpush.bf16.msrb.mxu2 %v6240_v11  ;;  %v5901_v11 = vld [vmem:[#allocation2 + $0x438] sm:$0xf0] }
 0x23f   : > { %4137 = vmatpush.bf16.msrb.mxu3 %v6368_v16  ;;  %v6651_v16 = vld [vmem:[#allocation2 + $0x62c] sm:$0xf]  ;;  %v5904_v21 = vor.u32 %v6587_v3, %v5901_v11  ;;  %v3886_v36 = vadd.f32 %v3885_v5, %v3873_v49 }
 0x240   : > { %4099 = vmatpush.bf16.msrb.mxu0 %v5968_v20  ;;  %v6160_v20 = vor.u32 %v6651_v16, %v6157_v17 }
 0x241   : > { %4112 = vmatpush.bf16.msrb.mxu1 %v6096_v27  ;;  %v6583_v27 = vld [vmem:[#allocation2 + $0x40c] sm:$0xf] }
 0x242   : > { %4125 = vmatpush.bf16.msrb.mxu2 %v6224_v48  ;;  %v5885_v48 = vld [vmem:[#allocation2 + $0x418] sm:$0xf0] }
 0x243   : > { %4138 = vmatpush.bf16.msrb.mxu3 %v6352_v50  ;;  %v6013_v50 = vld [vmem:[#allocation2 + $0x518] sm:$0xf0] }
 0x244   : > { %4100 = vmatpush.bf16.msrb.mxu0 %v5952_v13  ;;  %v3874_v25 = vpop.f32.mrf.mxu2  ;;  %v5888_v13 = vor.u32 %v6583_v27, %v5885_v48 }
 0x245   : > { %4113 = vmatpush.bf16.msrb.mxu1 %v6080_v56  ;;  %v3887_v35 = vpop.f32.mrf.mxu3  ;;  %v6016_v56 = vor.u32 %v6615_v31, %v6013_v50 }
 0x246   : > { %4126 = vmatpush.bf16.msrb.mxu2 %v6208_v39  ;;  %v6144_v39 = vor.u32 %v6647_v34, %v6141_v29 }
 0x247   : > { %4139 = vmatpush.bf16.msrb.mxu3 %v6336_v44 }
 0x248   : > { %4101 = vmatpush.bf16.msrb.mxu0 %v5936_v54 }
 0x249   : > { %4114 = vmatpush.bf16.msrb.mxu1 %v6064_v55 }
 0x24a   : > { %4127 = vmatpush.bf16.msrb.mxu2 %v6192_v58 }
 0x24b   : > { %4140 = vmatpush.bf16.msrb.mxu3 %v6320_v63 }
 0x24c   : > { %4102 = vmatpush.bf16.msrb.mxu0 %v5920_v8 }
 0x24d   : > { %4115 = vmatpush.bf16.msrb.mxu1 %v6048_v9 }
 0x24e   : > { %4128 = vmatpush.bf16.msrb.mxu2 %v6176_v10 }
 0x24f   : > { %4141 = vmatpush.bf16.msrb.mxu3 %v6304_v28 }
 0x250   : > { %4103 = vmatpush.bf16.msrb.mxu0 %v5904_v21 }
 0x251   : > { %4116 = vmatpush.bf16.msrb.mxu1 %v6032_v26 }
 0x252   : > { %4129 = vmatpush.bf16.msrb.mxu2 %v6160_v20 }
 0x253   : > { %4142 = vmatpush.bf16.msrb.mxu3 %v6288_v32 }
 0x254   : > { %4104 = vmatpush.bf16.msrb.mxu0 %v5888_v13  ;;  %v3898_v33 = vpop.f32.mrf.mxu0 }
 0x255   : > { %4117 = vmatpush.bf16.msrb.mxu1 %v6016_v56  ;;  %v3911_v44 = vpop.f32.mrf.mxu1  ;;  %v3899_v45 = vadd.f32 %v3898_v33, %v3886_v36 }
 0x256   : > { %4130 = vmatpush.bf16.msrb.mxu2 %v6144_v39 }
 0x257   : > { %4143 = vmatpush.bf16.msrb.mxu3 %v6272_v40  ;;  %6442 = vmatmul.msk.bf16.vlgmr.msrb.gmra.mxu0 %vm7325_vm12, %v7169_v24  ;;  %v3912_v14 = vadd.f32 %v3911_v44, %v3899_v45 }
 0x258   : > { %6444 = vmatmul.msk.bf16.vlgmr.msrb.gmra.mxu1 %vm7335_vm13, %v7169_v24 }
 0x259   : > { %6446 = vmatmul.msk.bf16.vlgmr.msrb.gmra.mxu2 %vm7345_vm14, %v7169_v24 }
 0x25a   : > { %6448 = vmatmul.msk.bf16.vlgmr.msrb.gmra.mxu3 %vm7355_vm15, %v7169_v24 }
 0x25c   : > { %v3924_v57 = vpop.f32.mrf.mxu2  ;;  %v3900_v18 = vpop.f32.mrf.mxu0 }
 0x25d   : > { %v3925_v46 = vadd.f32 %v3924_v57, %v3912_v14  ;;  %v3937_v47 = vpop.f32.mrf.mxu3  ;;  %v3913_v52 = vpop.f32.mrf.mxu1 }
 0x25f   : > { %v3938_v54 = vadd.f32 %v3937_v47, %v3925_v46 }
 0x261   : > { %v4150_v55 = vmul.f32 22.627417, %v3938_v54 }
 0x263   : > { %4154 = vst [vmem:[%s7542_s26 + $0x8] sm:$0xff] %v4150_v55 }
 0x264   : > { %v3926_v23 = vpop.f32.mrf.mxu2 }
 0x265   : > { %v3939_v58 = vpop.f32.mrf.mxu3 }
 0x274   : > { %v3950_v59 = vpop.f32.mrf.mxu0 }
 0x275   : > { %v3963_v60 = vpop.f32.mrf.mxu1  ;;  %v3951_v2 = vadd.f32 %v3950_v59, %v7468_v53 }
 0x277   : > { %v3964_v4 = vadd.f32 %v3963_v60, %v3951_v2 }
 0x27c   : > { %v3976_v62 = vpop.f32.mrf.mxu2  ;;  %v3952_v24 = vpop.f32.mrf.mxu0 }
 0x27d   : > { %v3989_v30 = vpop.f32.mrf.mxu3  ;;  %v3965_v63 = vpop.f32.mrf.mxu1  ;;  %v3977_v5 = vadd.f32 %v3976_v62, %v3964_v4 }
 0x27f   : > { %v3990_v43 = vadd.f32 %v3989_v30, %v3977_v5 }
 0x284   : > { %v3978_v0 = vpop.f32.mrf.mxu2 }
 0x285   : > { %v3991_v1 = vpop.f32.mrf.mxu3 }
 0x294   : > { %v4002_v22 = vpop.f32.mrf.mxu0 }
 0x295   : > { %v4015_v6 = vpop.f32.mrf.mxu1  ;;  %v4003_v7 = vadd.f32 %v4002_v22, %v3990_v43 }
 0x297   : > { %v4016_v8 = vadd.f32 %v4015_v6, %v4003_v7 }
 0x29c   : > { %v4028_v9 = vpop.f32.mrf.mxu2  ;;  %v4004_v11 = vpop.f32.mrf.mxu0 }
 0x29d   : > { %v4029_v10 = vadd.f32 %v4028_v9, %v4016_v8  ;;  %v4041_v3 = vpop.f32.mrf.mxu3  ;;  %v4017_v12 = vpop.f32.mrf.mxu1 }
 0x29f   : > { %v4042_v28 = vadd.f32 %v4041_v3, %v4029_v10 }
 0x2a1   : > { %v4151_v15 = vmul.f32 22.627417, %v4042_v28 }
 0x2a3   : > { %4155 = vst [vmem:[%s7542_s26 + $0x10] sm:$0xff] %v4151_v15 }
 0x2a4   : > { %v4030_v16 = vpop.f32.mrf.mxu2 }
 0x2a5   : > { %v4043_v17 = vpop.f32.mrf.mxu3 }
 0x2b4   : > { %v4054_v51 = vpop.f32.mrf.mxu0 }
 0x2b5   : > { %v4067_v53 = vpop.f32.mrf.mxu1  ;;  %v4055_v31 = vadd.f32 %v4054_v51, %v7497_v61 }
 0x2b7   : > { %v4068_v32 = vadd.f32 %v4067_v53, %v4055_v31 }
 0x2bc   : > { %v4080_v19 = vpop.f32.mrf.mxu2  ;;  %v4056_v26 = vpop.f32.mrf.mxu0 }
 0x2bd   : > { %v4093_v21 = vpop.f32.mrf.mxu3  ;;  %v4069_v20 = vpop.f32.mrf.mxu1  ;;  %v4081_v25 = vadd.f32 %v4080_v19, %v4068_v32 }
 0x2bf   : > { %v4094_v50 = vadd.f32 %v4093_v21, %v4081_v25 }
 0x2c4   : > { %v4082_v27 = vpop.f32.mrf.mxu2 }
 0x2c5   : > { %v4095_v48 = vpop.f32.mrf.mxu3 }
 0x2d4   : > { %v4106_v34 = vpop.f32.mrf.mxu0 }
 0x2d5   : > { %v4119_v29 = vpop.f32.mrf.mxu1  ;;  %v4107_v35 = vadd.f32 %v4106_v34, %v4094_v50 }
 0x2d7   : > { %v4120_v37 = vadd.f32 %v4119_v29, %v4107_v35 }
 0x2dc   : > { %v4132_v38 = vpop.f32.mrf.mxu2  ;;  %v4108_v39 = vpop.f32.mrf.mxu0 }
 0x2dd   : > { %v4133_v13 = vadd.f32 %v4132_v38, %v4120_v37  ;;  %v4145_v56 = vpop.f32.mrf.mxu3  ;;  %v4121_v61 = vpop.f32.mrf.mxu1 }
 0x2df   : > { %v4146_v40 = vadd.f32 %v4145_v56, %v4133_v13 }
 0x2e1   : > { %v4152_v41 = vmul.f32 22.627417, %v4146_v40 }
 0x2e3   : > { %4156 = vst [vmem:[%s7542_s26 + $0x18] sm:$0xff] %v4152_v41 }
 0x2e4   : > { %v4134_v42 = vpop.f32.mrf.mxu2 }
 0x2e5   : > { %7119 = shalt.err (!%p7116_p8)
}
 0x2e6   : > { %6975 = dma.vmem_to_hbm [thread:$0]  (%p7228_p5), %s4172_s4, 512, %s4174_s5, %s4158_s16   ;;  %v4147_v49 = vpop.f32.mrf.mxu3 }
 0x2e7 PF: > { %p6992_p9 = scmp.ge.s32.totalorder %s7162_s15, 2  ;;  %s4185_s19 = sand.u32 1, %s7150_s12  }
 0x2e8   : > { %s4186_s20 = scalar_lea.sflag [#allocation4], %s4185_s19 }
 0x2e9   : > { %p6985_p10 = pnand %p6992_p9, %p7232_p6 }
 0x2eb   : > { %p6986_p11 = pneg %p6985_p10 }
 0x2ed   : > { %7145 = dma.done.wait (%p6986_p11), %s4186_s20, 512  }
 0x2ee   : > { %7147 = vsyncadd (%p6986_p11), %s4186_s20, 4294966784  ;;  %p15_p12 = scmp.ge.s32.totalorder %s7215_s18, 4   ;;  %s7638_s12 = smov %s7154_s13 }
 0x2ef   : > { %s7639_s13 = smov %s7158_s14  ;;  %s7640_s14 = smov %s7226_s21 }
 0x2f0   : > { %s7641_s15 = smov %s7215_s18  ;;  %17 = sbr.rel (!%p15_p12) target bundleno = 5 (0x5), region = 76 }
 0x2f5   :  { %4192 = vsyncpa [#allocation3], 1 }
 0x2f6   :  { %4194 = vsyncpa [#allocation3 + $0x1], 1 }
 0x2f7   :  { %4195 = vsyncpa [#allocation6], 1 }
 0x2f8   :  { %4196 = vsyncpa [#allocation4], 1 }
 0x2f9   :  { %4198 = vsyncpa [#allocation4 + $0x1], 1 }

</bundles_post_ra>
